<compile_context>
chip_gen: v5e
topology: v5e:2x2
jax: 0.10.0
libtpu: 0.0.40
codegen_flags: <defaults>
</compile_context>

<pallas_src>
import jax
import jax.numpy as jnp
import numpy as np
from jax.experimental import pallas as pl
from jax.experimental.pallas import tpu as pltpu

# ---------------- mini ViT-B/32-style config (scaled down) ----------------
B = 2                    # batch
C_IN = 3                 # RGB
IMG = 64                 # image size
PATCH = 32               # ViT-B/32 patch size
N_PATCH = (IMG // PATCH) ** 2        # 4 patches
SEQ = N_PATCH + 1                    # 5 valid tokens (class token + patches)
SEQ_PAD = 8                          # padded to the 8-sublane tile
ROWS = B * SEQ_PAD                   # 16 rows in the activation slab
D = 64                   # hidden_dim
HEADS = 4
HEAD_DIM = D // HEADS    # 16
MLP = 128                # mlp_dim
LAYERS = 2               # encoder depth (scaled down from 12)
NUM_CLASSES = 5
CPP = C_IN * PATCH * PATCH           # 3072 = flattened patch
LN_EPS = 1e-6
ATTN_SCALE = 1.0 / float(np.sqrt(HEAD_DIM))
OUT_PAD = 128            # lane-dense classifier output width (>= NUM_CLASSES+2)


# ---------------- math helpers (used both in-kernel and in the reference) ----
def _erf(x):
    # Abramowitz & Stegun 7.1.26 polynomial, |err| <= 1.5e-7 -> exact nn.GELU
    # reproduced to float32 precision.
    # TODO(synk): switch to lax.erf once its Mosaic lowering is guaranteed.
    s = jnp.where(x < 0, -1.0, 1.0)
    ax = jnp.abs(x)
    t = 1.0 / (1.0 + 0.3275911 * ax)
    poly = ((((1.061405429 * t - 1.453152027) * t + 1.421413741) * t
             - 0.284496736) * t + 0.254829592) * t
    return s * (1.0 - poly * jnp.exp(-ax * ax))


def _gelu(x):
    return 0.5 * x * (1.0 + _erf(x * 0.7071067811865476))


def _ln_noaffine(x):
    mu = jnp.mean(x, axis=-1, keepdims=True)
    var = jnp.mean(jnp.square(x - mu), axis=-1, keepdims=True)
    return (x - mu) * jax.lax.rsqrt(var + LN_EPS)


def _layernorm(x, w, b):
    return _ln_noaffine(x) * w + b


# ---------------- the Pallas kernel: full ViT forward ----------------
def vit_kernel(
    patches_ref, convw_ref, addfull_ref, mask_ref,
    wqkv_ref, bqkv_ref, wo_ref, bo_ref,
    w1_ref, b1_ref, w2_ref, b2_ref,
    headw_ref, headb_ref,
    logits_ref,
):
    f32 = jnp.float32

    # ---- patch embedding: Conv2d(k=stride=PATCH) == one bf16 matmul ----
    # patches/convw are bf16 (the only big-K matmul), accumulate in f32.
    x = jnp.dot(patches_ref[...], convw_ref[...], preferred_element_type=f32)
    # class token + conv bias + positional embedding were folded on the host
    # into one (ROWS, D) additive term; pad rows stay 0.  Dropout is identity.
    x = x + addfull_ref[...]                                     # (ROWS, D)

    # static mask: 0 within a batch block for valid keys, -1e9 for pad keys
    # and cross-batch entries (host precomputed).
    neg_mask = mask_ref[...]                                     # (ROWS, ROWS)

    for l in range(LAYERS):
        # ---- pre-LN multi-head self-attention ----
        # LN1 affine + attention scale already folded into wqkv/bqkv.
        y = _ln_noaffine(x)
        qkv = jnp.dot(y, wqkv_ref[l], preferred_element_type=f32) + bqkv_ref[l]
        heads = []
        for h in range(HEADS):
            q = qkv[:, 0 * D + h * HEAD_DIM:0 * D + (h + 1) * HEAD_DIM]
            k = qkv[:, 1 * D + h * HEAD_DIM:1 * D + (h + 1) * HEAD_DIM]
            v = qkv[:, 2 * D + h * HEAD_DIM:2 * D + (h + 1) * HEAD_DIM]
            # all batches at once: (ROWS, ROWS) scores, block-diag mask kills
            # cross-batch entries (2 matmuls/head instead of 2 per batch*head).
            s = jax.lax.dot_general(q, k, (((1,), (1,)), ((), ())),
                                    preferred_element_type=f32)
            s = s + neg_mask
            s = s - jnp.max(s, axis=-1, keepdims=True)
            p = jnp.exp(s)
            p = p * pl.reciprocal(jnp.sum(p, axis=-1, keepdims=True),
                                  approx=True)
            heads.append(jnp.dot(p, v, preferred_element_type=f32))
        ctx = jnp.concatenate(heads, axis=1)                     # (ROWS, D)
        x = x + jnp.dot(ctx, wo_ref[l], preferred_element_type=f32) + bo_ref[l]

        # ---- pre-LN MLP (Linear -> GELU(exact) -> Linear) ----
        # LN2 affine folded into w1/b1.
        y = _ln_noaffine(x)
        hid = _gelu(jnp.dot(y, w1_ref[l], preferred_element_type=f32)
                    + b1_ref[l])
        x = x + jnp.dot(hid, w2_ref[l], preferred_element_type=f32) + b2_ref[l]

    # ---- final LN (affine folded into the fused classifier) + heads ----
    # Computed for all rows so the only output store is a single unmasked,
    # lane-dense (ROWS, 128) slab; the host slices the class-token rows.
    y = _ln_noaffine(x)
    logits_ref[...] = (jnp.dot(y, headw_ref[...], preferred_element_type=f32)
                       + headb_ref[...])


# ---------------- host-side glue ----------------
def extract_patches_padded(x_nchw):
    """(B, C, H, W) -> (B*SEQ_PAD, CPP) bf16 with zero rows at class-token and
    pad positions, so x = patches @ W + addfull needs no in-kernel assembly."""
    nh = IMG // PATCH
    p = x_nchw.reshape(B, C_IN, nh, PATCH, nh, PATCH)
    p = p.transpose(0, 2, 4, 1, 3, 5).reshape(B, N_PATCH, CPP)   # (C,kh,kw)
    padded = jnp.zeros((B, SEQ_PAD, CPP), jnp.float32)
    padded = padded.at[:, 1:1 + N_PATCH, :].set(p)
    return padded.reshape(B * SEQ_PAD, CPP).astype(jnp.bfloat16)


def init_params(key):
    ki = iter(jax.random.split(key, 128))

    def nrm(shape, scale=0.02):
        return scale * jax.random.normal(next(ki), shape, dtype=jnp.float32)

    p = {}
    # conv_proj (torch layout: weight (D, C, P, P), bias (D,))
    conv_w = nrm((D, C_IN, PATCH, PATCH))
    p['conv_w_t'] = conv_w.reshape(D, CPP).T            # (CPP, D)
    p['conv_b'] = nrm((D,)).reshape(1, D)
    p['cls'] = nrm((1, D))
    p['pos'] = nrm((SEQ, D))

    per = {k: [] for k in ['ln1w', 'ln1b', 'ln2w', 'ln2b', 'in_w', 'in_b',
                           'wo', 'bo', 'w1', 'b1', 'w2', 'b2']}
    for _ in range(LAYERS):
        # non-trivial LN affines so the host-side folding is actually tested
        per['ln1w'].append(1.0 + nrm((1, D)))
        per['ln1b'].append(nrm((1, D)))
        per['ln2w'].append(1.0 + nrm((1, D)))
        per['ln2b'].append(nrm((1, D)))
        per['in_w'].append(nrm((3 * D, D)))             # torch in_proj_weight
        per['in_b'].append(nrm((3 * D,)))               # torch in_proj_bias
        per['wo'].append(nrm((D, D)).T)
        per['bo'].append(nrm((D,)).reshape(1, D))
        per['w1'].append(nrm((MLP, D)).T)
        per['b1'].append(nrm((MLP,)).reshape(1, MLP))
        per['w2'].append(nrm((D, MLP)).T)
        per['b2'].append(nrm((D,)).reshape(1, D))
    for k, v in per.items():
        p[k] = jnp.stack(v)

    p['lnfw'] = 1.0 + nrm((1, D))
    p['lnfb'] = nrm((1, D))
    p['gw_t'] = nrm((NUM_CLASSES, D)).T
    p['gb'] = nrm((NUM_CLASSES,)).reshape(1, NUM_CLASSES)
    p['hw_t'] = nrm((2, D)).T
    p['hb'] = nrm((2,)).reshape(1, 2)
    return p


def prepare_kernel_params(p):
    """Fold/fuse raw (torch-layout) params into the kernel-friendly layout."""
    kp = {}
    kp['convw'] = p['conv_w_t'].astype(jnp.bfloat16)    # bf16 MXU operand

    # additive term: class token + pos for row 0, conv_b + pos for patch rows,
    # zeros for pad rows.  Eliminates in-kernel token assembly entirely.
    add = jnp.zeros((B, SEQ_PAD, D), jnp.float32)
    add = add.at[:, 0, :].set(p['cls'][0] + p['pos'][0])
    add = add.at[:, 1:SEQ, :].set(p['conv_b'] + p['pos'][1:SEQ])
    kp['addfull'] = add.reshape(B * SEQ_PAD, D)

    # static attention mask over the (ROWS, ROWS) all-batch score matrix:
    # 0 iff same batch block and valid key, else -1e9.
    ri = np.arange(ROWS)[:, None]
    ci = np.arange(ROWS)[None, :]
    valid = (ri // SEQ_PAD == ci // SEQ_PAD) & ((ci % SEQ_PAD) < SEQ)
    kp['mask'] = jnp.asarray(np.where(valid, 0.0, -1e9), jnp.float32)

    # fused QKV weights (D, 3D) with ATTN_SCALE folded into Q and the LN1
    # affine folded into rows/bias; LN2 affine folded into W1/b1.
    wqkv, bqkv, w1s, b1s = [], [], [], []
    for l in range(LAYERS):
        in_w, in_b = p['in_w'][l], p['in_b'][l]
        wq = in_w[0:D].T * ATTN_SCALE
        wk = in_w[D:2 * D].T
        wv = in_w[2 * D:3 * D].T
        wf = jnp.concatenate([wq, wk, wv], axis=1)               # (D, 3D)
        bf = jnp.concatenate(
            [in_b[0:D] * ATTN_SCALE, in_b[D:2 * D], in_b[2 * D:3 * D]]
        ).reshape(1, 3 * D)
        g1, be1 = p['ln1w'][l], p['ln1b'][l]
        wqkv.append(g1[0][:, None] * wf)
        bqkv.append(be1 @ wf + bf)

        g2, be2 = p['ln2w'][l], p['ln2b'][l]
        w1s.append(g2[0][:, None] * p['w1'][l])
        b1s.append(be2 @ p['w1'][l] + p['b1'][l])
    kp['wqkv'] = jnp.stack(wqkv)
    kp['bqkv'] = jnp.stack(bqkv)
    kp['w1'] = jnp.stack(w1s)
    kp['b1'] = jnp.stack(b1s)

    for name in ['wo', 'bo', 'w2', 'b2']:
        kp[name] = p[name]

    # fused classifier heads + final LN affine fold, lane-padded to 128 cols.
    hw0 = jnp.concatenate([p['gw_t'], p['hw_t']], axis=1)        # (D, 7)
    hb0 = jnp.concatenate([p['gb'], p['hb']], axis=1)            # (1, 7)
    hw = p['lnfw'][0][:, None] * hw0
    hb = p['lnfb'] @ hw0 + hb0
    kp['headw'] = jnp.pad(hw, ((0, 0), (0, OUT_PAD - hw.shape[1])))
    kp['headb'] = jnp.pad(hb, ((0, 0), (0, OUT_PAD - hb.shape[1])))
    return kp


def _vit_forward(x_nchw, p):
    kp = prepare_kernel_params(p)
    patches = extract_patches_padded(x_nchw)
    args = [patches, kp['convw'], kp['addfull'], kp['mask'],
            kp['wqkv'], kp['bqkv'], kp['wo'], kp['bo'],
            kp['w1'], kp['b1'], kp['w2'], kp['b2'],
            kp['headw'], kp['headb']]
    # TODO(synk): for realistic serving batches add a batch grid with
    # dimension_semantics=("parallel",) so v7x's two TensorCores split work.
    logits = pl.pallas_call(
        vit_kernel,
        out_shape=jax.ShapeDtypeStruct((ROWS, OUT_PAD), jnp.float32),
        in_specs=[pl.BlockSpec(memory_space=pltpu.MemorySpace.VMEM)] * len(args),
        out_specs=pl.BlockSpec(memory_space=pltpu.MemorySpace.VMEM),
    )(*args)
    cls_logits = logits[0::SEQ_PAD]          # class-token row of each batch
    return {'gesture': cls_logits[:, :NUM_CLASSES],
            'leading_hand': cls_logits[:, NUM_CLASSES:NUM_CLASSES + 2]}


vit_forward = jax.jit(_vit_forward)


# ---------------- plain-JAX reference (unpadded, f32, for a sanity check) ----
def vit_reference(x_nchw, p):
    nh = IMG // PATCH
    pt = x_nchw.reshape(B, C_IN, nh, PATCH, nh, PATCH)
    pt = pt.transpose(0, 2, 4, 1, 3, 5).reshape(B, N_PATCH, CPP)
    emb = pt @ p['conv_w_t'] + p['conv_b']                       # (B, NP, D)
    cls = jnp.broadcast_to(p['cls'], (B, 1, D))
    x = jnp.concatenate([cls, emb], axis=1) + p['pos'][None]     # (B, SEQ, D)
    for l in range(LAYERS):
        y = _layernorm(x, p['ln1w'][l], p['ln1b'][l])
        in_w, in_b = p['in_w'][l], p['in_b'][l]
        q = y @ in_w[0:D].T + in_b[0:D]
        k = y @ in_w[D:2 * D].T + in_b[D:2 * D]
        v = y @ in_w[2 * D:3 * D].T + in_b[2 * D:3 * D]
        q = q.reshape(B, SEQ, HEADS, HEAD_DIM).transpose(0, 2, 1, 3)
        k = k.reshape(B, SEQ, HEADS, HEAD_DIM).transpose(0, 2, 1, 3)
        v = v.reshape(B, SEQ, HEADS, HEAD_DIM).transpose(0, 2, 1, 3)
        s = jnp.einsum('bhqd,bhkd->bhqk', q * ATTN_SCALE, k)
        pr = jax.nn.softmax(s, axis=-1)
        ctx = jnp.einsum('bhqk,bhkd->bhqd', pr, v)
        ctx = ctx.transpose(0, 2, 1, 3).reshape(B, SEQ, D)
        x = x + ctx @ p['wo'][l] + p['bo'][l]
        y = _layernorm(x, p['ln2w'][l], p['ln2b'][l])
        x = x + _gelu(y @ p['w1'][l] + p['b1'][l]) @ p['w2'][l] + p['b2'][l]
    x = _layernorm(x, p['lnfw'], p['lnfb'])
    x0 = x[:, 0]
    return x0 @ p['gw_t'] + p['gb'], x0 @ p['hw_t'] + p['hb']


if __name__ == "__main__":
    key = jax.random.PRNGKey(0)
    kx, kparam = jax.random.split(key)
    x = jax.random.normal(kx, (B, C_IN, IMG, IMG), dtype=jnp.float32)
    params = init_params(kparam)

    out = vit_forward(x, params)
    jax.block_until_ready(out)

    g_ref, h_ref = vit_reference(x, params)
    assert jnp.max(jnp.abs(out['gesture'] - g_ref)) < 5e-2
    assert jnp.max(jnp.abs(out['leading_hand'] - h_ref)) < 5e-2

    print("KERNEL_OK")
</pallas_src>

<mosaic_0001>
module attributes {stable_mosaic.version = 11 : i64} {
  func.func @vit_kernel(%arg0: memref<16x3072xbf16, #tpu.memory_space<vmem>>, %arg1: memref<3072x64xbf16, #tpu.memory_space<vmem>>, %arg2: memref<16x64xf32, #tpu.memory_space<vmem>>, %arg3: memref<16x16xf32, #tpu.memory_space<vmem>>, %arg4: memref<2x64x192xf32, #tpu.memory_space<vmem>>, %arg5: memref<2x1x192xf32, #tpu.memory_space<vmem>>, %arg6: memref<2x64x64xf32, #tpu.memory_space<vmem>>, %arg7: memref<2x1x64xf32, #tpu.memory_space<vmem>>, %arg8: memref<2x64x128xf32, #tpu.memory_space<vmem>>, %arg9: memref<2x1x128xf32, #tpu.memory_space<vmem>>, %arg10: memref<2x128x64xf32, #tpu.memory_space<vmem>>, %arg11: memref<2x1x64xf32, #tpu.memory_space<vmem>>, %arg12: memref<64x128xf32, #tpu.memory_space<vmem>>, %arg13: memref<1x128xf32, #tpu.memory_space<vmem>>, %arg14: memref<16x128xf32, #tpu.memory_space<vmem>>) attributes {dimension_semantics = [], scalar_prefetch = 0 : i64, scratch_operands = 0 : i64, tpu.core_type = #tpu.core_type<tc>} {
    %c0 = arith.constant 0 : index
    %c0_0 = arith.constant 0 : index
    %0 = vector.load %arg0[%c0, %c0_0] : memref<16x3072xbf16, #tpu.memory_space<vmem>>, vector<16x3072xbf16>
    %c0_1 = arith.constant 0 : index
    %c0_2 = arith.constant 0 : index
    %1 = vector.load %arg1[%c0_1, %c0_2] : memref<3072x64xbf16, #tpu.memory_space<vmem>>, vector<3072x64xbf16>
    %cst = arith.constant dense<0.000000e+00> : vector<16x64xf32>
    %2 = tpu.matmul %0, %1, %cst {dimension_numbers = #tpu.dot_dimension_numbers<[1], [0], [0], [1], [0, 0, 1, 1], [], []>} : vector<16x3072xbf16>, vector<3072x64xbf16>, vector<16x64xf32> -> vector<16x64xf32>
    %c0_3 = arith.constant 0 : index
    %c0_4 = arith.constant 0 : index
    %3 = vector.load %arg2[%c0_3, %c0_4] : memref<16x64xf32, #tpu.memory_space<vmem>>, vector<16x64xf32>
    %4 = arith.addf %2, %3 : vector<16x64xf32>
    %c0_5 = arith.constant 0 : index
    %c0_6 = arith.constant 0 : index
    %5 = vector.load %arg3[%c0_5, %c0_6] : memref<16x16xf32, #tpu.memory_space<vmem>>, vector<16x16xf32>
    %cst_7 = arith.constant dense<0.000000e+00> : vector<16xf32>
    %6 = vector.multi_reduction <add>, %4, %cst_7 [1] : vector<16x64xf32> to vector<16xf32>
    %7 = vector.shape_cast %6 : vector<16xf32> to vector<16x1xf32>
    %cst_8 = arith.constant 6.400000e+01 : f32
    %8 = vector.broadcast %cst_8 : f32 to vector<16x1xf32>
    %9 = arith.divf %7, %8 : vector<16x1xf32>
    %10 = vector.broadcast %9 : vector<16x1xf32> to vector<16x64xf32>
    %11 = arith.subf %4, %10 : vector<16x64xf32>
    %12 = arith.mulf %11, %11 : vector<16x64xf32>
    %cst_9 = arith.constant dense<0.000000e+00> : vector<16xf32>
    %13 = vector.multi_reduction <add>, %12, %cst_9 [1] : vector<16x64xf32> to vector<16xf32>
    %14 = vector.shape_cast %13 : vector<16xf32> to vector<16x1xf32>
    %cst_10 = arith.constant 6.400000e+01 : f32
    %15 = vector.broadcast %cst_10 : f32 to vector<16x1xf32>
    %16 = arith.divf %14, %15 : vector<16x1xf32>
    %17 = vector.broadcast %9 : vector<16x1xf32> to vector<16x64xf32>
    %18 = arith.subf %4, %17 : vector<16x64xf32>
    %cst_11 = arith.constant 9.99999997E-7 : f32
    %19 = vector.broadcast %cst_11 : f32 to vector<16x1xf32>
    %20 = arith.addf %16, %19 : vector<16x1xf32>
    %21 = math.rsqrt %20 : vector<16x1xf32>
    %22 = vector.broadcast %21 : vector<16x1xf32> to vector<16x64xf32>
    %23 = arith.mulf %18, %22 : vector<16x64xf32>
    %c0_12 = arith.constant 0 : index
    %c0_13 = arith.constant 0 : index
    %c0_14 = arith.constant 0 : index
    %24 = vector.load %arg4[%c0_12, %c0_13, %c0_14] : memref<2x64x192xf32, #tpu.memory_space<vmem>>, vector<1x64x192xf32>
    %25 = vector.shape_cast %24 : vector<1x64x192xf32> to vector<64x192xf32>
    %cst_15 = arith.constant dense<0.000000e+00> : vector<16x192xf32>
    %26 = tpu.matmul %23, %25, %cst_15 {dimension_numbers = #tpu.dot_dimension_numbers<[1], [0], [0], [1], [0, 0, 1, 1], [], []>} : vector<16x64xf32>, vector<64x192xf32>, vector<16x192xf32> -> vector<16x192xf32>
    %c0_16 = arith.constant 0 : index
    %c0_17 = arith.constant 0 : index
    %c0_18 = arith.constant 0 : index
    %27 = vector.load %arg5[%c0_16, %c0_17, %c0_18] : memref<2x1x192xf32, #tpu.memory_space<vmem>>, vector<1x1x192xf32>
    %28 = vector.shape_cast %27 : vector<1x1x192xf32> to vector<1x192xf32>
    %29 = vector.broadcast %28 : vector<1x192xf32> to vector<16x192xf32>
    %30 = arith.addf %26, %29 : vector<16x192xf32>
    %31 = vector.extract_strided_slice %30 {offsets = [0, 0], sizes = [16, 16], strides = [1, 1]} : vector<16x192xf32> to vector<16x16xf32>
    %32 = vector.extract_strided_slice %30 {offsets = [0, 64], sizes = [16, 16], strides = [1, 1]} : vector<16x192xf32> to vector<16x16xf32>
    %33 = vector.extract_strided_slice %30 {offsets = [0, 128], sizes = [16, 16], strides = [1, 1]} : vector<16x192xf32> to vector<16x16xf32>
    %cst_19 = arith.constant dense<0.000000e+00> : vector<16x16xf32>
    %34 = tpu.matmul %31, %32, %cst_19 {dimension_numbers = #tpu.dot_dimension_numbers<[1], [1], [0], [0], [0, 0, 1, 0], [], []>} : vector<16x16xf32>, vector<16x16xf32>, vector<16x16xf32> -> vector<16x16xf32>
    %35 = arith.addf %34, %5 : vector<16x16xf32>
    %cst_20 = arith.constant dense<0xFF800000> : vector<16xf32>
    %36 = vector.multi_reduction <maximumf>, %35, %cst_20 [1] : vector<16x16xf32> to vector<16xf32>
    %37 = vector.shape_cast %36 : vector<16xf32> to vector<16x1xf32>
    %38 = vector.broadcast %37 : vector<16x1xf32> to vector<16x16xf32>
    %39 = arith.subf %35, %38 : vector<16x16xf32>
    %40 = math.exp %39 : vector<16x16xf32>
    %cst_21 = arith.constant dense<0.000000e+00> : vector<16xf32>
    %41 = vector.multi_reduction <add>, %40, %cst_21 [1] : vector<16x16xf32> to vector<16xf32>
    %42 = vector.shape_cast %41 : vector<16xf32> to vector<16x1xf32>
    %43 = tpu.reciprocal %42 {approx = true} : vector<16x1xf32> -> vector<16x1xf32>
    %44 = vector.broadcast %43 : vector<16x1xf32> to vector<16x16xf32>
    %45 = arith.mulf %40, %44 : vector<16x16xf32>
    %cst_22 = arith.constant dense<0.000000e+00> : vector<16x16xf32>
    %46 = tpu.matmul %45, %33, %cst_22 {dimension_numbers = #tpu.dot_dimension_numbers<[1], [0], [0], [1], [0, 0, 1, 1], [], []>} : vector<16x16xf32>, vector<16x16xf32>, vector<16x16xf32> -> vector<16x16xf32>
    %47 = vector.extract_strided_slice %30 {offsets = [0, 16], sizes = [16, 16], strides = [1, 1]} : vector<16x192xf32> to vector<16x16xf32>
    %48 = vector.extract_strided_slice %30 {offsets = [0, 80], sizes = [16, 16], strides = [1, 1]} : vector<16x192xf32> to vector<16x16xf32>
    %49 = vector.extract_strided_slice %30 {offsets = [0, 144], sizes = [16, 16], strides = [1, 1]} : vector<16x192xf32> to vector<16x16xf32>
    %cst_23 = arith.constant dense<0.000000e+00> : vector<16x16xf32>
    %50 = tpu.matmul %47, %48, %cst_23 {dimension_numbers = #tpu.dot_dimension_numbers<[1], [1], [0], [0], [0, 0, 1, 0], [], []>} : vector<16x16xf32>, vector<16x16xf32>, vector<16x16xf32> -> vector<16x16xf32>
    %51 = arith.addf %50, %5 : vector<16x16xf32>
    %cst_24 = arith.constant dense<0xFF800000> : vector<16xf32>
    %52 = vector.multi_reduction <maximumf>, %51, %cst_24 [1] : vector<16x16xf32> to vector<16xf32>
    %53 = vector.shape_cast %52 : vector<16xf32> to vector<16x1xf32>
    %54 = vector.broadcast %53 : vector<16x1xf32> to vector<16x16xf32>
    %55 = arith.subf %51, %54 : vector<16x16xf32>
    %56 = math.exp %55 : vector<16x16xf32>
    %cst_25 = arith.constant dense<0.000000e+00> : vector<16xf32>
    %57 = vector.multi_reduction <add>, %56, %cst_25 [1] : vector<16x16xf32> to vector<16xf32>
    %58 = vector.shape_cast %57 : vector<16xf32> to vector<16x1xf32>
    %59 = tpu.reciprocal %58 {approx = true} : vector<16x1xf32> -> vector<16x1xf32>
    %60 = vector.broadcast %59 : vector<16x1xf32> to vector<16x16xf32>
    %61 = arith.mulf %56, %60 : vector<16x16xf32>
    %cst_26 = arith.constant dense<0.000000e+00> : vector<16x16xf32>
    %62 = tpu.matmul %61, %49, %cst_26 {dimension_numbers = #tpu.dot_dimension_numbers<[1], [0], [0], [1], [0, 0, 1, 1], [], []>} : vector<16x16xf32>, vector<16x16xf32>, vector<16x16xf32> -> vector<16x16xf32>
    %63 = vector.extract_strided_slice %30 {offsets = [0, 32], sizes = [16, 16], strides = [1, 1]} : vector<16x192xf32> to vector<16x16xf32>
    %64 = vector.extract_strided_slice %30 {offsets = [0, 96], sizes = [16, 16], strides = [1, 1]} : vector<16x192xf32> to vector<16x16xf32>
    %65 = vector.extract_strided_slice %30 {offsets = [0, 160], sizes = [16, 16], strides = [1, 1]} : vector<16x192xf32> to vector<16x16xf32>
    %cst_27 = arith.constant dense<0.000000e+00> : vector<16x16xf32>
    %66 = tpu.matmul %63, %64, %cst_27 {dimension_numbers = #tpu.dot_dimension_numbers<[1], [1], [0], [0], [0, 0, 1, 0], [], []>} : vector<16x16xf32>, vector<16x16xf32>, vector<16x16xf32> -> vector<16x16xf32>
    %67 = arith.addf %66, %5 : vector<16x16xf32>
    %cst_28 = arith.constant dense<0xFF800000> : vector<16xf32>
    %68 = vector.multi_reduction <maximumf>, %67, %cst_28 [1] : vector<16x16xf32> to vector<16xf32>
    %69 = vector.shape_cast %68 : vector<16xf32> to vector<16x1xf32>
    %70 = vector.broadcast %69 : vector<16x1xf32> to vector<16x16xf32>
    %71 = arith.subf %67, %70 : vector<16x16xf32>
    %72 = math.exp %71 : vector<16x16xf32>
    %cst_29 = arith.constant dense<0.000000e+00> : vector<16xf32>
    %73 = vector.multi_reduction <add>, %72, %cst_29 [1] : vector<16x16xf32> to vector<16xf32>
    %74 = vector.shape_cast %73 : vector<16xf32> to vector<16x1xf32>
    %75 = tpu.reciprocal %74 {approx = true} : vector<16x1xf32> -> vector<16x1xf32>
    %76 = vector.broadcast %75 : vector<16x1xf32> to vector<16x16xf32>
    %77 = arith.mulf %72, %76 : vector<16x16xf32>
    %cst_30 = arith.constant dense<0.000000e+00> : vector<16x16xf32>
    %78 = tpu.matmul %77, %65, %cst_30 {dimension_numbers = #tpu.dot_dimension_numbers<[1], [0], [0], [1], [0, 0, 1, 1], [], []>} : vector<16x16xf32>, vector<16x16xf32>, vector<16x16xf32> -> vector<16x16xf32>
    %79 = vector.extract_strided_slice %30 {offsets = [0, 48], sizes = [16, 16], strides = [1, 1]} : vector<16x192xf32> to vector<16x16xf32>
    %80 = vector.extract_strided_slice %30 {offsets = [0, 112], sizes = [16, 16], strides = [1, 1]} : vector<16x192xf32> to vector<16x16xf32>
    %81 = vector.extract_strided_slice %30 {offsets = [0, 176], sizes = [16, 16], strides = [1, 1]} : vector<16x192xf32> to vector<16x16xf32>
    %cst_31 = arith.constant dense<0.000000e+00> : vector<16x16xf32>
    %82 = tpu.matmul %79, %80, %cst_31 {dimension_numbers = #tpu.dot_dimension_numbers<[1], [1], [0], [0], [0, 0, 1, 0], [], []>} : vector<16x16xf32>, vector<16x16xf32>, vector<16x16xf32> -> vector<16x16xf32>
    %83 = arith.addf %82, %5 : vector<16x16xf32>
    %cst_32 = arith.constant dense<0xFF800000> : vector<16xf32>
    %84 = vector.multi_reduction <maximumf>, %83, %cst_32 [1] : vector<16x16xf32> to vector<16xf32>
    %85 = vector.shape_cast %84 : vector<16xf32> to vector<16x1xf32>
    %86 = vector.broadcast %85 : vector<16x1xf32> to vector<16x16xf32>
    %87 = arith.subf %83, %86 : vector<16x16xf32>
    %88 = math.exp %87 : vector<16x16xf32>
    %cst_33 = arith.constant dense<0.000000e+00> : vector<16xf32>
    %89 = vector.multi_reduction <add>, %88, %cst_33 [1] : vector<16x16xf32> to vector<16xf32>
    %90 = vector.shape_cast %89 : vector<16xf32> to vector<16x1xf32>
    %91 = tpu.reciprocal %90 {approx = true} : vector<16x1xf32> -> vector<16x1xf32>
    %92 = vector.broadcast %91 : vector<16x1xf32> to vector<16x16xf32>
    %93 = arith.mulf %88, %92 : vector<16x16xf32>
    %cst_34 = arith.constant dense<0.000000e+00> : vector<16x16xf32>
    %94 = tpu.matmul %93, %81, %cst_34 {dimension_numbers = #tpu.dot_dimension_numbers<[1], [0], [0], [1], [0, 0, 1, 1], [], []>} : vector<16x16xf32>, vector<16x16xf32>, vector<16x16xf32> -> vector<16x16xf32>
    %95 = tpu.concatenate %46, %62, %78, %94 in 1 : vector<16x16xf32>, vector<16x16xf32>, vector<16x16xf32>, vector<16x16xf32> -> vector<16x64xf32>
    %c0_35 = arith.constant 0 : index
    %c0_36 = arith.constant 0 : index
    %c0_37 = arith.constant 0 : index
    %96 = vector.load %arg6[%c0_35, %c0_36, %c0_37] : memref<2x64x64xf32, #tpu.memory_space<vmem>>, vector<1x64x64xf32>
    %97 = vector.shape_cast %96 : vector<1x64x64xf32> to vector<64x64xf32>
    %cst_38 = arith.constant dense<0.000000e+00> : vector<16x64xf32>
    %98 = tpu.matmul %95, %97, %cst_38 {dimension_numbers = #tpu.dot_dimension_numbers<[1], [0], [0], [1], [0, 0, 1, 1], [], []>} : vector<16x64xf32>, vector<64x64xf32>, vector<16x64xf32> -> vector<16x64xf32>
    %99 = arith.addf %4, %98 : vector<16x64xf32>
    %c0_39 = arith.constant 0 : index
    %c0_40 = arith.constant 0 : index
    %c0_41 = arith.constant 0 : index
    %100 = vector.load %arg7[%c0_39, %c0_40, %c0_41] : memref<2x1x64xf32, #tpu.memory_space<vmem>>, vector<1x1x64xf32>
    %101 = vector.shape_cast %100 : vector<1x1x64xf32> to vector<1x64xf32>
    %102 = vector.broadcast %101 : vector<1x64xf32> to vector<16x64xf32>
    %103 = arith.addf %99, %102 : vector<16x64xf32>
    %cst_42 = arith.constant dense<0.000000e+00> : vector<16xf32>
    %104 = vector.multi_reduction <add>, %103, %cst_42 [1] : vector<16x64xf32> to vector<16xf32>
    %105 = vector.shape_cast %104 : vector<16xf32> to vector<16x1xf32>
    %cst_43 = arith.constant 6.400000e+01 : f32
    %106 = vector.broadcast %cst_43 : f32 to vector<16x1xf32>
    %107 = arith.divf %105, %106 : vector<16x1xf32>
    %108 = vector.broadcast %107 : vector<16x1xf32> to vector<16x64xf32>
    %109 = arith.subf %103, %108 : vector<16x64xf32>
    %110 = arith.mulf %109, %109 : vector<16x64xf32>
    %cst_44 = arith.constant dense<0.000000e+00> : vector<16xf32>
    %111 = vector.multi_reduction <add>, %110, %cst_44 [1] : vector<16x64xf32> to vector<16xf32>
    %112 = vector.shape_cast %111 : vector<16xf32> to vector<16x1xf32>
    %cst_45 = arith.constant 6.400000e+01 : f32
    %113 = vector.broadcast %cst_45 : f32 to vector<16x1xf32>
    %114 = arith.divf %112, %113 : vector<16x1xf32>
    %115 = vector.broadcast %107 : vector<16x1xf32> to vector<16x64xf32>
    %116 = arith.subf %103, %115 : vector<16x64xf32>
    %cst_46 = arith.constant 9.99999997E-7 : f32
    %117 = vector.broadcast %cst_46 : f32 to vector<16x1xf32>
    %118 = arith.addf %114, %117 : vector<16x1xf32>
    %119 = math.rsqrt %118 : vector<16x1xf32>
    %120 = vector.broadcast %119 : vector<16x1xf32> to vector<16x64xf32>
    %121 = arith.mulf %116, %120 : vector<16x64xf32>
    %c0_47 = arith.constant 0 : index
    %c0_48 = arith.constant 0 : index
    %c0_49 = arith.constant 0 : index
    %122 = vector.load %arg8[%c0_47, %c0_48, %c0_49] : memref<2x64x128xf32, #tpu.memory_space<vmem>>, vector<1x64x128xf32>
    %123 = vector.shape_cast %122 : vector<1x64x128xf32> to vector<64x128xf32>
    %cst_50 = arith.constant dense<0.000000e+00> : vector<16x128xf32>
    %124 = tpu.matmul %121, %123, %cst_50 {dimension_numbers = #tpu.dot_dimension_numbers<[1], [0], [0], [1], [0, 0, 1, 1], [], []>} : vector<16x64xf32>, vector<64x128xf32>, vector<16x128xf32> -> vector<16x128xf32>
    %c0_51 = arith.constant 0 : index
    %c0_52 = arith.constant 0 : index
    %c0_53 = arith.constant 0 : index
    %125 = vector.load %arg9[%c0_51, %c0_52, %c0_53] : memref<2x1x128xf32, #tpu.memory_space<vmem>>, vector<1x1x128xf32>
    %126 = vector.shape_cast %125 : vector<1x1x128xf32> to vector<1x128xf32>
    %127 = vector.broadcast %126 : vector<1x128xf32> to vector<16x128xf32>
    %128 = arith.addf %124, %127 : vector<16x128xf32>
    %cst_54 = arith.constant 5.000000e-01 : f32
    %129 = vector.broadcast %cst_54 : f32 to vector<16x128xf32>
    %130 = arith.mulf %129, %128 : vector<16x128xf32>
    %cst_55 = arith.constant 0.707106769 : f32
    %131 = vector.broadcast %cst_55 : f32 to vector<16x128xf32>
    %132 = arith.mulf %128, %131 : vector<16x128xf32>
    %cst_56 = arith.constant 0.000000e+00 : f32
    %133 = vector.broadcast %cst_56 : f32 to vector<16x128xf32>
    %134 = arith.cmpf olt, %132, %133 : vector<16x128xf32>
    %cst_57 = arith.constant -1.000000e+00 : f32
    %cst_58 = arith.constant 1.000000e+00 : f32
    %135 = vector.broadcast %cst_57 : f32 to vector<16x128xf32>
    %136 = vector.broadcast %cst_58 : f32 to vector<16x128xf32>
    %137 = arith.select %134, %135, %136 : vector<16x128xi1>, vector<16x128xf32>
    %138 = math.absf %132 : vector<16x128xf32>
    %cst_59 = arith.constant 0.327591091 : f32
    %139 = vector.broadcast %cst_59 : f32 to vector<16x128xf32>
    %140 = arith.mulf %139, %138 : vector<16x128xf32>
    %cst_60 = arith.constant 1.000000e+00 : f32
    %141 = vector.broadcast %cst_60 : f32 to vector<16x128xf32>
    %142 = arith.addf %141, %140 : vector<16x128xf32>
    %cst_61 = arith.constant 1.000000e+00 : f32
    %143 = vector.broadcast %cst_61 : f32 to vector<16x128xf32>
    %144 = arith.divf %143, %142 : vector<16x128xf32>
    %cst_62 = arith.constant 1.06140542 : f32
    %145 = vector.broadcast %cst_62 : f32 to vector<16x128xf32>
    %146 = arith.mulf %145, %144 : vector<16x128xf32>
    %cst_63 = arith.constant 1.45315206 : f32
    %147 = vector.broadcast %cst_63 : f32 to vector<16x128xf32>
    %148 = arith.subf %146, %147 : vector<16x128xf32>
    %149 = arith.mulf %148, %144 : vector<16x128xf32>
    %cst_64 = arith.constant 1.42141378 : f32
    %150 = vector.broadcast %cst_64 : f32 to vector<16x128xf32>
    %151 = arith.addf %149, %150 : vector<16x128xf32>
    %152 = arith.mulf %151, %144 : vector<16x128xf32>
    %cst_65 = arith.constant 0.284496725 : f32
    %153 = vector.broadcast %cst_65 : f32 to vector<16x128xf32>
    %154 = arith.subf %152, %153 : vector<16x128xf32>
    %155 = arith.mulf %154, %144 : vector<16x128xf32>
    %cst_66 = arith.constant 0.254829586 : f32
    %156 = vector.broadcast %cst_66 : f32 to vector<16x128xf32>
    %157 = arith.addf %155, %156 : vector<16x128xf32>
    %158 = arith.mulf %157, %144 : vector<16x128xf32>
    %cst_67 = arith.constant 0.000000e+00 : f32
    %159 = vector.broadcast %cst_67 : f32 to vector<16x128xf32>
    %160 = arith.subf %159, %138 : vector<16x128xf32>
    %161 = arith.mulf %160, %138 : vector<16x128xf32>
    %162 = math.exp %161 : vector<16x128xf32>
    %163 = arith.mulf %158, %162 : vector<16x128xf32>
    %cst_68 = arith.constant 1.000000e+00 : f32
    %164 = vector.broadcast %cst_68 : f32 to vector<16x128xf32>
    %165 = arith.subf %164, %163 : vector<16x128xf32>
    %166 = arith.mulf %137, %165 : vector<16x128xf32>
    %cst_69 = arith.constant 1.000000e+00 : f32
    %167 = vector.broadcast %cst_69 : f32 to vector<16x128xf32>
    %168 = arith.addf %167, %166 : vector<16x128xf32>
    %169 = arith.mulf %130, %168 : vector<16x128xf32>
    %c0_70 = arith.constant 0 : index
    %c0_71 = arith.constant 0 : index
    %c0_72 = arith.constant 0 : index
    %170 = vector.load %arg10[%c0_70, %c0_71, %c0_72] : memref<2x128x64xf32, #tpu.memory_space<vmem>>, vector<1x128x64xf32>
    %171 = vector.shape_cast %170 : vector<1x128x64xf32> to vector<128x64xf32>
    %cst_73 = arith.constant dense<0.000000e+00> : vector<16x64xf32>
    %172 = tpu.matmul %169, %171, %cst_73 {dimension_numbers = #tpu.dot_dimension_numbers<[1], [0], [0], [1], [0, 0, 1, 1], [], []>} : vector<16x128xf32>, vector<128x64xf32>, vector<16x64xf32> -> vector<16x64xf32>
    %173 = arith.addf %103, %172 : vector<16x64xf32>
    %c0_74 = arith.constant 0 : index
    %c0_75 = arith.constant 0 : index
    %c0_76 = arith.constant 0 : index
    %174 = vector.load %arg11[%c0_74, %c0_75, %c0_76] : memref<2x1x64xf32, #tpu.memory_space<vmem>>, vector<1x1x64xf32>
    %175 = vector.shape_cast %174 : vector<1x1x64xf32> to vector<1x64xf32>
    %176 = vector.broadcast %175 : vector<1x64xf32> to vector<16x64xf32>
    %177 = arith.addf %173, %176 : vector<16x64xf32>
    %cst_77 = arith.constant dense<0.000000e+00> : vector<16xf32>
    %178 = vector.multi_reduction <add>, %177, %cst_77 [1] : vector<16x64xf32> to vector<16xf32>
    %179 = vector.shape_cast %178 : vector<16xf32> to vector<16x1xf32>
    %cst_78 = arith.constant 6.400000e+01 : f32
    %180 = vector.broadcast %cst_78 : f32 to vector<16x1xf32>
    %181 = arith.divf %179, %180 : vector<16x1xf32>
    %182 = vector.broadcast %181 : vector<16x1xf32> to vector<16x64xf32>
    %183 = arith.subf %177, %182 : vector<16x64xf32>
    %184 = arith.mulf %183, %183 : vector<16x64xf32>
    %cst_79 = arith.constant dense<0.000000e+00> : vector<16xf32>
    %185 = vector.multi_reduction <add>, %184, %cst_79 [1] : vector<16x64xf32> to vector<16xf32>
    %186 = vector.shape_cast %185 : vector<16xf32> to vector<16x1xf32>
    %cst_80 = arith.constant 6.400000e+01 : f32
    %187 = vector.broadcast %cst_80 : f32 to vector<16x1xf32>
    %188 = arith.divf %186, %187 : vector<16x1xf32>
    %189 = vector.broadcast %181 : vector<16x1xf32> to vector<16x64xf32>
    %190 = arith.subf %177, %189 : vector<16x64xf32>
    %cst_81 = arith.constant 9.99999997E-7 : f32
    %191 = vector.broadcast %cst_81 : f32 to vector<16x1xf32>
    %192 = arith.addf %188, %191 : vector<16x1xf32>
    %193 = math.rsqrt %192 : vector<16x1xf32>
    %194 = vector.broadcast %193 : vector<16x1xf32> to vector<16x64xf32>
    %195 = arith.mulf %190, %194 : vector<16x64xf32>
    %c1 = arith.constant 1 : index
    %c0_82 = arith.constant 0 : index
    %c0_83 = arith.constant 0 : index
    %196 = vector.load %arg4[%c1, %c0_82, %c0_83] : memref<2x64x192xf32, #tpu.memory_space<vmem>>, vector<1x64x192xf32>
    %197 = vector.shape_cast %196 : vector<1x64x192xf32> to vector<64x192xf32>
    %cst_84 = arith.constant dense<0.000000e+00> : vector<16x192xf32>
    %198 = tpu.matmul %195, %197, %cst_84 {dimension_numbers = #tpu.dot_dimension_numbers<[1], [0], [0], [1], [0, 0, 1, 1], [], []>} : vector<16x64xf32>, vector<64x192xf32>, vector<16x192xf32> -> vector<16x192xf32>
    %c1_85 = arith.constant 1 : index
    %c0_86 = arith.constant 0 : index
    %c0_87 = arith.constant 0 : index
    %199 = vector.load %arg5[%c1_85, %c0_86, %c0_87] : memref<2x1x192xf32, #tpu.memory_space<vmem>>, vector<1x1x192xf32>
    %200 = vector.shape_cast %199 : vector<1x1x192xf32> to vector<1x192xf32>
    %201 = vector.broadcast %200 : vector<1x192xf32> to vector<16x192xf32>
    %202 = arith.addf %198, %201 : vector<16x192xf32>
    %203 = vector.extract_strided_slice %202 {offsets = [0, 0], sizes = [16, 16], strides = [1, 1]} : vector<16x192xf32> to vector<16x16xf32>
    %204 = vector.extract_strided_slice %202 {offsets = [0, 64], sizes = [16, 16], strides = [1, 1]} : vector<16x192xf32> to vector<16x16xf32>
    %205 = vector.extract_strided_slice %202 {offsets = [0, 128], sizes = [16, 16], strides = [1, 1]} : vector<16x192xf32> to vector<16x16xf32>
    %cst_88 = arith.constant dense<0.000000e+00> : vector<16x16xf32>
    %206 = tpu.matmul %203, %204, %cst_88 {dimension_numbers = #tpu.dot_dimension_numbers<[1], [1], [0], [0], [0, 0, 1, 0], [], []>} : vector<16x16xf32>, vector<16x16xf32>, vector<16x16xf32> -> vector<16x16xf32>
    %207 = arith.addf %206, %5 : vector<16x16xf32>
    %cst_89 = arith.constant dense<0xFF800000> : vector<16xf32>
    %208 = vector.multi_reduction <maximumf>, %207, %cst_89 [1] : vector<16x16xf32> to vector<16xf32>
    %209 = vector.shape_cast %208 : vector<16xf32> to vector<16x1xf32>
    %210 = vector.broadcast %209 : vector<16x1xf32> to vector<16x16xf32>
    %211 = arith.subf %207, %210 : vector<16x16xf32>
    %212 = math.exp %211 : vector<16x16xf32>
    %cst_90 = arith.constant dense<0.000000e+00> : vector<16xf32>
    %213 = vector.multi_reduction <add>, %212, %cst_90 [1] : vector<16x16xf32> to vector<16xf32>
    %214 = vector.shape_cast %213 : vector<16xf32> to vector<16x1xf32>
    %215 = tpu.reciprocal %214 {approx = true} : vector<16x1xf32> -> vector<16x1xf32>
    %216 = vector.broadcast %215 : vector<16x1xf32> to vector<16x16xf32>
    %217 = arith.mulf %212, %216 : vector<16x16xf32>
    %cst_91 = arith.constant dense<0.000000e+00> : vector<16x16xf32>
    %218 = tpu.matmul %217, %205, %cst_91 {dimension_numbers = #tpu.dot_dimension_numbers<[1], [0], [0], [1], [0, 0, 1, 1], [], []>} : vector<16x16xf32>, vector<16x16xf32>, vector<16x16xf32> -> vector<16x16xf32>
    %219 = vector.extract_strided_slice %202 {offsets = [0, 16], sizes = [16, 16], strides = [1, 1]} : vector<16x192xf32> to vector<16x16xf32>
    %220 = vector.extract_strided_slice %202 {offsets = [0, 80], sizes = [16, 16], strides = [1, 1]} : vector<16x192xf32> to vector<16x16xf32>
    %221 = vector.extract_strided_slice %202 {offsets = [0, 144], sizes = [16, 16], strides = [1, 1]} : vector<16x192xf32> to vector<16x16xf32>
    %cst_92 = arith.constant dense<0.000000e+00> : vector<16x16xf32>
    %222 = tpu.matmul %219, %220, %cst_92 {dimension_numbers = #tpu.dot_dimension_numbers<[1], [1], [0], [0], [0, 0, 1, 0], [], []>} : vector<16x16xf32>, vector<16x16xf32>, vector<16x16xf32> -> vector<16x16xf32>
    %223 = arith.addf %222, %5 : vector<16x16xf32>
    %cst_93 = arith.constant dense<0xFF800000> : vector<16xf32>
    %224 = vector.multi_reduction <maximumf>, %223, %cst_93 [1] : vector<16x16xf32> to vector<16xf32>
    %225 = vector.shape_cast %224 : vector<16xf32> to vector<16x1xf32>
    %226 = vector.broadcast %225 : vector<16x1xf32> to vector<16x16xf32>
    %227 = arith.subf %223, %226 : vector<16x16xf32>
    %228 = math.exp %227 : vector<16x16xf32>
    %cst_94 = arith.constant dense<0.000000e+00> : vector<16xf32>
    %229 = vector.multi_reduction <add>, %228, %cst_94 [1] : vector<16x16xf32> to vector<16xf32>
    %230 = vector.shape_cast %229 : vector<16xf32> to vector<16x1xf32>
    %231 = tpu.reciprocal %230 {approx = true} : vector<16x1xf32> -> vector<16x1xf32>
    %232 = vector.broadcast %231 : vector<16x1xf32> to vector<16x16xf32>
    %233 = arith.mulf %228, %232 : vector<16x16xf32>
    %cst_95 = arith.constant dense<0.000000e+00> : vector<16x16xf32>
    %234 = tpu.matmul %233, %221, %cst_95 {dimension_numbers = #tpu.dot_dimension_numbers<[1], [0], [0], [1], [0, 0, 1, 1], [], []>} : vector<16x16xf32>, vector<16x16xf32>, vector<16x16xf32> -> vector<16x16xf32>
    %235 = vector.extract_strided_slice %202 {offsets = [0, 32], sizes = [16, 16], strides = [1, 1]} : vector<16x192xf32> to vector<16x16xf32>
    %236 = vector.extract_strided_slice %202 {offsets = [0, 96], sizes = [16, 16], strides = [1, 1]} : vector<16x192xf32> to vector<16x16xf32>
    %237 = vector.extract_strided_slice %202 {offsets = [0, 160], sizes = [16, 16], strides = [1, 1]} : vector<16x192xf32> to vector<16x16xf32>
    %cst_96 = arith.constant dense<0.000000e+00> : vector<16x16xf32>
    %238 = tpu.matmul %235, %236, %cst_96 {dimension_numbers = #tpu.dot_dimension_numbers<[1], [1], [0], [0], [0, 0, 1, 0], [], []>} : vector<16x16xf32>, vector<16x16xf32>, vector<16x16xf32> -> vector<16x16xf32>
    %239 = arith.addf %238, %5 : vector<16x16xf32>
    %cst_97 = arith.constant dense<0xFF800000> : vector<16xf32>
    %240 = vector.multi_reduction <maximumf>, %239, %cst_97 [1] : vector<16x16xf32> to vector<16xf32>
    %241 = vector.shape_cast %240 : vector<16xf32> to vector<16x1xf32>
    %242 = vector.broadcast %241 : vector<16x1xf32> to vector<16x16xf32>
    %243 = arith.subf %239, %242 : vector<16x16xf32>
    %244 = math.exp %243 : vector<16x16xf32>
    %cst_98 = arith.constant dense<0.000000e+00> : vector<16xf32>
    %245 = vector.multi_reduction <add>, %244, %cst_98 [1] : vector<16x16xf32> to vector<16xf32>
    %246 = vector.shape_cast %245 : vector<16xf32> to vector<16x1xf32>
    %247 = tpu.reciprocal %246 {approx = true} : vector<16x1xf32> -> vector<16x1xf32>
    %248 = vector.broadcast %247 : vector<16x1xf32> to vector<16x16xf32>
    %249 = arith.mulf %244, %248 : vector<16x16xf32>
    %cst_99 = arith.constant dense<0.000000e+00> : vector<16x16xf32>
    %250 = tpu.matmul %249, %237, %cst_99 {dimension_numbers = #tpu.dot_dimension_numbers<[1], [0], [0], [1], [0, 0, 1, 1], [], []>} : vector<16x16xf32>, vector<16x16xf32>, vector<16x16xf32> -> vector<16x16xf32>
    %251 = vector.extract_strided_slice %202 {offsets = [0, 48], sizes = [16, 16], strides = [1, 1]} : vector<16x192xf32> to vector<16x16xf32>
    %252 = vector.extract_strided_slice %202 {offsets = [0, 112], sizes = [16, 16], strides = [1, 1]} : vector<16x192xf32> to vector<16x16xf32>
    %253 = vector.extract_strided_slice %202 {offsets = [0, 176], sizes = [16, 16], strides = [1, 1]} : vector<16x192xf32> to vector<16x16xf32>
    %cst_100 = arith.constant dense<0.000000e+00> : vector<16x16xf32>
    %254 = tpu.matmul %251, %252, %cst_100 {dimension_numbers = #tpu.dot_dimension_numbers<[1], [1], [0], [0], [0, 0, 1, 0], [], []>} : vector<16x16xf32>, vector<16x16xf32>, vector<16x16xf32> -> vector<16x16xf32>
    %255 = arith.addf %254, %5 : vector<16x16xf32>
    %cst_101 = arith.constant dense<0xFF800000> : vector<16xf32>
    %256 = vector.multi_reduction <maximumf>, %255, %cst_101 [1] : vector<16x16xf32> to vector<16xf32>
    %257 = vector.shape_cast %256 : vector<16xf32> to vector<16x1xf32>
    %258 = vector.broadcast %257 : vector<16x1xf32> to vector<16x16xf32>
    %259 = arith.subf %255, %258 : vector<16x16xf32>
    %260 = math.exp %259 : vector<16x16xf32>
    %cst_102 = arith.constant dense<0.000000e+00> : vector<16xf32>
    %261 = vector.multi_reduction <add>, %260, %cst_102 [1] : vector<16x16xf32> to vector<16xf32>
    %262 = vector.shape_cast %261 : vector<16xf32> to vector<16x1xf32>
    %263 = tpu.reciprocal %262 {approx = true} : vector<16x1xf32> -> vector<16x1xf32>
    %264 = vector.broadcast %263 : vector<16x1xf32> to vector<16x16xf32>
    %265 = arith.mulf %260, %264 : vector<16x16xf32>
    %cst_103 = arith.constant dense<0.000000e+00> : vector<16x16xf32>
    %266 = tpu.matmul %265, %253, %cst_103 {dimension_numbers = #tpu.dot_dimension_numbers<[1], [0], [0], [1], [0, 0, 1, 1], [], []>} : vector<16x16xf32>, vector<16x16xf32>, vector<16x16xf32> -> vector<16x16xf32>
    %267 = tpu.concatenate %218, %234, %250, %266 in 1 : vector<16x16xf32>, vector<16x16xf32>, vector<16x16xf32>, vector<16x16xf32> -> vector<16x64xf32>
    %c1_104 = arith.constant 1 : index
    %c0_105 = arith.constant 0 : index
    %c0_106 = arith.constant 0 : index
    %268 = vector.load %arg6[%c1_104, %c0_105, %c0_106] : memref<2x64x64xf32, #tpu.memory_space<vmem>>, vector<1x64x64xf32>
    %269 = vector.shape_cast %268 : vector<1x64x64xf32> to vector<64x64xf32>
    %cst_107 = arith.constant dense<0.000000e+00> : vector<16x64xf32>
    %270 = tpu.matmul %267, %269, %cst_107 {dimension_numbers = #tpu.dot_dimension_numbers<[1], [0], [0], [1], [0, 0, 1, 1], [], []>} : vector<16x64xf32>, vector<64x64xf32>, vector<16x64xf32> -> vector<16x64xf32>
    %271 = arith.addf %177, %270 : vector<16x64xf32>
    %c1_108 = arith.constant 1 : index
    %c0_109 = arith.constant 0 : index
    %c0_110 = arith.constant 0 : index
    %272 = vector.load %arg7[%c1_108, %c0_109, %c0_110] : memref<2x1x64xf32, #tpu.memory_space<vmem>>, vector<1x1x64xf32>
    %273 = vector.shape_cast %272 : vector<1x1x64xf32> to vector<1x64xf32>
    %274 = vector.broadcast %273 : vector<1x64xf32> to vector<16x64xf32>
    %275 = arith.addf %271, %274 : vector<16x64xf32>
    %cst_111 = arith.constant dense<0.000000e+00> : vector<16xf32>
    %276 = vector.multi_reduction <add>, %275, %cst_111 [1] : vector<16x64xf32> to vector<16xf32>
    %277 = vector.shape_cast %276 : vector<16xf32> to vector<16x1xf32>
    %cst_112 = arith.constant 6.400000e+01 : f32
    %278 = vector.broadcast %cst_112 : f32 to vector<16x1xf32>
    %279 = arith.divf %277, %278 : vector<16x1xf32>
    %280 = vector.broadcast %279 : vector<16x1xf32> to vector<16x64xf32>
    %281 = arith.subf %275, %280 : vector<16x64xf32>
    %282 = arith.mulf %281, %281 : vector<16x64xf32>
    %cst_113 = arith.constant dense<0.000000e+00> : vector<16xf32>
    %283 = vector.multi_reduction <add>, %282, %cst_113 [1] : vector<16x64xf32> to vector<16xf32>
    %284 = vector.shape_cast %283 : vector<16xf32> to vector<16x1xf32>
    %cst_114 = arith.constant 6.400000e+01 : f32
    %285 = vector.broadcast %cst_114 : f32 to vector<16x1xf32>
    %286 = arith.divf %284, %285 : vector<16x1xf32>
    %287 = vector.broadcast %279 : vector<16x1xf32> to vector<16x64xf32>
    %288 = arith.subf %275, %287 : vector<16x64xf32>
    %cst_115 = arith.constant 9.99999997E-7 : f32
    %289 = vector.broadcast %cst_115 : f32 to vector<16x1xf32>
    %290 = arith.addf %286, %289 : vector<16x1xf32>
    %291 = math.rsqrt %290 : vector<16x1xf32>
    %292 = vector.broadcast %291 : vector<16x1xf32> to vector<16x64xf32>
    %293 = arith.mulf %288, %292 : vector<16x64xf32>
    %c1_116 = arith.constant 1 : index
    %c0_117 = arith.constant 0 : index
    %c0_118 = arith.constant 0 : index
    %294 = vector.load %arg8[%c1_116, %c0_117, %c0_118] : memref<2x64x128xf32, #tpu.memory_space<vmem>>, vector<1x64x128xf32>
    %295 = vector.shape_cast %294 : vector<1x64x128xf32> to vector<64x128xf32>
    %cst_119 = arith.constant dense<0.000000e+00> : vector<16x128xf32>
    %296 = tpu.matmul %293, %295, %cst_119 {dimension_numbers = #tpu.dot_dimension_numbers<[1], [0], [0], [1], [0, 0, 1, 1], [], []>} : vector<16x64xf32>, vector<64x128xf32>, vector<16x128xf32> -> vector<16x128xf32>
    %c1_120 = arith.constant 1 : index
    %c0_121 = arith.constant 0 : index
    %c0_122 = arith.constant 0 : index
    %297 = vector.load %arg9[%c1_120, %c0_121, %c0_122] : memref<2x1x128xf32, #tpu.memory_space<vmem>>, vector<1x1x128xf32>
    %298 = vector.shape_cast %297 : vector<1x1x128xf32> to vector<1x128xf32>
    %299 = vector.broadcast %298 : vector<1x128xf32> to vector<16x128xf32>
    %300 = arith.addf %296, %299 : vector<16x128xf32>
    %cst_123 = arith.constant 5.000000e-01 : f32
    %301 = vector.broadcast %cst_123 : f32 to vector<16x128xf32>
    %302 = arith.mulf %301, %300 : vector<16x128xf32>
    %cst_124 = arith.constant 0.707106769 : f32
    %303 = vector.broadcast %cst_124 : f32 to vector<16x128xf32>
    %304 = arith.mulf %300, %303 : vector<16x128xf32>
    %cst_125 = arith.constant 0.000000e+00 : f32
    %305 = vector.broadcast %cst_125 : f32 to vector<16x128xf32>
    %306 = arith.cmpf olt, %304, %305 : vector<16x128xf32>
    %cst_126 = arith.constant -1.000000e+00 : f32
    %cst_127 = arith.constant 1.000000e+00 : f32
    %307 = vector.broadcast %cst_126 : f32 to vector<16x128xf32>
    %308 = vector.broadcast %cst_127 : f32 to vector<16x128xf32>
    %309 = arith.select %306, %307, %308 : vector<16x128xi1>, vector<16x128xf32>
    %310 = math.absf %304 : vector<16x128xf32>
    %cst_128 = arith.constant 0.327591091 : f32
    %311 = vector.broadcast %cst_128 : f32 to vector<16x128xf32>
    %312 = arith.mulf %311, %310 : vector<16x128xf32>
    %cst_129 = arith.constant 1.000000e+00 : f32
    %313 = vector.broadcast %cst_129 : f32 to vector<16x128xf32>
    %314 = arith.addf %313, %312 : vector<16x128xf32>
    %cst_130 = arith.constant 1.000000e+00 : f32
    %315 = vector.broadcast %cst_130 : f32 to vector<16x128xf32>
    %316 = arith.divf %315, %314 : vector<16x128xf32>
    %cst_131 = arith.constant 1.06140542 : f32
    %317 = vector.broadcast %cst_131 : f32 to vector<16x128xf32>
    %318 = arith.mulf %317, %316 : vector<16x128xf32>
    %cst_132 = arith.constant 1.45315206 : f32
    %319 = vector.broadcast %cst_132 : f32 to vector<16x128xf32>
    %320 = arith.subf %318, %319 : vector<16x128xf32>
    %321 = arith.mulf %320, %316 : vector<16x128xf32>
    %cst_133 = arith.constant 1.42141378 : f32
    %322 = vector.broadcast %cst_133 : f32 to vector<16x128xf32>
    %323 = arith.addf %321, %322 : vector<16x128xf32>
    %324 = arith.mulf %323, %316 : vector<16x128xf32>
    %cst_134 = arith.constant 0.284496725 : f32
    %325 = vector.broadcast %cst_134 : f32 to vector<16x128xf32>
    %326 = arith.subf %324, %325 : vector<16x128xf32>
    %327 = arith.mulf %326, %316 : vector<16x128xf32>
    %cst_135 = arith.constant 0.254829586 : f32
    %328 = vector.broadcast %cst_135 : f32 to vector<16x128xf32>
    %329 = arith.addf %327, %328 : vector<16x128xf32>
    %330 = arith.mulf %329, %316 : vector<16x128xf32>
    %cst_136 = arith.constant 0.000000e+00 : f32
    %331 = vector.broadcast %cst_136 : f32 to vector<16x128xf32>
    %332 = arith.subf %331, %310 : vector<16x128xf32>
    %333 = arith.mulf %332, %310 : vector<16x128xf32>
    %334 = math.exp %333 : vector<16x128xf32>
    %335 = arith.mulf %330, %334 : vector<16x128xf32>
    %cst_137 = arith.constant 1.000000e+00 : f32
    %336 = vector.broadcast %cst_137 : f32 to vector<16x128xf32>
    %337 = arith.subf %336, %335 : vector<16x128xf32>
    %338 = arith.mulf %309, %337 : vector<16x128xf32>
    %cst_138 = arith.constant 1.000000e+00 : f32
    %339 = vector.broadcast %cst_138 : f32 to vector<16x128xf32>
    %340 = arith.addf %339, %338 : vector<16x128xf32>
    %341 = arith.mulf %302, %340 : vector<16x128xf32>
    %c1_139 = arith.constant 1 : index
    %c0_140 = arith.constant 0 : index
    %c0_141 = arith.constant 0 : index
    %342 = vector.load %arg10[%c1_139, %c0_140, %c0_141] : memref<2x128x64xf32, #tpu.memory_space<vmem>>, vector<1x128x64xf32>
    %343 = vector.shape_cast %342 : vector<1x128x64xf32> to vector<128x64xf32>
    %cst_142 = arith.constant dense<0.000000e+00> : vector<16x64xf32>
    %344 = tpu.matmul %341, %343, %cst_142 {dimension_numbers = #tpu.dot_dimension_numbers<[1], [0], [0], [1], [0, 0, 1, 1], [], []>} : vector<16x128xf32>, vector<128x64xf32>, vector<16x64xf32> -> vector<16x64xf32>
    %345 = arith.addf %275, %344 : vector<16x64xf32>
    %c1_143 = arith.constant 1 : index
    %c0_144 = arith.constant 0 : index
    %c0_145 = arith.constant 0 : index
    %346 = vector.load %arg11[%c1_143, %c0_144, %c0_145] : memref<2x1x64xf32, #tpu.memory_space<vmem>>, vector<1x1x64xf32>
    %347 = vector.shape_cast %346 : vector<1x1x64xf32> to vector<1x64xf32>
    %348 = vector.broadcast %347 : vector<1x64xf32> to vector<16x64xf32>
    %349 = arith.addf %345, %348 : vector<16x64xf32>
    %cst_146 = arith.constant dense<0.000000e+00> : vector<16xf32>
    %350 = vector.multi_reduction <add>, %349, %cst_146 [1] : vector<16x64xf32> to vector<16xf32>
    %351 = vector.shape_cast %350 : vector<16xf32> to vector<16x1xf32>
    %cst_147 = arith.constant 6.400000e+01 : f32
    %352 = vector.broadcast %cst_147 : f32 to vector<16x1xf32>
    %353 = arith.divf %351, %352 : vector<16x1xf32>
    %354 = vector.broadcast %353 : vector<16x1xf32> to vector<16x64xf32>
    %355 = arith.subf %349, %354 : vector<16x64xf32>
    %356 = arith.mulf %355, %355 : vector<16x64xf32>
    %cst_148 = arith.constant dense<0.000000e+00> : vector<16xf32>
    %357 = vector.multi_reduction <add>, %356, %cst_148 [1] : vector<16x64xf32> to vector<16xf32>
    %358 = vector.shape_cast %357 : vector<16xf32> to vector<16x1xf32>
    %cst_149 = arith.constant 6.400000e+01 : f32
    %359 = vector.broadcast %cst_149 : f32 to vector<16x1xf32>
    %360 = arith.divf %358, %359 : vector<16x1xf32>
    %361 = vector.broadcast %353 : vector<16x1xf32> to vector<16x64xf32>
    %362 = arith.subf %349, %361 : vector<16x64xf32>
    %cst_150 = arith.constant 9.99999997E-7 : f32
    %363 = vector.broadcast %cst_150 : f32 to vector<16x1xf32>
    %364 = arith.addf %360, %363 : vector<16x1xf32>
    %365 = math.rsqrt %364 : vector<16x1xf32>
    %366 = vector.broadcast %365 : vector<16x1xf32> to vector<16x64xf32>
    %367 = arith.mulf %362, %366 : vector<16x64xf32>
    %c0_151 = arith.constant 0 : index
    %c0_152 = arith.constant 0 : index
    %368 = vector.load %arg12[%c0_151, %c0_152] : memref<64x128xf32, #tpu.memory_space<vmem>>, vector<64x128xf32>
    %cst_153 = arith.constant dense<0.000000e+00> : vector<16x128xf32>
    %369 = tpu.matmul %367, %368, %cst_153 {dimension_numbers = #tpu.dot_dimension_numbers<[1], [0], [0], [1], [0, 0, 1, 1], [], []>} : vector<16x64xf32>, vector<64x128xf32>, vector<16x128xf32> -> vector<16x128xf32>
    %c0_154 = arith.constant 0 : index
    %c0_155 = arith.constant 0 : index
    %370 = vector.load %arg13[%c0_154, %c0_155] : memref<1x128xf32, #tpu.memory_space<vmem>>, vector<1x128xf32>
    %371 = vector.broadcast %370 : vector<1x128xf32> to vector<16x128xf32>
    %372 = arith.addf %369, %371 : vector<16x128xf32>
    %c0_156 = arith.constant 0 : index
    %c0_157 = arith.constant 0 : index
    %373 = vector.load %arg14[%c0_156, %c0_157] : memref<16x128xf32, #tpu.memory_space<vmem>>, vector<16x128xf32>
    tpu.vector_store %arg14[%c0_156, %c0_157], %372 {strides = array<i32>} : memref<16x128xf32, #tpu.memory_space<vmem>>, vector<16x128xf32>,
    return
  }
}

</mosaic_0001>

<bundles_post_ra>
// kernel: _vit_forward.1
= control target key start
LH: loop header
LB: loop body
LE: loop exit
PB: predicated region body
PF: predicated region fallthrough
CT: control target
= control target key end

     0   :  { %vm2067_vm0 = vcmask 523264   ;;  %s5103_s28 = smov 32   ;;  %s5104_s29 = smov 48   ;;  %vm2199_vm8 = vcmask 130048   ;;  %vm2598_vm9 = vcmask 261120   ;;  %vm2601_vm10 = vcmask 392192   ;;  %s6581_s1 = inlined_call_operand.vmem [shape: bf16[3072,64], index: 1, kind: input, shape index: {}]   ;;  %s6582_s0 = inlined_call_operand.vmem [shape: bf16[16,3072], index: 0, kind: input, shape index: {}]   ;;  %s6583_s2 = inlined_call_operand.vmem [shape: f32[16,64], index: 2, kind: input, shape index: {}]   ;;  %s6584_s4 = inlined_call_operand.vmem [shape: f32[2,64,192], index: 4, kind: input, shape index: {}]   ;;  %s6585_s5 = inlined_call_operand.vmem [shape: f32[2,1,192], index: 5, kind: input, shape index: {}]   ;;  %s6586_s3 = inlined_call_operand.vmem [shape: f32[16,16], index: 3, kind: input, shape index: {}]   ;;  %s6587_s7 = inlined_call_operand.vmem [shape: f32[2,1,64], index: 7, kind: input, shape index: {}]   ;;  %s6588_s6 = inlined_call_operand.vmem [shape: f32[2,64,64], index: 6, kind: input, shape index: {}]   ;;  %s6589_s9 = inlined_call_operand.vmem [shape: f32[2,1,128], index: 9, kind: input, shape index: {}]   ;;  %s6590_s8 = inlined_call_operand.vmem [shape: f32[2,64,128], index: 8, kind: input, shape index: {}]   ;;  %s6591_s11 = inlined_call_operand.vmem [shape: f32[2,1,64], index: 11, kind: input, shape index: {}]   ;;  %s6592_s10 = inlined_call_operand.vmem [shape: f32[2,128,64], index: 10, kind: input, shape index: {}]   ;;  %s6593_s13 = inlined_call_operand.vmem [shape: f32[1,128], index: 13, kind: input, shape index: {}]   ;;  %s6594_s12 = inlined_call_operand.vmem [shape: f32[64,128], index: 12, kind: input, shape index: {}]   ;;  %s6595_s14 = inlined_call_operand.vmem [shape: f32[16,128], index: 14, kind: output, shape index: {}]  }
   0x1   :  { %v4764_v0 = vld [vmem:[%s6581_s1 + $0x38] sm:$0xff]  ;;  %v4763_v4 = vld [vmem:[%s6581_s1 + $0x30] sm:$0xff]  ;;  %v4762_v8 = vld [vmem:[%s6581_s1 + $0x28] sm:$0xff]  ;;  %s5105_s30 = smov 16   ;;  %s5107_s15 = smov 80  }
   0x2   :  { %v4772_v1 = vld [vmem:[%s6581_s1 + $0x78] sm:$0xff]  ;;  %1729 = vmatpush.bf16.msra.mxu0 %v4764_v0  ;;  %v4771_v5 = vld [vmem:[%s6581_s1 + $0x70] sm:$0xff]  ;;  %v4770_v9 = vld [vmem:[%s6581_s1 + $0x68] sm:$0xff]  ;;  %s5108_s16 = smov 112  }
   0x3   :  { %v4780_v2 = vld [vmem:[%s6581_s1 + $0xb8] sm:$0xff]  ;;  %1743 = vmatpush.bf16.msra.mxu1 %v4772_v1  ;;  %v4779_v6 = vld [vmem:[%s6581_s1 + $0xb0] sm:$0xff]  ;;  %v4778_v10 = vld [vmem:[%s6581_s1 + $0xa8] sm:$0xff] }
   0x4   :  { %v4788_v3 = vld [vmem:[%s6581_s1 + $0xf8] sm:$0xff]  ;;  %1757 = vmatpush.bf16.msra.mxu2 %v4780_v2  ;;  %v4787_v7 = vld [vmem:[%s6581_s1 + $0xf0] sm:$0xff]  ;;  %v4786_v11 = vld [vmem:[%s6581_s1 + $0xe8] sm:$0xff] }
   0x5   :  { %1771 = vmatpush.bf16.msra.mxu3 %v4788_v3  ;;  %v4761_v12 = vld [vmem:[%s6581_s1 + $0x20] sm:$0xff]  ;;  %v4760_v16 = vld [vmem:[%s6581_s1 + $0x18] sm:$0xff]  ;;  %v4759_v20 = vld [vmem:[%s6581_s1 + $0x10] sm:$0xff] }
   0x6   :  { %1730 = vmatpush.bf16.msra.mxu0 %v4763_v4  ;;  %v4769_v13 = vld [vmem:[%s6581_s1 + $0x60] sm:$0xff]  ;;  %v4768_v17 = vld [vmem:[%s6581_s1 + $0x58] sm:$0xff]  ;;  %v4767_v21 = vld [vmem:[%s6581_s1 + $0x50] sm:$0xff] }
   0x7   :  { %1744 = vmatpush.bf16.msra.mxu1 %v4771_v5  ;;  %v4777_v14 = vld [vmem:[%s6581_s1 + $0xa0] sm:$0xff]  ;;  %v4776_v18 = vld [vmem:[%s6581_s1 + $0x98] sm:$0xff]  ;;  %v4775_v22 = vld [vmem:[%s6581_s1 + $0x90] sm:$0xff] }
   0x8   :  { %1758 = vmatpush.bf16.msra.mxu2 %v4779_v6  ;;  %v4785_v15 = vld [vmem:[%s6581_s1 + $0xe0] sm:$0xff]  ;;  %v4784_v19 = vld [vmem:[%s6581_s1 + $0xd8] sm:$0xff]  ;;  %v4783_v23 = vld [vmem:[%s6581_s1 + $0xd0] sm:$0xff] }
   0x9   :  { %1772 = vmatpush.bf16.msra.mxu3 %v4787_v7  ;;  %v4758_v24 = vld [vmem:[%s6581_s1 + $0x8] sm:$0xff]  ;;  %v4757_v28 = vld [vmem:[%s6581_s1] sm:$0xff]  ;;  %v4796_v32 = vld [vmem:[%s6581_s1 + $0x138] sm:$0xff] }
   0xa   :  { %1731 = vmatpush.bf16.msra.mxu0 %v4762_v8  ;;  %v4766_v25 = vld [vmem:[%s6581_s1 + $0x48] sm:$0xff]  ;;  %v4765_v29 = vld [vmem:[%s6581_s1 + $0x40] sm:$0xff]  ;;  %v4804_v33 = vld [vmem:[%s6581_s1 + $0x178] sm:$0xff] }
   0xb   :  { %1745 = vmatpush.bf16.msra.mxu1 %v4770_v9  ;;  %v4774_v26 = vld [vmem:[%s6581_s1 + $0x88] sm:$0xff]  ;;  %v4773_v30 = vld [vmem:[%s6581_s1 + $0x80] sm:$0xff]  ;;  %v4812_v42 = vld [vmem:[%s6581_s1 + $0x1b8] sm:$0xff] }
   0xc   :  { %1759 = vmatpush.bf16.msra.mxu2 %v4778_v10  ;;  %v4782_v27 = vld [vmem:[%s6581_s1 + $0xc8] sm:$0xff]  ;;  %v4781_v31 = vld [vmem:[%s6581_s1 + $0xc0] sm:$0xff]  ;;  %v4820_v43 = vld [vmem:[%s6581_s1 + $0x1f8] sm:$0xff] }
   0xd   :  { %1773 = vmatpush.bf16.msra.mxu3 %v4786_v11  ;;  %v3745_v34 = vld [vmem:[%s6582_s0] sm:$0xf]  ;;  %v3753_v36 = vld [vmem:[%s6582_s0 + $0x8] sm:$0xf]  ;;  %v4733_v38 = vld [vmem:[%s6582_s0 + $0x4] sm:$0xf] }
   0xe   :  { %1732 = vmatpush.bf16.msra.mxu0 %v4761_v12  ;;  %v4745_v35 = vld [vmem:[%s6582_s0 + $0x5c] sm:$0xf0]  ;;  %v4746_v37 = vld [vmem:[%s6582_s0 + $0x64] sm:$0xf0]  ;;  %v3747_v39 = vld [vmem:[%s6582_s0 + $0x60] sm:$0xf0] }
   0xf   :  { %1746 = vmatpush.bf16.msra.mxu1 %v4769_v13  ;;  %v4734_v40 = vld [vmem:[%s6582_s0 + $0xc] sm:$0xf]  ;;  %v3746_v44 = vor.u32 %v4745_v35, %v3745_v34  ;;  %v3754_v45 = vor.u32 %v4746_v37, %v3753_v36  ;;  %v3750_v46 = vor.u32 %v4733_v38, %v3747_v39  ;;  %v4795_v48 = vld [vmem:[%s6581_s1 + $0x130] sm:$0xff]  ;;  %v4793_v56 = vld [vmem:[%s6581_s1 + $0x120] sm:$0xff] }
  0x10   :  { %1760 = vmatpush.bf16.msra.mxu2 %v4777_v14  ;;  %v3755_v41 = vld [vmem:[%s6582_s0 + $0x68] sm:$0xf0]  ;;  %v4803_v49 = vld [vmem:[%s6581_s1 + $0x170] sm:$0xff]  ;;  %v4801_v57 = vld [vmem:[%s6581_s1 + $0x160] sm:$0xff] }
  0x11   :  { %1774 = vmatpush.bf16.msra.mxu3 %v4785_v15  ;;  %v3758_v47 = vor.u32 %v4734_v40, %v3755_v41  ;;  %v4811_v50 = vld [vmem:[%s6581_s1 + $0x1b0] sm:$0xff]  ;;  %v4794_v52 = vld [vmem:[%s6581_s1 + $0x128] sm:$0xff]  ;;  %v4809_v58 = vld [vmem:[%s6581_s1 + $0x1a0] sm:$0xff] }
  0x12   :  { %1733 = vmatpush.bf16.msra.mxu0 %v4760_v16  ;;  %v4819_v51 = vld [vmem:[%s6581_s1 + $0x1f0] sm:$0xff]  ;;  %v4802_v53 = vld [vmem:[%s6581_s1 + $0x168] sm:$0xff]  ;;  %v4817_v59 = vld [vmem:[%s6581_s1 + $0x1e0] sm:$0xff] }
  0x13   :  { %1747 = vmatpush.bf16.msra.mxu1 %v4768_v17  ;;  %v4810_v54 = vld [vmem:[%s6581_s1 + $0x1a8] sm:$0xff]  ;;  %v4792_v60 = vld [vmem:[%s6581_s1 + $0x118] sm:$0xff]  ;;  %v4791_v0 = vld [vmem:[%s6581_s1 + $0x110] sm:$0xff] }
  0x14   :  { %1761 = vmatpush.bf16.msra.mxu2 %v4776_v18  ;;  %v4818_v55 = vld [vmem:[%s6581_s1 + $0x1e8] sm:$0xff]  ;;  %v4800_v61 = vld [vmem:[%s6581_s1 + $0x158] sm:$0xff]  ;;  %v4799_v1 = vld [vmem:[%s6581_s1 + $0x150] sm:$0xff] }
  0x15   :  { %1775 = vmatpush.bf16.msra.mxu3 %v4784_v19  ;;  %v4808_v62 = vld [vmem:[%s6581_s1 + $0x198] sm:$0xff]  ;;  %v4807_v2 = vld [vmem:[%s6581_s1 + $0x190] sm:$0xff]  ;;  %v4790_v4 = vld [vmem:[%s6581_s1 + $0x108] sm:$0xff] }
  0x16   :  { %1734 = vmatpush.bf16.msra.mxu0 %v4759_v20  ;;  %v4816_v63 = vld [vmem:[%s6581_s1 + $0x1d8] sm:$0xff]  ;;  %v4815_v3 = vld [vmem:[%s6581_s1 + $0x1d0] sm:$0xff]  ;;  %v4798_v5 = vld [vmem:[%s6581_s1 + $0x148] sm:$0xff] }
  0x17   :  { %1748 = vmatpush.bf16.msra.mxu1 %v4767_v21  ;;  %v4806_v6 = vld [vmem:[%s6581_s1 + $0x188] sm:$0xff]  ;;  %v4789_v8 = vld [vmem:[%s6581_s1 + $0x100] sm:$0xff]  ;;  %v4828_v12 = vld [vmem:[%s6581_s1 + $0x238] sm:$0xff] }
  0x18   :  { %1762 = vmatpush.bf16.msra.mxu2 %v4775_v22  ;;  %v4814_v7 = vld [vmem:[%s6581_s1 + $0x1c8] sm:$0xff]  ;;  %v4797_v9 = vld [vmem:[%s6581_s1 + $0x140] sm:$0xff]  ;;  %v4836_v13 = vld [vmem:[%s6581_s1 + $0x278] sm:$0xff] }
  0x19   :  { %1776 = vmatpush.bf16.msra.mxu3 %v4783_v23  ;;  %v4805_v10 = vld [vmem:[%s6581_s1 + $0x180] sm:$0xff]  ;;  %v3761_v14 = vld [vmem:[%s6582_s0 + $0x10] sm:$0xf]  ;;  %v3769_v16 = vld [vmem:[%s6582_s0 + $0x18] sm:$0xf] }
  0x1a   :  { %1735 = vmatpush.bf16.msra.mxu0 %v4758_v24  ;;  %v4813_v11 = vld [vmem:[%s6581_s1 + $0x1c0] sm:$0xff]  ;;  %v4747_v15 = vld [vmem:[%s6582_s0 + $0x6c] sm:$0xf0]  ;;  %v4748_v17 = vld [vmem:[%s6582_s0 + $0x74] sm:$0xf0] }
  0x1b   :  { %1749 = vmatpush.bf16.msra.mxu1 %v4766_v25  ;;  %v4735_v18 = vld [vmem:[%s6582_s0 + $0x14] sm:$0xf]  ;;  %v4736_v20 = vld [vmem:[%s6582_s0 + $0x1c] sm:$0xf]  ;;  %v3762_v24 = vor.u32 %v4747_v15, %v3761_v14  ;;  %v3770_v25 = vor.u32 %v4748_v17, %v3769_v16  ;;  %v4842_v34 = vld [vmem:[%s6581_s1 + $0x2a8] sm:$0xff] }
  0x1c   :  { %1763 = vmatpush.bf16.msra.mxu2 %v4774_v26  ;;  %v3763_v19 = vld [vmem:[%s6582_s0 + $0x70] sm:$0xf0]  ;;  %v3771_v21 = vld [vmem:[%s6582_s0 + $0x78] sm:$0xf0]  ;;  %v4850_v35 = vld [vmem:[%s6581_s1 + $0x2e8] sm:$0xff] }
  0x1d   :  { %1777 = vmatpush.bf16.msra.mxu3 %v4782_v27  ;;  %v4844_v22 = vld [vmem:[%s6581_s1 + $0x2b8] sm:$0xff]  ;;  %v3766_v26 = vor.u32 %v4735_v18, %v3763_v19  ;;  %v3774_v27 = vor.u32 %v4736_v20, %v3771_v21  ;;  %v4825_v36 = vld [vmem:[%s6581_s1 + $0x220] sm:$0xff]  ;;  %v4874_v14 = vld [vmem:[%s6581_s1 + $0x3a8] sm:$0xff] }
  0x1e   :  { %1736 = vmatpush.bf16.msra.mxu0 %v4757_v28  ;;  %v4852_v23 = vld [vmem:[%s6581_s1 + $0x2f8] sm:$0xff]  ;;  %v4827_v28 = vld [vmem:[%s6581_s1 + $0x230] sm:$0xff]  ;;  %v4833_v37 = vld [vmem:[%s6581_s1 + $0x260] sm:$0xff] }
  0x1f   :  { %1750 = vmatpush.bf16.msra.mxu1 %v4765_v29  ;;  %v4835_v29 = vld [vmem:[%s6581_s1 + $0x270] sm:$0xff]  ;;  %v4841_v38 = vld [vmem:[%s6581_s1 + $0x2a0] sm:$0xff]  ;;  %v4824_v40 = vld [vmem:[%s6581_s1 + $0x218] sm:$0xff] }
  0x20   :  { %1764 = vmatpush.bf16.msra.mxu2 %v4773_v30  ;;  %v4843_v30 = vld [vmem:[%s6581_s1 + $0x2b0] sm:$0xff]  ;;  %v4849_v39 = vld [vmem:[%s6581_s1 + $0x2e0] sm:$0xff]  ;;  %v4832_v41 = vld [vmem:[%s6581_s1 + $0x258] sm:$0xff] }
  0x21   :  { %1778 = vmatpush.bf16.msra.mxu3 %v4781_v31  ;;  %1737 = vmatmul.bf16.vlgmr.msra.gmra.mxu0 %v3746_v44  ;;  %v4851_v31 = vld [vmem:[%s6581_s1 + $0x2f0] sm:$0xff]  ;;  %v4882_v15 = vld [vmem:[%s6581_s1 + $0x3e8] sm:$0xff]  ;;  %v4857_v16 = vld [vmem:[%s6581_s1 + $0x320] sm:$0xff] }
  0x22   :  { %1785 = vmatpush.bf16.msrb.mxu0 %v4796_v32  ;;  %1751 = vmatmul.bf16.vlgmr.msra.gmra.mxu1 %v3750_v46  ;;  %v4826_v32 = vld [vmem:[%s6581_s1 + $0x228] sm:$0xff]  ;;  %v4823_v44 = vld [vmem:[%s6581_s1 + $0x210] sm:$0xff]  ;;  %v4865_v17 = vld [vmem:[%s6581_s1 + $0x360] sm:$0xff] }
  0x23   :  { %1799 = vmatpush.bf16.msrb.mxu1 %v4804_v33  ;;  %1765 = vmatmul.bf16.vlgmr.msra.gmra.mxu2 %v3754_v45  ;;  %v4834_v33 = vld [vmem:[%s6581_s1 + $0x268] sm:$0xff]  ;;  %v4831_v45 = vld [vmem:[%s6581_s1 + $0x250] sm:$0xff]  ;;  %v4873_v18 = vld [vmem:[%s6581_s1 + $0x3a0] sm:$0xff] }
  0x24   :  { %1813 = vmatpush.bf16.msrb.mxu2 %v4812_v42  ;;  %1779 = vmatmul.bf16.vlgmr.msra.gmra.mxu3 %v3758_v47  ;;  %v4840_v42 = vld [vmem:[%s6581_s1 + $0x298] sm:$0xff]  ;;  %v4839_v46 = vld [vmem:[%s6581_s1 + $0x290] sm:$0xff]  ;;  %v4881_v19 = vld [vmem:[%s6581_s1 + $0x3e0] sm:$0xff] }
  0x25   :  { %1827 = vmatpush.bf16.msrb.mxu3 %v4820_v43  ;;  %v4848_v43 = vld [vmem:[%s6581_s1 + $0x2d8] sm:$0xff]  ;;  %v4847_v47 = vld [vmem:[%s6581_s1 + $0x2d0] sm:$0xff] }
  0x26   :  { %1786 = vmatpush.bf16.msrb.mxu0 %v4795_v48  ;;  %v4822_v48 = vld [vmem:[%s6581_s1 + $0x208] sm:$0xff]  ;;  %v4856_v20 = vld [vmem:[%s6581_s1 + $0x318] sm:$0xff] }
  0x27   :  { %1800 = vmatpush.bf16.msrb.mxu1 %v4803_v49  ;;  %v4830_v49 = vld [vmem:[%s6581_s1 + $0x248] sm:$0xff]  ;;  %v4864_v21 = vld [vmem:[%s6581_s1 + $0x358] sm:$0xff] }
  0x28   :  { %1814 = vmatpush.bf16.msrb.mxu2 %v4811_v50  ;;  %v4838_v50 = vld [vmem:[%s6581_s1 + $0x288] sm:$0xff] }
  0x29   :  { %1828 = vmatpush.bf16.msrb.mxu3 %v4819_v51  ;;  %v4846_v51 = vld [vmem:[%s6581_s1 + $0x2c8] sm:$0xff] }
  0x2a   :  { %1787 = vmatpush.bf16.msrb.mxu0 %v4794_v52  ;;  %v4821_v52 = vld [vmem:[%s6581_s1 + $0x200] sm:$0xff] }
  0x2b   :  { %1801 = vmatpush.bf16.msrb.mxu1 %v4802_v53  ;;  %v4829_v53 = vld [vmem:[%s6581_s1 + $0x240] sm:$0xff] }
  0x2c   :  { %1815 = vmatpush.bf16.msrb.mxu2 %v4810_v54  ;;  %v4837_v54 = vld [vmem:[%s6581_s1 + $0x280] sm:$0xff] }
  0x2d   :  { %1829 = vmatpush.bf16.msrb.mxu3 %v4818_v55  ;;  %v4845_v55 = vld [vmem:[%s6581_s1 + $0x2c0] sm:$0xff] }
  0x2e   :  { %1788 = vmatpush.bf16.msrb.mxu0 %v4793_v56  ;;  %v4860_v56 = vld [vmem:[%s6581_s1 + $0x338] sm:$0xff] }
  0x2f   :  { %1802 = vmatpush.bf16.msrb.mxu1 %v4801_v57  ;;  %v4868_v57 = vld [vmem:[%s6581_s1 + $0x378] sm:$0xff] }
  0x30   :  { %1816 = vmatpush.bf16.msrb.mxu2 %v4809_v58  ;;  %v3777_v58 = vld [vmem:[%s6582_s0 + $0x20] sm:$0xf] }
  0x31   :  { %1830 = vmatpush.bf16.msrb.mxu3 %v4817_v59  ;;  %v4749_v59 = vld [vmem:[%s6582_s0 + $0x7c] sm:$0xf0] }
  0x32   :  { %1789 = vmatpush.bf16.msrb.mxu0 %v4792_v60  ;;  %v3785_v60 = vld [vmem:[%s6582_s0 + $0x28] sm:$0xf] }
  0x33   :  { %1803 = vmatpush.bf16.msrb.mxu1 %v4800_v61  ;;  %v4750_v61 = vld [vmem:[%s6582_s0 + $0x84] sm:$0xf0] }
  0x34   :  { %1817 = vmatpush.bf16.msrb.mxu2 %v4808_v62  ;;  %v4737_v62 = vld [vmem:[%s6582_s0 + $0x24] sm:$0xf] }
  0x35   :  { %1831 = vmatpush.bf16.msrb.mxu3 %v4816_v63  ;;  %v3779_v63 = vld [vmem:[%s6582_s0 + $0x80] sm:$0xf0] }
  0x36   :  { %1790 = vmatpush.bf16.msrb.mxu0 %v4791_v0  ;;  %v4738_v0 = vld [vmem:[%s6582_s0 + $0x2c] sm:$0xf] }
  0x37   :  { %1804 = vmatpush.bf16.msrb.mxu1 %v4799_v1  ;;  %v3787_v1 = vld [vmem:[%s6582_s0 + $0x88] sm:$0xf0] }
  0x38   :  { %1818 = vmatpush.bf16.msrb.mxu2 %v4807_v2  ;;  %v4876_v2 = vld [vmem:[%s6581_s1 + $0x3b8] sm:$0xff] }
  0x39   :  { %1832 = vmatpush.bf16.msrb.mxu3 %v4815_v3  ;;  %v4884_v3 = vld [vmem:[%s6581_s1 + $0x3f8] sm:$0xff] }
  0x3a   :  { %1791 = vmatpush.bf16.msrb.mxu0 %v4790_v4  ;;  %v3778_v4 = vor.u32 %v4749_v59, %v3777_v58  ;;  %v4906_v58 = vld [vmem:[%s6581_s1 + $0x4a8] sm:$0xff] }
  0x3b   :  { %1805 = vmatpush.bf16.msrb.mxu1 %v4798_v5  ;;  %v3786_v5 = vor.u32 %v4750_v61, %v3785_v60  ;;  %v4914_v59 = vld [vmem:[%s6581_s1 + $0x4e8] sm:$0xff]  ;;  %v4889_v60 = vld [vmem:[%s6581_s1 + $0x420] sm:$0xff] }
  0x3c   :  { %1819 = vmatpush.bf16.msrb.mxu2 %v4806_v6  ;;  %v3782_v6 = vor.u32 %v4737_v62, %v3779_v63  ;;  %v4897_v61 = vld [vmem:[%s6581_s1 + $0x460] sm:$0xff] }
  0x3d   :  { %1833 = vmatpush.bf16.msrb.mxu3 %v4814_v7  ;;  %v3790_v7 = vor.u32 %v4738_v0, %v3787_v1  ;;  %v4905_v62 = vld [vmem:[%s6581_s1 + $0x4a0] sm:$0xff]  ;;  %v4888_v0 = vld [vmem:[%s6581_s1 + $0x418] sm:$0xff] }
  0x3e   :  { %1792 = vmatpush.bf16.msrb.mxu0 %v4789_v8  ;;  %v4859_v8 = vld [vmem:[%s6581_s1 + $0x330] sm:$0xff]  ;;  %v4913_v63 = vld [vmem:[%s6581_s1 + $0x4e0] sm:$0xff]  ;;  %v4896_v1 = vld [vmem:[%s6581_s1 + $0x458] sm:$0xff] }
  0x3f   :  { %1806 = vmatpush.bf16.msrb.mxu1 %v4797_v9  ;;  %v4867_v9 = vld [vmem:[%s6581_s1 + $0x370] sm:$0xff] }
  0x40   :  { %1820 = vmatpush.bf16.msrb.mxu2 %v4805_v10  ;;  %v4875_v10 = vld [vmem:[%s6581_s1 + $0x3b0] sm:$0xff] }
  0x41   :  { %1834 = vmatpush.bf16.msrb.mxu3 %v4813_v11  ;;  %1793 = vmatmul.bf16.vlgmr.msrb.gmra.mxu0 %v3762_v24  ;;  %v4883_v11 = vld [vmem:[%s6581_s1 + $0x3f0] sm:$0xff] }
  0x42   :  { %1841 = vmatpush.bf16.msra.mxu0 %v4828_v12  ;;  %1807 = vmatmul.bf16.vlgmr.msrb.gmra.mxu1 %v3766_v26  ;;  %v4858_v12 = vld [vmem:[%s6581_s1 + $0x328] sm:$0xff]  ;;  %v4855_v24 = vld [vmem:[%s6581_s1 + $0x310] sm:$0xff] }
  0x43   :  { %1855 = vmatpush.bf16.msra.mxu1 %v4836_v13  ;;  %1821 = vmatmul.bf16.vlgmr.msrb.gmra.mxu2 %v3770_v25  ;;  %v4866_v13 = vld [vmem:[%s6581_s1 + $0x368] sm:$0xff]  ;;  %v4863_v25 = vld [vmem:[%s6581_s1 + $0x350] sm:$0xff] }
  0x44   :  { %1869 = vmatpush.bf16.msra.mxu2 %v4844_v22  ;;  %1835 = vmatmul.bf16.vlgmr.msrb.gmra.mxu3 %v3774_v27  ;;  %v4872_v22 = vld [vmem:[%s6581_s1 + $0x398] sm:$0xff]  ;;  %v4871_v26 = vld [vmem:[%s6581_s1 + $0x390] sm:$0xff] }
  0x45   :  { %1883 = vmatpush.bf16.msra.mxu3 %v4852_v23  ;;  %v4880_v23 = vld [vmem:[%s6581_s1 + $0x3d8] sm:$0xff]  ;;  %v4879_v27 = vld [vmem:[%s6581_s1 + $0x3d0] sm:$0xff] }
  0x46   :  { %1842 = vmatpush.bf16.msra.mxu0 %v4827_v28  ;;  %v4854_v28 = vld [vmem:[%s6581_s1 + $0x308] sm:$0xff] }
  0x47   :  { %1856 = vmatpush.bf16.msra.mxu1 %v4835_v29  ;;  %v4862_v29 = vld [vmem:[%s6581_s1 + $0x348] sm:$0xff] }
  0x48   :  { %1870 = vmatpush.bf16.msra.mxu2 %v4843_v30  ;;  %v4870_v30 = vld [vmem:[%s6581_s1 + $0x388] sm:$0xff] }
  0x49   :  { %1884 = vmatpush.bf16.msra.mxu3 %v4851_v31  ;;  %v4878_v31 = vld [vmem:[%s6581_s1 + $0x3c8] sm:$0xff] }
  0x4a   :  { %1843 = vmatpush.bf16.msra.mxu0 %v4826_v32  ;;  %v4853_v32 = vld [vmem:[%s6581_s1 + $0x300] sm:$0xff] }
  0x4b   :  { %1857 = vmatpush.bf16.msra.mxu1 %v4834_v33  ;;  %v4861_v33 = vld [vmem:[%s6581_s1 + $0x340] sm:$0xff] }
  0x4c   :  { %1871 = vmatpush.bf16.msra.mxu2 %v4842_v34  ;;  %v4869_v34 = vld [vmem:[%s6581_s1 + $0x380] sm:$0xff] }
  0x4d   :  { %1885 = vmatpush.bf16.msra.mxu3 %v4850_v35  ;;  %v4877_v35 = vld [vmem:[%s6581_s1 + $0x3c0] sm:$0xff] }
  0x4e   :  { %1844 = vmatpush.bf16.msra.mxu0 %v4825_v36  ;;  %v4892_v36 = vld [vmem:[%s6581_s1 + $0x438] sm:$0xff] }
  0x4f   :  { %1858 = vmatpush.bf16.msra.mxu1 %v4833_v37  ;;  %v4900_v37 = vld [vmem:[%s6581_s1 + $0x478] sm:$0xff] }
  0x50   :  { %1872 = vmatpush.bf16.msra.mxu2 %v4841_v38  ;;  %v3793_v38 = vld [vmem:[%s6582_s0 + $0x30] sm:$0xf] }
  0x51   :  { %1886 = vmatpush.bf16.msra.mxu3 %v4849_v39  ;;  %v4751_v39 = vld [vmem:[%s6582_s0 + $0x8c] sm:$0xf0] }
  0x52   :  { %1845 = vmatpush.bf16.msra.mxu0 %v4824_v40  ;;  %v3801_v40 = vld [vmem:[%s6582_s0 + $0x38] sm:$0xf] }
  0x53   :  { %1859 = vmatpush.bf16.msra.mxu1 %v4832_v41  ;;  %v4752_v41 = vld [vmem:[%s6582_s0 + $0x94] sm:$0xf0] }
  0x54   :  { %1873 = vmatpush.bf16.msra.mxu2 %v4840_v42  ;;  %v4739_v42 = vld [vmem:[%s6582_s0 + $0x34] sm:$0xf] }
  0x55   :  { %1887 = vmatpush.bf16.msra.mxu3 %v4848_v43  ;;  %v3795_v43 = vld [vmem:[%s6582_s0 + $0x90] sm:$0xf0] }
  0x56   :  { %1846 = vmatpush.bf16.msra.mxu0 %v4823_v44  ;;  %v4740_v44 = vld [vmem:[%s6582_s0 + $0x3c] sm:$0xf] }
  0x57   :  { %1860 = vmatpush.bf16.msra.mxu1 %v4831_v45  ;;  %v3803_v45 = vld [vmem:[%s6582_s0 + $0x98] sm:$0xf0] }
  0x58   :  { %1874 = vmatpush.bf16.msra.mxu2 %v4839_v46  ;;  %v4908_v46 = vld [vmem:[%s6581_s1 + $0x4b8] sm:$0xff] }
  0x59   :  { %1888 = vmatpush.bf16.msra.mxu3 %v4847_v47  ;;  %v4916_v47 = vld [vmem:[%s6581_s1 + $0x4f8] sm:$0xff] }
  0x5a   :  { %1847 = vmatpush.bf16.msra.mxu0 %v4822_v48  ;;  %v3794_v48 = vor.u32 %v4751_v39, %v3793_v38  ;;  %v4938_v38 = vld [vmem:[%s6581_s1 + $0x5a8] sm:$0xff] }
  0x5b   :  { %1861 = vmatpush.bf16.msra.mxu1 %v4830_v49  ;;  %v3802_v49 = vor.u32 %v4752_v41, %v3801_v40  ;;  %v4946_v39 = vld [vmem:[%s6581_s1 + $0x5e8] sm:$0xff]  ;;  %v4921_v40 = vld [vmem:[%s6581_s1 + $0x520] sm:$0xff] }
  0x5c   :  { %1875 = vmatpush.bf16.msra.mxu2 %v4838_v50  ;;  %v3798_v50 = vor.u32 %v4739_v42, %v3795_v43  ;;  %v4929_v41 = vld [vmem:[%s6581_s1 + $0x560] sm:$0xff] }
  0x5d   :  { %1889 = vmatpush.bf16.msra.mxu3 %v4846_v51  ;;  %v3806_v51 = vor.u32 %v4740_v44, %v3803_v45  ;;  %v4937_v42 = vld [vmem:[%s6581_s1 + $0x5a0] sm:$0xff]  ;;  %v4920_v44 = vld [vmem:[%s6581_s1 + $0x518] sm:$0xff] }
  0x5e   :  { %1848 = vmatpush.bf16.msra.mxu0 %v4821_v52  ;;  %v4891_v52 = vld [vmem:[%s6581_s1 + $0x430] sm:$0xff]  ;;  %v4945_v43 = vld [vmem:[%s6581_s1 + $0x5e0] sm:$0xff]  ;;  %v4928_v45 = vld [vmem:[%s6581_s1 + $0x558] sm:$0xff] }
  0x5f   :  { %1862 = vmatpush.bf16.msra.mxu1 %v4829_v53  ;;  %v4899_v53 = vld [vmem:[%s6581_s1 + $0x470] sm:$0xff] }
  0x60   :  { %1876 = vmatpush.bf16.msra.mxu2 %v4837_v54  ;;  %v4907_v54 = vld [vmem:[%s6581_s1 + $0x4b0] sm:$0xff] }
  0x61   :  { %1890 = vmatpush.bf16.msra.mxu3 %v4845_v55  ;;  %1849 = vmatmul.bf16.vlgmr.msra.gmra.mxu0 %v3778_v4  ;;  %v4915_v55 = vld [vmem:[%s6581_s1 + $0x4f0] sm:$0xff] }
  0x62   :  { %1897 = vmatpush.bf16.msrb.mxu0 %v4860_v56  ;;  %1863 = vmatmul.bf16.vlgmr.msra.gmra.mxu1 %v3782_v6  ;;  %v4890_v56 = vld [vmem:[%s6581_s1 + $0x428] sm:$0xff]  ;;  %v4887_v4 = vld [vmem:[%s6581_s1 + $0x410] sm:$0xff] }
  0x63   :  { %1911 = vmatpush.bf16.msrb.mxu1 %v4868_v57  ;;  %1877 = vmatmul.bf16.vlgmr.msra.gmra.mxu2 %v3786_v5  ;;  %v4898_v57 = vld [vmem:[%s6581_s1 + $0x468] sm:$0xff]  ;;  %v4895_v5 = vld [vmem:[%s6581_s1 + $0x450] sm:$0xff] }
  0x64   :  { %1925 = vmatpush.bf16.msrb.mxu2 %v4876_v2  ;;  %1891 = vmatmul.bf16.vlgmr.msra.gmra.mxu3 %v3790_v7  ;;  %v4904_v2 = vld [vmem:[%s6581_s1 + $0x498] sm:$0xff]  ;;  %v4903_v6 = vld [vmem:[%s6581_s1 + $0x490] sm:$0xff] }
  0x65   :  { %1939 = vmatpush.bf16.msrb.mxu3 %v4884_v3  ;;  %v4912_v3 = vld [vmem:[%s6581_s1 + $0x4d8] sm:$0xff]  ;;  %v4911_v7 = vld [vmem:[%s6581_s1 + $0x4d0] sm:$0xff] }
  0x66   :  { %1898 = vmatpush.bf16.msrb.mxu0 %v4859_v8  ;;  %v4886_v8 = vld [vmem:[%s6581_s1 + $0x408] sm:$0xff] }
  0x67   :  { %1912 = vmatpush.bf16.msrb.mxu1 %v4867_v9  ;;  %v4894_v9 = vld [vmem:[%s6581_s1 + $0x448] sm:$0xff] }
  0x68   :  { %1926 = vmatpush.bf16.msrb.mxu2 %v4875_v10  ;;  %v4902_v10 = vld [vmem:[%s6581_s1 + $0x488] sm:$0xff] }
  0x69   :  { %1940 = vmatpush.bf16.msrb.mxu3 %v4883_v11  ;;  %v4910_v11 = vld [vmem:[%s6581_s1 + $0x4c8] sm:$0xff] }
  0x6a   :  { %1899 = vmatpush.bf16.msrb.mxu0 %v4858_v12  ;;  %v4885_v12 = vld [vmem:[%s6581_s1 + $0x400] sm:$0xff] }
  0x6b   :  { %1913 = vmatpush.bf16.msrb.mxu1 %v4866_v13  ;;  %v4893_v13 = vld [vmem:[%s6581_s1 + $0x440] sm:$0xff] }
  0x6c   :  { %1927 = vmatpush.bf16.msrb.mxu2 %v4874_v14  ;;  %v4901_v14 = vld [vmem:[%s6581_s1 + $0x480] sm:$0xff] }
  0x6d   :  { %1941 = vmatpush.bf16.msrb.mxu3 %v4882_v15  ;;  %v4909_v15 = vld [vmem:[%s6581_s1 + $0x4c0] sm:$0xff] }
  0x6e   :  { %1900 = vmatpush.bf16.msrb.mxu0 %v4857_v16  ;;  %v4924_v16 = vld [vmem:[%s6581_s1 + $0x538] sm:$0xff] }
  0x6f   :  { %1914 = vmatpush.bf16.msrb.mxu1 %v4865_v17  ;;  %v4932_v17 = vld [vmem:[%s6581_s1 + $0x578] sm:$0xff] }
  0x70   :  { %1928 = vmatpush.bf16.msrb.mxu2 %v4873_v18  ;;  %v3809_v18 = vld [vmem:[%s6582_s0 + $0x40] sm:$0xf] }
  0x71   :  { %1942 = vmatpush.bf16.msrb.mxu3 %v4881_v19  ;;  %v4753_v19 = vld [vmem:[%s6582_s0 + $0x9c] sm:$0xf0] }
  0x72   :  { %1901 = vmatpush.bf16.msrb.mxu0 %v4856_v20  ;;  %v3817_v20 = vld [vmem:[%s6582_s0 + $0x48] sm:$0xf] }
  0x73   :  { %1915 = vmatpush.bf16.msrb.mxu1 %v4864_v21  ;;  %v4754_v21 = vld [vmem:[%s6582_s0 + $0xa4] sm:$0xf0] }
  0x74   :  { %1929 = vmatpush.bf16.msrb.mxu2 %v4872_v22  ;;  %v4741_v22 = vld [vmem:[%s6582_s0 + $0x44] sm:$0xf] }
  0x75   :  { %1943 = vmatpush.bf16.msrb.mxu3 %v4880_v23  ;;  %v3811_v23 = vld [vmem:[%s6582_s0 + $0xa0] sm:$0xf0] }
  0x76   :  { %1902 = vmatpush.bf16.msrb.mxu0 %v4855_v24  ;;  %v4742_v24 = vld [vmem:[%s6582_s0 + $0x4c] sm:$0xf] }
  0x77   :  { %1916 = vmatpush.bf16.msrb.mxu1 %v4863_v25  ;;  %v3819_v25 = vld [vmem:[%s6582_s0 + $0xa8] sm:$0xf0] }
  0x78   :  { %1930 = vmatpush.bf16.msrb.mxu2 %v4871_v26  ;;  %v4940_v26 = vld [vmem:[%s6581_s1 + $0x5b8] sm:$0xff] }
  0x79   :  { %1944 = vmatpush.bf16.msrb.mxu3 %v4879_v27  ;;  %v4948_v27 = vld [vmem:[%s6581_s1 + $0x5f8] sm:$0xff] }
  0x7a   :  { %1903 = vmatpush.bf16.msrb.mxu0 %v4854_v28  ;;  %v3810_v28 = vor.u32 %v4753_v19, %v3809_v18  ;;  %v455_v18 = vld [vmem:[%s6583_s2] sm:$0xff] }
  0x7b   :  { %1917 = vmatpush.bf16.msrb.mxu1 %v4862_v29  ;;  %v3818_v29 = vor.u32 %v4754_v21, %v3817_v20 }
  0x7c   :  { %1931 = vmatpush.bf16.msrb.mxu2 %v4870_v30  ;;  %v3814_v30 = vor.u32 %v4741_v22, %v3811_v23 }
  0x7d   :  { %1945 = vmatpush.bf16.msrb.mxu3 %v4878_v31  ;;  %v3822_v31 = vor.u32 %v4742_v24, %v3819_v25  ;;  %v456_v25 = vld [vmem:[%s6583_s2 + $0x8] sm:$0xff]  ;;  %s5106_s2 = smov 96  }
  0x7e   :  { %1904 = vmatpush.bf16.msrb.mxu0 %v4853_v32  ;;  %v4923_v32 = vld [vmem:[%s6581_s1 + $0x530] sm:$0xff] }
  0x7f   :  { %1918 = vmatpush.bf16.msrb.mxu1 %v4861_v33  ;;  %v4931_v33 = vld [vmem:[%s6581_s1 + $0x570] sm:$0xff] }
  0x80   :  { %1932 = vmatpush.bf16.msrb.mxu2 %v4869_v34  ;;  %v4939_v34 = vld [vmem:[%s6581_s1 + $0x5b0] sm:$0xff] }
  0x81   :  { %1946 = vmatpush.bf16.msrb.mxu3 %v4877_v35  ;;  %1905 = vmatmul.bf16.vlgmr.msrb.gmra.mxu0 %v3794_v48  ;;  %v4947_v35 = vld [vmem:[%s6581_s1 + $0x5f0] sm:$0xff] }
  0x82   :  { %1953 = vmatpush.bf16.msra.mxu0 %v4892_v36  ;;  %1919 = vmatmul.bf16.vlgmr.msrb.gmra.mxu1 %v3798_v50  ;;  %v4922_v36 = vld [vmem:[%s6581_s1 + $0x528] sm:$0xff]  ;;  %v4919_v48 = vld [vmem:[%s6581_s1 + $0x510] sm:$0xff] }
  0x83   :  { %1967 = vmatpush.bf16.msra.mxu1 %v4900_v37  ;;  %1933 = vmatmul.bf16.vlgmr.msrb.gmra.mxu2 %v3802_v49  ;;  %v4930_v37 = vld [vmem:[%s6581_s1 + $0x568] sm:$0xff]  ;;  %v4927_v49 = vld [vmem:[%s6581_s1 + $0x550] sm:$0xff] }
  0x84   :  { %1981 = vmatpush.bf16.msra.mxu2 %v4908_v46  ;;  %1947 = vmatmul.bf16.vlgmr.msrb.gmra.mxu3 %v3806_v51  ;;  %v4936_v46 = vld [vmem:[%s6581_s1 + $0x598] sm:$0xff]  ;;  %v4935_v50 = vld [vmem:[%s6581_s1 + $0x590] sm:$0xff] }
  0x85   :  { %1995 = vmatpush.bf16.msra.mxu3 %v4916_v47  ;;  %v4944_v47 = vld [vmem:[%s6581_s1 + $0x5d8] sm:$0xff]  ;;  %v4943_v51 = vld [vmem:[%s6581_s1 + $0x5d0] sm:$0xff] }
  0x86   :  { %1954 = vmatpush.bf16.msra.mxu0 %v4891_v52  ;;  %v4918_v52 = vld [vmem:[%s6581_s1 + $0x508] sm:$0xff] }
  0x87   :  { %1968 = vmatpush.bf16.msra.mxu1 %v4899_v53  ;;  %v4926_v53 = vld [vmem:[%s6581_s1 + $0x548] sm:$0xff] }
  0x88   :  { %1982 = vmatpush.bf16.msra.mxu2 %v4907_v54  ;;  %v4934_v54 = vld [vmem:[%s6581_s1 + $0x588] sm:$0xff] }
  0x89   :  { %1996 = vmatpush.bf16.msra.mxu3 %v4915_v55  ;;  %v4942_v55 = vld [vmem:[%s6581_s1 + $0x5c8] sm:$0xff] }
  0x8a   :  { %1955 = vmatpush.bf16.msra.mxu0 %v4890_v56  ;;  %v4917_v56 = vld [vmem:[%s6581_s1 + $0x500] sm:$0xff] }
  0x8b   :  { %1969 = vmatpush.bf16.msra.mxu1 %v4898_v57  ;;  %v4925_v57 = vld [vmem:[%s6581_s1 + $0x540] sm:$0xff] }
  0x8c   :  { %1983 = vmatpush.bf16.msra.mxu2 %v4906_v58  ;;  %v4933_v58 = vld [vmem:[%s6581_s1 + $0x580] sm:$0xff] }
  0x8d   :  { %1997 = vmatpush.bf16.msra.mxu3 %v4914_v59  ;;  %v4941_v59 = vld [vmem:[%s6581_s1 + $0x5c0] sm:$0xff] }
  0x8e   :  { %1956 = vmatpush.bf16.msra.mxu0 %v4889_v60  ;;  %v3825_v60 = vld [vmem:[%s6582_s0 + $0x50] sm:$0xf] }
  0x8f   :  { %1970 = vmatpush.bf16.msra.mxu1 %v4897_v61  ;;  %v4755_v61 = vld [vmem:[%s6582_s0 + $0xac] sm:$0xf0] }
  0x90   :  { %1984 = vmatpush.bf16.msra.mxu2 %v4905_v62  ;;  %v4743_v62 = vld [vmem:[%s6582_s0 + $0x54] sm:$0xf] }
  0x91   :  { %1998 = vmatpush.bf16.msra.mxu3 %v4913_v63  ;;  %v3827_v63 = vld [vmem:[%s6582_s0 + $0xb0] sm:$0xf0] }
  0x92   :  { %1957 = vmatpush.bf16.msra.mxu0 %v4888_v0  ;;  %v3833_v0 = vld [vmem:[%s6582_s0 + $0x58] sm:$0xf] }
  0x93   :  { %1971 = vmatpush.bf16.msra.mxu1 %v4896_v1  ;;  %v4756_v1 = vld [vmem:[%s6582_s0 + $0xb4] sm:$0xf0] }
  0x94   :  { %1985 = vmatpush.bf16.msra.mxu2 %v4904_v2  ;;  %v4744_v2 = vld [vmem:[%s6582_s0 + $0x5c] sm:$0xf] }
  0x95   :  { %1999 = vmatpush.bf16.msra.mxu3 %v4912_v3  ;;  %v3835_v3 = vld [vmem:[%s6582_s0 + $0xb8] sm:$0xf0]  ;;  %s5102_s0 = smov 64  }
  0x96   :  { %1958 = vmatpush.bf16.msra.mxu0 %v4887_v4  ;;  %v3826_v4 = vor.u32 %v4755_v61, %v3825_v60 }
  0x97   :  { %1972 = vmatpush.bf16.msra.mxu1 %v4895_v5  ;;  %v3830_v5 = vor.u32 %v4743_v62, %v3827_v63 }
  0x98   :  { %1986 = vmatpush.bf16.msra.mxu2 %v4903_v6  ;;  %v3834_v6 = vor.u32 %v4756_v1, %v3833_v0 }
  0x99   :  { %2000 = vmatpush.bf16.msra.mxu3 %v4911_v7  ;;  %v3838_v7 = vor.u32 %v4744_v2, %v3835_v3 }
  0x9a   :  { %1959 = vmatpush.bf16.msra.mxu0 %v4886_v8 }
  0x9b   :  { %1973 = vmatpush.bf16.msra.mxu1 %v4894_v9 }
  0x9c   :  { %1987 = vmatpush.bf16.msra.mxu2 %v4902_v10 }
  0x9d   :  { %2001 = vmatpush.bf16.msra.mxu3 %v4910_v11 }
  0x9e   :  { %1960 = vmatpush.bf16.msra.mxu0 %v4885_v12  ;;  %v1738_v8 = vpop.f32.mrf.mxu0 }
  0x9f   :  { %1974 = vmatpush.bf16.msra.mxu1 %v4893_v13  ;;  %v1752_v9 = vpop.f32.mrf.mxu1  ;;  %v1739_v21 = vadd.f32 %v1738_v8, %v455_v18 }
  0xa0   :  { %1988 = vmatpush.bf16.msra.mxu2 %v4901_v14 }
  0xa1   :  { %2002 = vmatpush.bf16.msra.mxu3 %v4909_v15  ;;  %1961 = vmatmul.bf16.vlgmr.msra.gmra.mxu0 %v3810_v28  ;;  %v1753_v23 = vadd.f32 %v1752_v9, %v1739_v21 }
  0xa2   :  { %2009 = vmatpush.bf16.msrb.mxu0 %v4924_v16  ;;  %1975 = vmatmul.bf16.vlgmr.msra.gmra.mxu1 %v3814_v30 }
  0xa3   :  { %2023 = vmatpush.bf16.msrb.mxu1 %v4932_v17  ;;  %1989 = vmatmul.bf16.vlgmr.msra.gmra.mxu2 %v3818_v29 }
  0xa4   :  { %2037 = vmatpush.bf16.msrb.mxu2 %v4940_v26  ;;  %2003 = vmatmul.bf16.vlgmr.msra.gmra.mxu3 %v3822_v31 }
  0xa5   :  { %2051 = vmatpush.bf16.msrb.mxu3 %v4948_v27 }
  0xa6   :  { %2010 = vmatpush.bf16.msrb.mxu0 %v4923_v32  ;;  %v1766_v10 = vpop.f32.mrf.mxu2  ;;  %v1740_v12 = vpop.f32.mrf.mxu0 }
  0xa7   :  { %2024 = vmatpush.bf16.msrb.mxu1 %v4931_v33  ;;  %v1780_v11 = vpop.f32.mrf.mxu3  ;;  %v1754_v13 = vpop.f32.mrf.mxu1  ;;  %v1767_v26 = vadd.f32 %v1766_v10, %v1753_v23  ;;  %v1741_v29 = vadd.f32 %v1740_v12, %v456_v25 }
  0xa8   :  { %2038 = vmatpush.bf16.msrb.mxu2 %v4939_v34 }
  0xa9   :  { %2052 = vmatpush.bf16.msrb.mxu3 %v4947_v35  ;;  %v1781_v31 = vadd.f32 %v1780_v11, %v1767_v26  ;;  %v1755_v33 = vadd.f32 %v1754_v13, %v1741_v29 }
  0xaa   :  { %2011 = vmatpush.bf16.msrb.mxu0 %v4922_v36 }
  0xab   :  { %2025 = vmatpush.bf16.msrb.mxu1 %v4930_v37 }
  0xac   :  { %2039 = vmatpush.bf16.msrb.mxu2 %v4938_v38 }
  0xad   :  { %2053 = vmatpush.bf16.msrb.mxu3 %v4946_v39 }
  0xae   :  { %2012 = vmatpush.bf16.msrb.mxu0 %v4921_v40  ;;  %v1768_v14 = vpop.f32.mrf.mxu2 }
  0xaf   :  { %2026 = vmatpush.bf16.msrb.mxu1 %v4929_v41  ;;  %v1782_v15 = vpop.f32.mrf.mxu3  ;;  %v1769_v37 = vadd.f32 %v1768_v14, %v1755_v33 }
  0xb0   :  { %2040 = vmatpush.bf16.msrb.mxu2 %v4937_v42 }
  0xb1   :  { %2054 = vmatpush.bf16.msrb.mxu3 %v4945_v43  ;;  %v1783_v40 = vadd.f32 %v1782_v15, %v1769_v37 }
  0xb2   :  { %2013 = vmatpush.bf16.msrb.mxu0 %v4920_v44 }
  0xb3   :  { %2027 = vmatpush.bf16.msrb.mxu1 %v4928_v45 }
  0xb4   :  { %2041 = vmatpush.bf16.msrb.mxu2 %v4936_v46 }
  0xb5   :  { %2055 = vmatpush.bf16.msrb.mxu3 %v4944_v47 }
  0xb6   :  { %2014 = vmatpush.bf16.msrb.mxu0 %v4919_v48 }
  0xb7   :  { %2028 = vmatpush.bf16.msrb.mxu1 %v4927_v49 }
  0xb8   :  { %2042 = vmatpush.bf16.msrb.mxu2 %v4935_v50 }
  0xb9   :  { %2056 = vmatpush.bf16.msrb.mxu3 %v4943_v51 }
  0xba   :  { %2015 = vmatpush.bf16.msrb.mxu0 %v4918_v52 }
  0xbb   :  { %2029 = vmatpush.bf16.msrb.mxu1 %v4926_v53 }
  0xbc   :  { %2043 = vmatpush.bf16.msrb.mxu2 %v4934_v54 }
  0xbd   :  { %2057 = vmatpush.bf16.msrb.mxu3 %v4942_v55 }
  0xbe   :  { %2016 = vmatpush.bf16.msrb.mxu0 %v4917_v56  ;;  %v1794_v16 = vpop.f32.mrf.mxu0 }
  0xbf   :  { %2030 = vmatpush.bf16.msrb.mxu1 %v4925_v57  ;;  %v1808_v17 = vpop.f32.mrf.mxu1  ;;  %v1795_v34 = vadd.f32 %v1794_v16, %v1781_v31 }
  0xc0   :  { %2044 = vmatpush.bf16.msrb.mxu2 %v4933_v58 }
  0xc1   :  { %2058 = vmatpush.bf16.msrb.mxu3 %v4941_v59  ;;  %2017 = vmatmul.bf16.vlgmr.msrb.gmra.mxu0 %v3826_v4  ;;  %v1809_v38 = vadd.f32 %v1808_v17, %v1795_v34 }
  0xc2   :  { %2031 = vmatmul.bf16.vlgmr.msrb.gmra.mxu1 %v3830_v5 }
  0xc3   :  { %2045 = vmatmul.bf16.vlgmr.msrb.gmra.mxu2 %v3834_v6 }
  0xc4   :  { %2059 = vmatmul.bf16.vlgmr.msrb.gmra.mxu3 %v3838_v7 }
  0xc6   :  { %v1822_v19 = vpop.f32.mrf.mxu2  ;;  %v1796_v22 = vpop.f32.mrf.mxu0 }
  0xc7   :  { %v1836_v20 = vpop.f32.mrf.mxu3  ;;  %v1810_v24 = vpop.f32.mrf.mxu1  ;;  %v1823_v42 = vadd.f32 %v1822_v19, %v1809_v38  ;;  %v1797_v43 = vadd.f32 %v1796_v22, %v1783_v40 }
  0xc9   :  { %v1837_v46 = vadd.f32 %v1836_v20, %v1823_v42  ;;  %v1811_v48 = vadd.f32 %v1810_v24, %v1797_v43 }
  0xce   :  { %v1824_v27 = vpop.f32.mrf.mxu2 }
  0xcf   :  { %v1838_v28 = vpop.f32.mrf.mxu3  ;;  %v1825_v51 = vadd.f32 %v1824_v27, %v1811_v48 }
  0xd1   :  { %v1839_v55 = vadd.f32 %v1838_v28, %v1825_v51 }
  0xde   :  { %v1850_v30 = vpop.f32.mrf.mxu0 }
  0xdf   :  { %v1864_v32 = vpop.f32.mrf.mxu1  ;;  %v1851_v49 = vadd.f32 %v1850_v30, %v1837_v46 }
  0xe1   :  { %v1865_v52 = vadd.f32 %v1864_v32, %v1851_v49 }
  0xe6   :  { %v1878_v35 = vpop.f32.mrf.mxu2  ;;  %v1852_v39 = vpop.f32.mrf.mxu0 }
  0xe7   :  { %v1892_v36 = vpop.f32.mrf.mxu3  ;;  %v1866_v41 = vpop.f32.mrf.mxu1  ;;  %v1879_v56 = vadd.f32 %v1878_v35, %v1865_v52  ;;  %v1853_v57 = vadd.f32 %v1852_v39, %v1839_v55 }
  0xe9   :  { %v1893_v59 = vadd.f32 %v1892_v36, %v1879_v56  ;;  %v1867_v61 = vadd.f32 %v1866_v41, %v1853_v57 }
  0xee   :  { %v1880_v44 = vpop.f32.mrf.mxu2 }
  0xef   :  { %v1894_v45 = vpop.f32.mrf.mxu3  ;;  %v1881_v63 = vadd.f32 %v1880_v44, %v1867_v61  ;;  %v5101_v44 = vmov 64.0   ;;  %v2133_v61 = vld [vmem:[%s6584_s4 + $0x70] sm:$0xff] }
  0xf0   :  { %4997 = vrcp.f32 %v5101_v44  ;;  %2155 = vmatpush.msra.mxu0 %v2133_v61 }
  0xf1   :  { %v1895_v4 = vadd.f32 %v1894_v45, %v1881_v63  ;;  %v2131_v63 = vld [vmem:[%s6584_s4 + $0x60] sm:$0xff] }
  0xf2   :  { %2156 = vmatpush.msra.mxu0 %v2131_v63 }
  0xf6   :  { %v4998_v45 = vpop.eup %4997 }
  0xf7   :  { %v2075_v46 = vmul.f32 64.0, %v4998_v45  ;;  %vm2079_vm1 = vweird.f32 %v4998_v45 }
  0xfe   :  { %v1906_v47 = vpop.f32.mrf.mxu0 }
  0xff   :  { %v1920_v50 = vpop.f32.mrf.mxu1  ;;  %v1907_v62 = vadd.f32 %v1906_v47, %v1893_v59  ;;  %v2076_v47 = vsub.f32 1.0, %v2075_v46 }
 0x101   :  { %v1921_v2 = vadd.f32 %v1920_v50, %v1907_v62  ;;  %v2077_v48 = vmul.f32 %v4998_v45, %v2076_v47  ;;  %v2134_v62 = vld [vmem:[%s6584_s4 + $0x78] sm:$0xff] }
 0x102   :  { %2178 = vmatpush.msra.mxu1 %v2134_v62 }
 0x103   :  { %v2078_v49 = vadd.f32 %v4998_v45, %v2077_v48 }
 0x105   :  { %v5919_v50 = vsel %vm2079_vm1, %v4998_v45, %v2078_v49 }
 0x106   :  { %v1934_v53 = vpop.f32.mrf.mxu2  ;;  %v1908_v58 = vpop.f32.mrf.mxu0 }
 0x107   :  { %v1948_v54 = vpop.f32.mrf.mxu3  ;;  %v1922_v60 = vpop.f32.mrf.mxu1  ;;  %v1935_v5 = vadd.f32 %v1934_v53, %v1921_v2  ;;  %v1909_v7 = vadd.f32 %v1908_v58, %v1895_v4  ;;  %v2130_v2 = vld [vmem:[%s6584_s4 + $0x58] sm:$0xff]  ;;  %v2128_v4 = vld [vmem:[%s6584_s4 + $0x48] sm:$0xff] }
 0x109   :  { %v1949_v8 = vadd.f32 %v1948_v54, %v1935_v5  ;;  %v1923_v11 = vadd.f32 %v1922_v60, %v1909_v7  ;;  %v2125_v5 = vld [vmem:[%s6584_s4 + $0x30] sm:$0xff]  ;;  %v2123_v7 = vld [vmem:[%s6584_s4 + $0x20] sm:$0xff] }
 0x10e   :  { %v1936_v0 = vpop.f32.mrf.mxu2 }
 0x10f   :  { %v1950_v1 = vpop.f32.mrf.mxu3  ;;  %v1937_v13 = vadd.f32 %v1936_v0, %v1923_v11  ;;  %v2132_v0 = vld [vmem:[%s6584_s4 + $0x68] sm:$0xff]  ;;  %v2119_v11 = vld [vmem:[%s6584_s4] sm:$0xff] }
 0x110   :  { %2179 = vmatpush.msra.mxu1 %v2132_v0  ;;  %v2065_v0 = vld [vmem:[%s6586_s3] sm:$0xff] }
 0x111   :  { %v1951_v17 = vadd.f32 %v1950_v1, %v1937_v13  ;;  %v2129_v1 = vld [vmem:[%s6584_s4 + $0x50] sm:$0xff] }
 0x112   :  { %2157 = vmatpush.msra.mxu0 %v2129_v1  ;;  %2180 = vmatpush.msra.mxu1 %v2130_v2 }
 0x114   :  { %2181 = vmatpush.msra.mxu1 %v2128_v4  ;;  %v2066_v4 = vld [vmem:[%s6586_s3 + $0x8] sm:$0xff] }
 0x11e   :  { %v1962_v3 = vpop.f32.mrf.mxu0 }
 0x11f   :  { %v1976_v6 = vpop.f32.mrf.mxu1  ;;  %v1963_v12 = vadd.f32 %v1962_v3, %v1949_v8  ;;  %v2127_v3 = vld [vmem:[%s6584_s4 + $0x40] sm:$0xff]  ;;  %v2124_v8 = vld [vmem:[%s6584_s4 + $0x28] sm:$0xff] }
 0x120   :  { %2158 = vmatpush.msra.mxu0 %v2127_v3 }
 0x121   :  { %v1977_v15 = vadd.f32 %v1976_v6, %v1963_v12  ;;  %v2126_v6 = vld [vmem:[%s6584_s4 + $0x38] sm:$0xff]  ;;  %v2120_v12 = vld [vmem:[%s6584_s4 + $0x8] sm:$0xff] }
 0x122   :  { %2159 = vmatpush.msra.mxu0 %v2125_v5  ;;  %2182 = vmatpush.msra.mxu1 %v2126_v6 }
 0x124   :  { %2160 = vmatpush.msra.mxu0 %v2123_v7  ;;  %2183 = vmatpush.msra.mxu1 %v2124_v8 }
 0x126   :  { %v1990_v9 = vpop.f32.mrf.mxu2  ;;  %v1964_v14 = vpop.f32.mrf.mxu0 }
 0x127   :  { %v2004_v10 = vpop.f32.mrf.mxu3  ;;  %v1978_v16 = vpop.f32.mrf.mxu1  ;;  %v1991_v18 = vadd.f32 %v1990_v9, %v1977_v15  ;;  %v1965_v19 = vadd.f32 %v1964_v14, %v1951_v17  ;;  %v2121_v9 = vld [vmem:[%s6584_s4 + $0x10] sm:$0xff] }
 0x128   :  { %2161 = vmatpush.msra.mxu0 %v2121_v9 }
 0x129   :  { %v2005_v22 = vadd.f32 %v2004_v10, %v1991_v18  ;;  %v1979_v24 = vadd.f32 %v1978_v16, %v1965_v19  ;;  %v2122_v10 = vld [vmem:[%s6584_s4 + $0x18] sm:$0xff] }
 0x12a   :  { %2184 = vmatpush.msra.mxu1 %v2122_v10  ;;  %2162 = vmatpush.msra.mxu0 %v2119_v11 }
 0x12c   :  { %2185 = vmatpush.msra.mxu1 %v2120_v12 }
 0x12e   :  { %v1992_v20 = vpop.f32.mrf.mxu2 }
 0x12f   :  { %v2006_v21 = vpop.f32.mrf.mxu3  ;;  %v1993_v27 = vadd.f32 %v1992_v20, %v1979_v24 }
 0x131   :  { %v2007_v31 = vadd.f32 %v2006_v21, %v1993_v27 }
 0x13e   :  { %v2018_v23 = vpop.f32.mrf.mxu0 }
 0x13f   :  { %v2019_v25 = vadd.f32 %v2018_v23, %v2005_v22  ;;  %v2032_v26 = vpop.f32.mrf.mxu1 }
 0x141   :  { %v2033_v28 = vadd.f32 %v2032_v26, %v2019_v25 }
 0x146   :  { %v2046_v29 = vpop.f32.mrf.mxu2  ;;  %v2020_v33 = vpop.f32.mrf.mxu0 }
 0x147   :  { %v2060_v30 = vpop.f32.mrf.mxu3  ;;  %v2047_v32 = vadd.f32 %v2046_v29, %v2033_v28  ;;  %v2021_v35 = vadd.f32 %v2020_v33, %v2007_v31  ;;  %v2034_v37 = vpop.f32.mrf.mxu1 }
 0x149   :  { %v5911_v34 = vadd.f32 %v2060_v30, %v2047_v32  ;;  %v2035_v38 = vadd.f32 %v2034_v37, %v2021_v35 }
 0x14b   :  { %v2068_v36 = vsel %vm2067_vm0, %v5911_v34, 0.0 }
 0x14c   :  { %2069 = vadd.xlane.f32.xlu0 %v2068_v36  ;;  %v2135_v36 = vld [vmem:[%s6585_s5] sm:$0x3] }
 0x14d   :  { %v2137_v37 = vperm.slane %v2135_v36, 0 }
 0x14e   :  { %v2048_v39 = vpop.f32.mrf.mxu2 }
 0x14f   :  { %v2049_v40 = vadd.f32 %v2048_v39, %v2035_v38  ;;  %v2062_v41 = vpop.f32.mrf.mxu3 }
 0x151   :  { %v5915_v42 = vadd.f32 %v2062_v41, %v2049_v40  ;;  %v2138_v41 = vperm.slane %v2135_v36, 1 }
 0x153   :  { %v2071_v43 = vsel %vm2067_vm0, %v5915_v42, 0.0 }
 0x154   :  { %2072 = vadd.xlane.f32.xlu0 %v2071_v43 }
 0x1bf   :  { %v2070_v51 = vpop.xlane.xlu0 %2069 }
 0x1c0   :  { %v2081_v52 = vmul.f32 %v5919_v50, %v2070_v51 }
 0x1c2   :  { %v5923_v53 = vsub.f32 %v5911_v34, %v2081_v52 }
 0x1c4   :  { %v2085_v54 = vmul.f32 %v5923_v53, %v5923_v53 }
 0x1c6   :  { %v2087_v55 = vsel %vm2067_vm0, %v2085_v54, 0.0 }
 0x1c7   :  { %2088 = vadd.xlane.f32.xlu1 %v2087_v55  ;;  %v2073_v56 = vpop.xlane.xlu0 %2072 }
 0x1c8   :  { %v2082_v57 = vmul.f32 %v5919_v50, %v2073_v56 }
 0x1ca   :  { %v5930_v58 = vsub.f32 %v5915_v42, %v2082_v57 }
 0x1cc   :  { %v2086_v59 = vmul.f32 %v5930_v58, %v5930_v58 }
 0x1ce   :  { %v2090_v60 = vsel %vm2067_vm0, %v2086_v59, 0.0 }
 0x1cf   :  { %2091 = vadd.xlane.f32.xlu1 %v2090_v60 }
 0x23a   :  { %v2089_v13 = vpop.xlane.xlu1 %2088 }
 0x23b   :  { %v2093_v14 = vmul.f32 %v2089_v13, %v5919_v50 }
 0x23d   :  { %v2095_v15 = vadd.f32 1e-06, %v2093_v14 }
 0x23f   :  { %4999 = vrsqrt.f32 %v2095_v15  ;;  %vm2103_vm3 = vweird.f32 %v2095_v15 }
 0x242   :  { %v2092_v16 = vpop.xlane.xlu1 %2091 }
 0x243   :  { %v2094_v17 = vmul.f32 %v2092_v16, %v5919_v50 }
 0x245   :  { %v5000_v18 = vpop.eup %4999  ;;  %v2096_v19 = vadd.f32 1e-06, %v2094_v17 }
 0x246   :  { %v2098_v20 = vmul.f32 %v5000_v18, %v2095_v15  ;;  %vm2104_vm2 = vweird.f32 %v5000_v18 }
 0x247   :  { %5001 = vrsqrt.f32 %v2096_v19  ;;  %vm2105_vm4 = vmor %vm2103_vm3, %vm2104_vm2  ;;  %vm2113_vm6 = vweird.f32 %v2096_v19 }
 0x248   :  { %v2099_v21 = vmul.f32 %v5000_v18, %v2098_v20 }
 0x24a   :  { %v2100_v22 = vmul.f32 0.5, %v2099_v21 }
 0x24c   :  { %v2101_v23 = vsub.f32 1.5, %v2100_v22 }
 0x24d   :  { %v5002_v24 = vpop.eup %5001 }
 0x24e   :  { %v2102_v25 = vmul.f32 %v5000_v18, %v2101_v23  ;;  %v2108_v26 = vmul.f32 %v5002_v24, %v2096_v19  ;;  %vm2114_vm5 = vweird.f32 %v5002_v24 }
 0x24f   :  { %vm2115_vm7 = vmor %vm2113_vm6, %vm2114_vm5 }
 0x250   :  { %v2106_v27 = vsel %vm2105_vm4, %v5000_v18, %v2102_v25  ;;  %v2109_v28 = vmul.f32 %v5002_v24, %v2108_v26 }
 0x251   :  { %v2117_v29 = vmul.f32 %v2106_v27, %v5923_v53 }
 0x252   :  { %v2110_v30 = vmul.f32 0.5, %v2109_v28 }
 0x253   :  { %4607 = vmatmul.msk.f32.vlgmr.msra.gmra.mxu0 %vm2067_vm0, %v2117_v29  ;;  %4609 = vmatmul.msk.f32.vlgmr.msra.gmra.mxu1 %vm2067_vm0, %v2117_v29 }
 0x254   :  { %v2111_v31 = vsub.f32 1.5, %v2110_v30 }
 0x256   :  { %v2112_v32 = vmul.f32 %v5002_v24, %v2111_v31 }
 0x258   :  { %v2116_v33 = vsel %vm2115_vm7, %v5002_v24, %v2112_v32 }
 0x259   :  { %v2118_v35 = vmul.f32 %v2116_v33, %v5930_v58 }
 0x25b   :  { %4608 = vmatmul.msk.f32.gmra.mxu0 %vm2067_vm0, %v2118_v35  ;;  %4610 = vmatmul.msk.f32.gmra.mxu1 %vm2067_vm0, %v2118_v35 }
 0x2d0   :  { %v2164_v38 = vpop.f32.mrf.mxu0  ;;  %v2187_v39 = vpop.f32.mrf.mxu1 }
 0x2d1   :  { %v2165_v40 = vadd.f32 %v2164_v38, %v2137_v37  ;;  %v2188_v45 = vadd.f32 %v2187_v39, %v2138_v41 }
 0x2d3   :  { %2195 = vrot.lane.b32.xlu2 %v2165_v40, %s5102_s0 }
 0x2d8   :  { %v2167_v43 = vpop.f32.mrf.mxu0  ;;  %v2190_v44 = vpop.f32.mrf.mxu1 }
 0x2d9   :  { %v2168_v46 = vadd.f32 %v2167_v43, %v2137_v37  ;;  %v2191_v47 = vadd.f32 %v2190_v44, %v2138_v41 }
 0x2db   :  { %2273 = vmatpush.msra.mxu3 %v2191_v47  ;;  %2386 = vrot.lane.b32.xlu1 %v2168_v46, %s5103_s28  ;;  %v5996_v48 = vpack.i.bf16 %v2188_v45, %v2191_v47 }
 0x2dc   :  { %2288 = vrot.lane.b32.xlu0 %v2168_v46, %s5104_s29  ;;  %2197 = vrot.lane.b32.xlu2 %v2168_v46, %s5102_s0 }
 0x2dd   :  { %2274 = vmatpush.msra.mxu3 %v2188_v45 }
 0x2e3   :  { %2482 = vrot.lane.b32.xlu1 %v2168_v46, %s5105_s30 }
 0x2e4   :  { %2380 = vrot.lane.b32.xlu0 %v2165_v40, %s5106_s2  ;;  %2286 = vrot.lane.b32.xlu2 %v2165_v40, %s5104_s29 }
 0x2eb   :  { %2476 = vrot.lane.b32.xlu1 %v2165_v40, %s5107_s15 }
 0x2ec   :  { %2382 = vrot.lane.b32.xlu0 %v2168_v46, %s5106_s2  ;;  %2282 = vrot.lane.b32.xlu2 %v2165_v40, %s5108_s16 }
 0x2f4   :  { %2478 = vrot.lane.b32.xlu0 %v2168_v46, %s5107_s15  ;;  %2384 = vrot.lane.b32.xlu2 %v2165_v40, %s5103_s28 }
 0x2fc   :  { %2284 = vrot.lane.b32.xlu2 %v2168_v46, %s5108_s16 }
 0x304   :  { %2480 = vrot.lane.b32.xlu2 %v2165_v40, %s5105_s30 }
 0x32d   :  { %v2196_v49 = vpop.permute.xlu2 %2195 }
 0x336   :  { %v2198_v51 = vpop.permute.xlu2 %2197 }
 0x337   :  { %4611 = vmatpush.xpose.msk.msrb.mxu0 %vm2199_vm8, %v2198_v51  ;;  %4949 = vmatpush.xpose.msk.msra.mxu2 %vm2199_vm8, %v2198_v51 }
 0x33b   :  { %4612 = vmatpush.xpose.msk.msrb.mxu0 %vm2199_vm8, %v2196_v49  ;;  %4950 = vmatpush.xpose.msk.msra.mxu2 %vm2199_vm8, %v2196_v49 }
 0x33e   :  { %4613 = vmatmul.msk.f32.vlgmr.msrb.gmra.mxu0 %vm2199_vm8, %v2165_v40  ;;  %4614 = vmatmul.msk.f32.vlgmr.msra.gmra.mxu2 %vm2199_vm8, %v2168_v46  ;;  %v2287_v52 = vpop.permute.xlu2 %2286 }
 0x346   :  { %v2283_v53 = vpop.permute.xlu2 %2282 }
 0x34d   :  { %v2387_v54 = vpop.permute.xlu1 %2386 }
 0x34e   :  { %v2289_v55 = vpop.permute.xlu0 %2288  ;;  %v2385_v56 = vpop.permute.xlu2 %2384  ;;  %4623 = vmatpush.xpose.msk.msrb.mxu2 %vm2199_vm8, %v2387_v54 }
 0x34f   :  { %4617 = vmatpush.xpose.msk.msra.mxu0 %vm2199_vm8, %v2289_v55 }
 0x352   :  { %4624 = vmatpush.xpose.msk.msrb.mxu2 %vm2199_vm8, %v2385_v56 }
 0x353   :  { %4618 = vmatpush.xpose.msk.msra.mxu0 %vm2199_vm8, %v2287_v52 }
 0x355   :  { %v2483_v57 = vpop.permute.xlu1 %2482 }
 0x356   :  { %v2381_v58 = vpop.permute.xlu0 %2380  ;;  %4619 = vmatmul.msk.f32.vlgmr.msra.gmra.mxu0 %vm2199_vm8, %v2283_v53  ;;  %v2285_v59 = vpop.permute.xlu2 %2284 }
 0x357   :  { %4625 = vmatmul.msk.f32.vlgmr.msrb.gmra.mxu2 %vm2199_vm8, %v2381_v58  ;;  %4629 = vmatpush.xpose.msk.msrb.mxu0 %vm2199_vm8, %v2483_v57 }
 0x35d   :  { %v2477_v62 = vpop.permute.xlu1 %2476 }
 0x35e   :  { %v2383_v60 = vpop.permute.xlu0 %2382  ;;  %4620 = vmatmul.msk.f32.gmra.mxu0 %vm2199_vm8, %v2285_v59  ;;  %v2481_v61 = vpop.permute.xlu2 %2480 }
 0x35f   :  { %4626 = vmatmul.msk.f32.gmra.mxu2 %vm2199_vm8, %v2383_v60  ;;  %4630 = vmatpush.xpose.msk.msrb.mxu0 %vm2199_vm8, %v2481_v61 }
 0x366   :  { %4631 = vmatmul.msk.f32.vlgmr.msrb.gmra.mxu0 %vm2199_vm8, %v2477_v62  ;;  %v2479_v63 = vpop.permute.xlu0 %2478 }
 0x36e   :  { %4632 = vmatmul.msk.f32.gmra.mxu0 %vm2199_vm8, %v2479_v63 }
 0x3bb   :  { %v2225_v1 = vpop.f32.mrf.mxu0 }
 0x3bc   :  { %v2226_v2 = vadd.f32 %v2225_v1, %v2065_v0 }
 0x3be   :  { %v2231_v3 = vsel %vm2199_vm8, %v2226_v2, -inf }
 0x3bf   :  { %2232 = vmax.xlane.f32.xlu2 %v2231_v3 }
 0x3c1   :  { %v2228_v5 = vpop.f32.mrf.mxu2 }
 0x3c2   :  { %v2229_v6 = vadd.f32 %v2228_v5, %v2066_v4 }
 0x3c4   :  { %v2234_v7 = vsel %vm2199_vm8, %v2229_v6, -inf }
 0x3c5   :  { %2235 = vmax.xlane.f32.xlu0 %v2234_v7 }
 0x3d3   :  { %v2315_v8 = vpop.f32.mrf.mxu0 }
 0x3d4   :  { %v2316_v9 = vadd.f32 %v2315_v8, %v2065_v0 }
 0x3d6   :  { %v2321_v10 = vsel %vm2199_vm8, %v2316_v9, -inf }
 0x3d7   :  { %2322 = vmax.xlane.f32.xlu1 %v2321_v10 }
 0x3da   :  { %v2413_v11 = vpop.f32.mrf.mxu2 }
 0x3db   :  { %v2414_v12 = vadd.f32 %v2413_v11, %v2065_v0  ;;  %v2318_v13 = vpop.f32.mrf.mxu0 }
 0x3dc   :  { %v2319_v14 = vadd.f32 %v2318_v13, %v2066_v4 }
 0x3dd   :  { %v2419_v15 = vsel %vm2199_vm8, %v2414_v12, -inf }
 0x3de   :  { %v2324_v16 = vsel %vm2199_vm8, %v2319_v14, -inf }
 0x3df   :  { %2420 = vmax.xlane.f32.xlu1 %v2419_v15  ;;  %2325 = vmax.xlane.f32.xlu2 %v2324_v16 }
 0x3e2   :  { %v2416_v17 = vpop.f32.mrf.mxu2 }
 0x3e3   :  { %v2417_v18 = vadd.f32 %v2416_v17, %v2066_v4  ;;  %v2509_v19 = vpop.f32.mrf.mxu0 }
 0x3e4   :  { %v2510_v20 = vadd.f32 %v2509_v19, %v2065_v0 }
 0x3e5   :  { %v2422_v21 = vsel %vm2199_vm8, %v2417_v18, -inf }
 0x3e6   :  { %v2515_v22 = vsel %vm2199_vm8, %v2510_v20, -inf }
 0x3e7   :  { %2423 = vmax.xlane.f32.xlu2 %v2422_v21  ;;  %2516 = vmax.xlane.f32.xlu0 %v2515_v22 }
 0x3eb   :  { %v2512_v23 = vpop.f32.mrf.mxu0 }
 0x3ec   :  { %v2513_v24 = vadd.f32 %v2512_v23, %v2066_v4 }
 0x3ee   :  { %v2518_v25 = vsel %vm2199_vm8, %v2513_v24, -inf }
 0x3ef   :  { %2519 = vmax.xlane.f32.xlu1 %v2518_v25 }
 0x432   :  { %v2233_v26 = vpop.xlane.xlu2 %2232 }
 0x433   :  { %v2237_v27 = vsub.f32 %v2226_v2, %v2233_v26 }
 0x435   :  { %v2239_v28 = vmul.f32 1.442695, %v2237_v27 }
 0x437   :  { %5003 = vpow2.f32 %v2239_v28 }
 0x438   :  { %v2236_v29 = vpop.xlane.xlu0 %2235 }
 0x439   :  { %v2238_v30 = vsub.f32 %v2229_v6, %v2236_v29 }
 0x43b   :  { %v2241_v31 = vmul.f32 1.442695, %v2238_v30 }
 0x43d   :  { %v5004_v32 = vpop.eup %5003  ;;  %5005 = vpow2.f32 %v2241_v31 }
 0x43e   :  { %v2243_v33 = vsel %vm2199_vm8, %v5004_v32, 0.0 }
 0x43f   :  { %2244 = vadd.xlane.f32.xlu0 %v2243_v33 }
 0x443   :  { %v5006_v35 = vpop.eup %5005 }
 0x444   :  { %v2246_v36 = vsel %vm2199_vm8, %v5006_v35, 0.0 }
 0x445   :  { %2247 = vadd.xlane.f32.xlu1 %v2246_v36 }
 0x44a   :  { %v2323_v37 = vpop.xlane.xlu1 %2322 }
 0x44b   :  { %v2327_v38 = vsub.f32 %v2316_v9, %v2323_v37 }
 0x44d   :  { %v2329_v39 = vmul.f32 1.442695, %v2327_v38 }
 0x44f   :  { %5007 = vpow2.f32 %v2329_v39 }
 0x452   :  { %v2421_v40 = vpop.xlane.xlu1 %2420  ;;  %v2326_v41 = vpop.xlane.xlu2 %2325 }
 0x453   :  { %v2425_v43 = vsub.f32 %v2414_v12, %v2421_v40  ;;  %v2328_v44 = vsub.f32 %v2319_v14, %v2326_v41  ;;  %4961 = vrot.lane.b32.xlu0 %v5996_v48, %s5108_s16 }
 0x455   :  { %v5008_v45 = vpop.eup %5007  ;;  %v2427_v46 = vmul.f32 1.442695, %v2425_v43  ;;  %v2331_v47 = vmul.f32 1.442695, %v2328_v44 }
 0x456   :  { %v2333_v49 = vsel %vm2199_vm8, %v5008_v45, 0.0 }
 0x457   :  { %5009 = vpow2.f32 %v2427_v46  ;;  %2334 = vadd.xlane.f32.xlu2 %v2333_v49  ;;  %v2611_v49 = vld [vmem:[%s6588_s6 + $0x38] sm:$0xff] }
 0x458   :  { %5011 = vpow2.f32 %v2331_v47  ;;  %2626 = vmatpush.msra.mxu2 %v2611_v49 }
 0x45a   :  { %v2517_v51 = vpop.xlane.xlu0 %2516  ;;  %v2424_v60 = vpop.xlane.xlu2 %2423 }
 0x45b   :  { %v2521_v52 = vsub.f32 %v2510_v20, %v2517_v51  ;;  %v2426_v61 = vsub.f32 %v2417_v18, %v2424_v60  ;;  %v2610_v51 = vld [vmem:[%s6588_s6 + $0x30] sm:$0xff] }
 0x45c   :  { %2627 = vmatpush.msra.mxu2 %v2610_v51 }
 0x45d   :  { %v5010_v53 = vpop.eup %5009  ;;  %v2523_v54 = vmul.f32 1.442695, %v2521_v52  ;;  %v2429_v62 = vmul.f32 1.442695, %v2426_v61  ;;  %v2609_v52 = vld [vmem:[%s6588_s6 + $0x28] sm:$0xff] }
 0x45e   :  { %v5012_v55 = vpop.eup %5011  ;;  %v2431_v56 = vsel %vm2199_vm8, %v5010_v53, 0.0  ;;  %2628 = vmatpush.msra.mxu2 %v2609_v52 }
 0x45f   :  { %5013 = vpow2.f32 %v2523_v54  ;;  %2432 = vadd.xlane.f32.xlu1 %v2431_v56  ;;  %v2336_v57 = vsel %vm2199_vm8, %v5012_v55, 0.0  ;;  %v2607_v54 = vld [vmem:[%s6588_s6 + $0x18] sm:$0xff]  ;;  %v2605_v56 = vld [vmem:[%s6588_s6 + $0x8] sm:$0xff] }
 0x460   :  { %2337 = vadd.xlane.f32.xlu2 %v2336_v57  ;;  %5015 = vpow2.f32 %v2429_v62  ;;  %v2604_v57 = vld [vmem:[%s6588_s6] sm:$0xff] }
 0x462   :  { %v2520_v1 = vpop.xlane.xlu1 %2519 }
 0x463   :  { %v2522_v2 = vsub.f32 %v2513_v24, %v2520_v1 }
 0x465   :  { %v6049_v58 = vpop.eup %5013  ;;  %v2525_v3 = vmul.f32 1.442695, %v2522_v2 }
 0x466   :  { %v2527_v59 = vsel %vm2199_vm8, %v6049_v58, 0.0  ;;  %v5016_v63 = vpop.eup %5015 }
 0x467   :  { %2528 = vadd.xlane.f32.xlu1 %v2527_v59  ;;  %v2434_v0 = vsel %vm2199_vm8, %v5016_v63, 0.0  ;;  %5017 = vpow2.f32 %v2525_v3 }
 0x46d   :  { %v5018_v4 = vpop.eup %5017 }
 0x46e   :  { %v2530_v5 = vsel %vm2199_vm8, %v5018_v4, 0.0 }
 0x478   :  { %4966 = vrot.lane.b32.xlu2 %v5996_v48, %s5106_s2 }
 0x47d   :  { %2435 = vadd.xlane.f32.xlu0 %v2434_v0 }
 0x480   :  { %4971 = vrot.lane.b32.xlu1 %v5996_v48, %s5107_s15 }
 0x4a1   :  { %2531 = vadd.xlane.f32.xlu2 %v2530_v5 }
 0x4b2   :  { %v2245_v6 = vpop.xlane.xlu0 %2244 }
 0x4b3   :  { %5019 = vrcp.f32 %v2245_v6  ;;  %v4990_v6 = vld [vmem:[%s6587_s7] ss:$0 sm:$0xff] }
 0x4b8   :  { %v2248_v7 = vpop.xlane.xlu1 %2247 }
 0x4b9   :  { %v5020_v8 = vpop.eup %5019  ;;  %5021 = vrcp.f32 %v2248_v7 }
 0x4ba   :  { %v2251_v9 = vmul.f32 %v5020_v8, %v5004_v32 }
 0x4bc   :  { %4615 = vmatmul.msk.f32.vlgmr.msra.gmra.mxu3 %vm2199_vm8, %v2251_v9 }
 0x4bf   :  { %v5022_v10 = vpop.eup %5021 }
 0x4c0   :  { %v2252_v11 = vmul.f32 %v5022_v10, %v5006_v35 }
 0x4c4   :  { %4616 = vmatmul.msk.f32.gmra.mxu3 %vm2199_vm8, %v2252_v11 }
 0x4c5   :  { %v4962_v48 = vpop.permute.xlu0 %4961 }
 0x4c6   :  { %v4963_v12 = vunpack.i.l.bf16 %v4962_v48  ;;  %v4964_v13 = vunpack.i.h.bf16 %v4962_v48 }
 0x4c8   :  { %2371 = vmatpush.msrb.mxu1 %v4963_v12 }
 0x4ca   :  { %2372 = vmatpush.msrb.mxu1 %v4964_v13  ;;  %v2335_v14 = vpop.xlane.xlu2 %2334 }
 0x4cb   :  { %5023 = vrcp.f32 %v2335_v14 }
 0x4d1   :  { %v5024_v15 = vpop.eup %5023 }
 0x4d2   :  { %v2341_v16 = vmul.f32 %v5024_v15, %v5008_v45  ;;  %v2433_v17 = vpop.xlane.xlu1 %2432 }
 0x4d3   :  { %v2338_v18 = vpop.xlane.xlu2 %2337 }
 0x4d4   :  { %5025 = vrcp.f32 %v2338_v18  ;;  %4621 = vmatmul.msk.f32.vlgmr.msrb.gmra.mxu1 %vm2199_vm8, %v2341_v16 }
 0x4d5   :  { %5027 = vrcp.f32 %v2433_v17 }
 0x4da   :  { %v5026_v19 = vpop.eup %5025  ;;  %v2529_v26 = vpop.xlane.xlu1 %2528 }
 0x4db   :  { %v4967_v20 = vpop.permute.xlu2 %4966  ;;  %v2342_v21 = vmul.f32 %v5026_v19, %v5012_v55  ;;  %v5028_v22 = vpop.eup %5027  ;;  %5029 = vrcp.f32 %v2529_v26  ;;  %v2606_v55 = vld [vmem:[%s6588_s6 + $0x10] sm:$0xff]  ;;  %v2696_v26 = vld [vmem:[%s6590_s8 + $0x18] sm:$0xff] }
 0x4dc   :  { %v4968_v23 = vunpack.i.l.bf16 %v4967_v20  ;;  %v4969_v24 = vunpack.i.h.bf16 %v4967_v20  ;;  %v2439_v25 = vmul.f32 %v5028_v22, %v5010_v53  ;;  %v2608_v53 = vld [vmem:[%s6588_s6 + $0x20] sm:$0xff]  ;;  %v2700_v22 = vld [vmem:[%s6590_s8 + $0x38] sm:$0xff] }
 0x4dd   :  { %4622 = vmatmul.msk.f32.gmra.mxu1 %vm2199_vm8, %v2342_v21  ;;  %2629 = vmatpush.msra.mxu2 %v2608_v53 }
 0x4de   :  { %2467 = vmatpush.msrb.mxu3 %v4968_v23  ;;  %v2699_v23 = vld [vmem:[%s6590_s8 + $0x30] sm:$0xff] }
 0x4df   :  { %2630 = vmatpush.msra.mxu2 %v2607_v54 }
 0x4e0   :  { %2468 = vmatpush.msrb.mxu3 %v4969_v24  ;;  %v2698_v24 = vld [vmem:[%s6590_s8 + $0x28] sm:$0xff] }
 0x4e1   :  { %4627 = vmatmul.msk.f32.vlgmr.msrb.gmra.mxu3 %vm2199_vm8, %v2439_v25  ;;  %v5030_v29 = vpop.eup %5029  ;;  %2631 = vmatpush.msra.mxu2 %v2606_v55  ;;  %v2697_v25 = vld [vmem:[%s6590_s8 + $0x20] sm:$0xff] }
 0x4e2   :  { %v2535_v32 = vmul.f32 %v5030_v29, %v6049_v58  ;;  %2719 = vmatpush.msra.mxu3 %v2700_v22  ;;  %v2693_v29 = vld [vmem:[%s6590_s8] sm:$0xff] }
 0x4e3   :  { %2632 = vmatpush.msra.mxu2 %v2605_v56  ;;  %v2829_v56 = vld [vmem:[%s6592_s10 + $0x78] sm:$0xff] }
 0x4e4   :  { %2720 = vmatpush.msra.mxu3 %v2699_v23  ;;  %2830 = vmatpush.msra.mxu0 %v2829_v56 }
 0x4e5   :  { %2633 = vmatpush.msra.mxu2 %v2604_v57  ;;  %v2828_v57 = vld [vmem:[%s6592_s10 + $0x70] sm:$0xff] }
 0x4e6   :  { %2721 = vmatpush.msra.mxu3 %v2698_v24  ;;  %2831 = vmatpush.msra.mxu0 %v2828_v57  ;;  %v2814_v24 = vld [vmem:[%s6592_s10] sm:$0xff] }
 0x4e8   :  { %2722 = vmatpush.msra.mxu3 %v2697_v25 }
 0x4ea   :  { %2723 = vmatpush.msra.mxu3 %v2696_v26 }
 0x4f0   :  { %v2436_v27 = vpop.xlane.xlu0 %2435 }
 0x4f1   :  { %5031 = vrcp.f32 %v2436_v27  ;;  %v2695_v27 = vld [vmem:[%s6590_s8 + $0x10] sm:$0xff] }
 0x4f2   :  { %v4972_v28 = vpop.permute.xlu1 %4971  ;;  %2724 = vmatpush.msra.mxu3 %v2695_v27 }
 0x4f3   :  { %v4973_v30 = vunpack.i.l.bf16 %v4972_v28  ;;  %v4974_v31 = vunpack.i.h.bf16 %v4972_v28  ;;  %v2694_v28 = vld [vmem:[%s6590_s8 + $0x8] sm:$0xff] }
 0x4f4   :  { %2725 = vmatpush.msra.mxu3 %v2694_v28 }
 0x4f5   :  { %2563 = vmatpush.msra.mxu1 %v4973_v30 }
 0x4f6   :  { %2726 = vmatpush.msra.mxu3 %v2693_v29 }
 0x4f7   :  { %v5032_v33 = vpop.eup %5031  ;;  %2564 = vmatpush.msra.mxu1 %v4974_v31 }
 0x4f8   :  { %4633 = vmatmul.msk.f32.vlgmr.msra.gmra.mxu1 %vm2199_vm8, %v2535_v32  ;;  %v2440_v35 = vmul.f32 %v5032_v33, %v5016_v63 }
 0x4fa   :  { %4628 = vmatmul.msk.f32.gmra.mxu3 %vm2199_vm8, %v2440_v35 }
 0x514   :  { %v2532_v36 = vpop.xlane.xlu2 %2531 }
 0x515   :  { %5033 = vrcp.f32 %v2532_v36 }
 0x51b   :  { %v5034_v37 = vpop.eup %5033 }
 0x51c   :  { %v2536_v38 = vmul.f32 %v5034_v37, %v5018_v4 }
 0x51e   :  { %4634 = vmatmul.msk.f32.gmra.mxu1 %vm2199_vm8, %v2536_v38 }
 0x53f   :  { %v2276_v40 = vpop.f32.mrf.mxu3 }
 0x547   :  { %v2279_v41 = vpop.f32.mrf.mxu3 }
 0x551   :  { %v2374_v39 = vpop.f32.mrf.mxu1 }
 0x552   :  { %2574 = vrot.lane.b32.xlu1 %v2374_v39, %s5105_s30 }
 0x55a   :  { %v2377_v44 = vpop.f32.mrf.mxu1 }
 0x564   :  { %v2470_v43 = vpop.f32.mrf.mxu3 }
 0x565   :  { %2582 = vrot.lane.b32.xlu1 %v2470_v43, %s5103_s28 }
 0x56d   :  { %2576 = vrot.lane.b32.xlu1 %v2377_v44, %s5105_s30 }
 0x575   :  { %v2566_v45 = vpop.f32.mrf.mxu1 }
 0x576   :  { %2590 = vrot.lane.b32.xlu0 %v2566_v45, %s5104_s29 }
 0x57d   :  { %v2473_v46 = vpop.f32.mrf.mxu3 }
 0x57e   :  { %2584 = vrot.lane.b32.xlu1 %v2473_v46, %s5103_s28 }
 0x59b   :  { %v2569_v47 = vpop.f32.mrf.mxu1 }
 0x59c   :  { %2592 = vrot.lane.b32.xlu2 %v2569_v47, %s5104_s29 }
 0x5c4   :  { %v2575_v58 = vpop.permute.xlu1 %2574 }
 0x5c5   :  { %v2596_v60 = vsel %vm2199_vm8, %v2276_v40, %v2575_v58  ;;  %v4991_v58 = vld [vmem:[%s6589_s9] ss:$0 sm:$0xff] }
 0x5d7   :  { %v2583_v59 = vpop.permute.xlu1 %2582 }
 0x5d8   :  { %v2599_v61 = vsel %vm2598_vm9, %v2596_v60, %v2583_v59  ;;  %v2827_v59 = vld [vmem:[%s6592_s10 + $0x68] sm:$0xff]  ;;  %v2826_v60 = vld [vmem:[%s6592_s10 + $0x60] sm:$0xff] }
 0x5d9   :  { %2832 = vmatpush.msra.mxu0 %v2827_v59 }
 0x5db   :  { %2833 = vmatpush.msra.mxu0 %v2826_v60 }
 0x5df   :  { %v2577_v0 = vpop.permute.xlu1 %2576 }
 0x5e0   :  { %v2597_v2 = vsel %vm2199_vm8, %v2279_v41, %v2577_v0 }
 0x5e8   :  { %v2591_v62 = vpop.permute.xlu0 %2590 }
 0x5e9   :  { %v2602_v63 = vsel %vm2601_vm10, %v2599_v61, %v2591_v62 }
 0x5ea   :  { %4635 = vmatmul.msk.f32.vlgmr.msra.gmra.mxu2 %vm2067_vm0, %v2602_v63  ;;  %v2825_v63 = vld [vmem:[%s6592_s10 + $0x58] sm:$0xff] }
 0x5eb   :  { %2834 = vmatpush.msra.mxu0 %v2825_v63 }
 0x5f0   :  { %v2585_v1 = vpop.permute.xlu1 %2584 }
 0x5f1   :  { %v2600_v3 = vsel %vm2598_vm9, %v2597_v2, %v2585_v1  ;;  %v2824_v1 = vld [vmem:[%s6592_s10 + $0x50] sm:$0xff] }
 0x5f2   :  { %2835 = vmatpush.msra.mxu0 %v2824_v1 }
 0x5f6   :  { %v2593_v4 = vpop.permute.xlu2 %2592 }
 0x5f7   :  { %v2603_v5 = vsel %vm2601_vm10, %v2600_v3, %v2593_v4  ;;  %v2823_v3 = vld [vmem:[%s6592_s10 + $0x48] sm:$0xff] }
 0x5f8   :  { %4636 = vmatmul.msk.f32.gmra.mxu2 %vm2067_vm0, %v2603_v5  ;;  %2836 = vmatpush.msra.mxu0 %v2823_v3  ;;  %v2822_v5 = vld [vmem:[%s6592_s10 + $0x40] sm:$0xff]  ;;  %v5109_v3 = vmov 1.0  }
 0x5fa   :  { %2837 = vmatpush.msra.mxu0 %v2822_v5 }
 0x66d   :  { %v2635_v7 = vpop.f32.mrf.mxu2 }
 0x66e   :  { %v2641_v8 = vadd.f32 %v2635_v7, %v5911_v34  ;;  %v2821_v7 = vld [vmem:[%s6592_s10 + $0x38] sm:$0xff] }
 0x66f   :  { %2838 = vmatpush.msra.mxu0 %v2821_v7 }
 0x670   :  { %v6110_v9 = vadd.f32 %v4990_v6, %v2641_v8  ;;  %v2820_v8 = vld [vmem:[%s6592_s10 + $0x30] sm:$0xff] }
 0x671   :  { %2839 = vmatpush.msra.mxu0 %v2820_v8 }
 0x672   :  { %v2649_v10 = vsel %vm2067_vm0, %v6110_v9, 0.0 }
 0x673   :  { %2650 = vadd.xlane.f32.xlu1 %v2649_v10  ;;  %v2819_v10 = vld [vmem:[%s6592_s10 + $0x28] sm:$0xff] }
 0x674   :  { %2840 = vmatpush.msra.mxu0 %v2819_v10 }
 0x67b   :  { %v2638_v11 = vpop.f32.mrf.mxu2 }
 0x67c   :  { %v2642_v48 = vadd.f32 %v2638_v11, %v5915_v42 }
 0x67e   :  { %v6115_v12 = vadd.f32 %v4990_v6, %v2642_v48 }
 0x680   :  { %v2652_v13 = vsel %vm2067_vm0, %v6115_v12, 0.0 }
 0x681   :  { %2653 = vadd.xlane.f32.xlu0 %v2652_v13  ;;  %v2818_v13 = vld [vmem:[%s6592_s10 + $0x20] sm:$0xff] }
 0x682   :  { %2841 = vmatpush.msra.mxu0 %v2818_v13 }
 0x6e6   :  { %v2651_v14 = vpop.xlane.xlu1 %2650 }
 0x6e7   :  { %v2655_v15 = vmul.f32 %v2651_v14, %v5919_v50 }
 0x6e9   :  { %v2657_v34 = vsub.f32 %v6110_v9, %v2655_v15 }
 0x6eb   :  { %v2659_v16 = vmul.f32 %v2657_v34, %v2657_v34 }
 0x6ed   :  { %v2661_v17 = vsel %vm2067_vm0, %v2659_v16, 0.0 }
 0x6ee   :  { %2662 = vadd.xlane.f32.xlu2 %v2661_v17 }
 0x6f4   :  { %v2654_v18 = vpop.xlane.xlu0 %2653 }
 0x6f5   :  { %v2656_v19 = vmul.f32 %v2654_v18, %v5919_v50  ;;  %v2816_v18 = vld [vmem:[%s6592_s10 + $0x10] sm:$0xff] }
 0x6f7   :  { %v2658_v42 = vsub.f32 %v6115_v12, %v2656_v19 }
 0x6f9   :  { %v2660_v20 = vmul.f32 %v2658_v42, %v2658_v42 }
 0x6fb   :  { %v2664_v21 = vsel %vm2067_vm0, %v2660_v20, 0.0 }
 0x6fc   :  { %2665 = vadd.xlane.f32.xlu1 %v2664_v21  ;;  %v2815_v21 = vld [vmem:[%s6592_s10 + $0x8] sm:$0xff] }
 0x761   :  { %v2663_v30 = vpop.xlane.xlu2 %2662 }
 0x762   :  { %v2667_v31 = vmul.f32 %v2663_v30, %v5919_v50 }
 0x764   :  { %v2669_v32 = vadd.f32 1e-06, %v2667_v31 }
 0x766   :  { %5035 = vrsqrt.f32 %v2669_v32  ;;  %vm2677_vm12 = vweird.f32 %v2669_v32 }
 0x76c   :  { %v5036_v33 = vpop.eup %5035 }
 0x76d   :  { %v2672_v35 = vmul.f32 %v5036_v33, %v2669_v32  ;;  %vm2678_vm11 = vweird.f32 %v5036_v33 }
 0x76e   :  { %vm2679_vm13 = vmor %vm2677_vm12, %vm2678_vm11 }
 0x76f   :  { %v2673_v36 = vmul.f32 %v5036_v33, %v2672_v35  ;;  %v2666_v37 = vpop.xlane.xlu1 %2665 }
 0x770   :  { %v2668_v38 = vmul.f32 %v2666_v37, %v5919_v50 }
 0x771   :  { %v2674_v39 = vmul.f32 0.5, %v2673_v36 }
 0x772   :  { %v2670_v40 = vadd.f32 1e-06, %v2668_v38 }
 0x773   :  { %v2675_v41 = vsub.f32 1.5, %v2674_v39 }
 0x774   :  { %5037 = vrsqrt.f32 %v2670_v40  ;;  %vm2687_vm15 = vweird.f32 %v2670_v40 }
 0x775   :  { %v2676_v43 = vmul.f32 %v5036_v33, %v2675_v41 }
 0x777   :  { %v2680_v44 = vsel %vm2679_vm13, %v5036_v33, %v2676_v43 }
 0x778   :  { %v2691_v45 = vmul.f32 %v2680_v44, %v2657_v34  ;;  %v2817_v34 = vld [vmem:[%s6592_s10 + $0x18] sm:$0xff] }
 0x779   :  { %2842 = vmatpush.msra.mxu0 %v2817_v34 }
 0x77a   :  { %v5038_v46 = vpop.eup %5037  ;;  %4637 = vmatmul.msk.f32.vlgmr.msra.gmra.mxu3 %vm2067_vm0, %v2691_v45 }
 0x77b   :  { %v2682_v47 = vmul.f32 %v5038_v46, %v2670_v40  ;;  %vm2688_vm14 = vweird.f32 %v5038_v46  ;;  %2843 = vmatpush.msra.mxu0 %v2816_v18 }
 0x77c   :  { %vm2689_vm1 = vmor %vm2687_vm15, %vm2688_vm14 }
 0x77d   :  { %v2683_v49 = vmul.f32 %v5038_v46, %v2682_v47  ;;  %2844 = vmatpush.msra.mxu0 %v2815_v21 }
 0x77f   :  { %v2684_v51 = vmul.f32 0.5, %v2683_v49  ;;  %2845 = vmatpush.msra.mxu0 %v2814_v24 }
 0x781   :  { %v2685_v52 = vsub.f32 1.5, %v2684_v51 }
 0x783   :  { %v2686_v53 = vmul.f32 %v5038_v46, %v2685_v52 }
 0x785   :  { %v2690_v54 = vsel %vm2689_vm1, %v5038_v46, %v2686_v53 }
 0x786   :  { %v2692_v55 = vmul.f32 %v2690_v54, %v2658_v42 }
 0x788   :  { %4638 = vmatmul.msk.f32.gmra.mxu3 %vm2067_vm0, %v2692_v55 }
 0x7fd   :  { %v2728_v61 = vpop.f32.mrf.mxu3 }
 0x7fe   :  { %v6168_v62 = vadd.f32 %v4991_v58, %v2728_v61 }
 0x800   :  { %v6174_v0 = vmul.f32 0.70710677, %v6168_v62  ;;  %v2734_v8 = vmul.f32 0.5, %v6168_v62 }
 0x802   :  { %v2742_v2 = vand.u32 2147483647, %v6174_v0  ;;  %vm2738_vm13 = vcmp.lt.f32.partialorder %v6174_v0, 0.0 }
 0x804   :  { %v2744_v4 = vmul.f32 0.3275911, %v2742_v2  ;;  %v2796_v30 = vsub.f32 0.0, %v2742_v2 }
 0x806   :  { %v2746_v6 = vadd.f32 1.0, %v2744_v4  ;;  %v2798_v35 = vmul.f32 %v2796_v30, %v2742_v2  ;;  %v2740_v4 = vsel %vm2738_vm13, -1.0, %v5109_v3 }
 0x808   :  { %5039 = vrcp.f32 %v2746_v6  ;;  %v2759_v42 = vand.u32 2147483648, %v2746_v6  ;;  %v2757_v23 = vand.u32 2147483647, %v2746_v6  ;;  %vm2753_vm3 = vweird.f32 %v2746_v6 }
 0x809   :  { %v2800_v40 = vmul.f32 1.442695, %v2798_v35 }
 0x80a   :  { %v2760_v27 = vor.u32 1.1754944e-38, %v2759_v42  ;;  %vm2758_vm5 = vcmp.eq.f32.partialorder %v2757_v23, 8.507059e+37 }
 0x80b   :  { %v2731_v11 = vpop.f32.mrf.mxu3 }
 0x80c   :  { %v6195_v48 = vadd.f32 %v4991_v58, %v2731_v11 }
 0x80e   :  { %v5040_v14 = vpop.eup %5039  ;;  %v6201_v15 = vmul.f32 0.70710677, %v6195_v48 }
 0x80f   :  { %v2749_v16 = vmul.f32 %v5040_v14, %v2746_v6  ;;  %vm2754_vm2 = vweird.f32 %v5040_v14 }
 0x810   :  { %v2743_v17 = vand.u32 2147483647, %v6201_v15  ;;  %vm2755_vm4 = vmor %vm2753_vm3, %vm2754_vm2  ;;  %vm2739_vm14 = vcmp.lt.f32.partialorder %v6201_v15, 0.0 }
 0x811   :  { %v2750_v19 = vsub.f32 1.0, %v2749_v16 }
 0x812   :  { %v2745_v20 = vmul.f32 0.3275911, %v2743_v17  ;;  %v2797_v53 = vsub.f32 0.0, %v2743_v17 }
 0x813   :  { %v2751_v22 = vmul.f32 %v5040_v14, %v2750_v19  ;;  %v2741_v19 = vsel %vm2739_vm14, -1.0, %v5109_v3 }
 0x814   :  { %v2747_v25 = vadd.f32 1.0, %v2745_v20  ;;  %v2799_v60 = vmul.f32 %v2797_v53, %v2743_v17  ;;  %v2735_v20 = vmul.f32 0.5, %v6195_v48  ;;  %v4645_v53 = vld [vmem:[%s6584_s4 + $0x90] sm:$0xff] }
 0x815   :  { %v2752_v26 = vadd.f32 %v5040_v14, %v2751_v22  ;;  %v4992_v22 = vld [vmem:[%s6591_s11] ss:$0 sm:$0xff] }
 0x816   :  { %5041 = vrcp.f32 %v2747_v25  ;;  %v2774_v41 = vand.u32 2147483648, %v2747_v25  ;;  %v2772_v45 = vand.u32 2147483647, %v2747_v25  ;;  %vm2768_vm7 = vweird.f32 %v2747_v25 }
 0x817   :  { %v2756_v28 = vsel %vm2755_vm4, %v5040_v14, %v2752_v26  ;;  %5043 = vpow2.f32 %v2800_v40  ;;  %v2802_v5 = vmul.f32 1.442695, %v2799_v60  ;;  %v4655_v40 = vld [vmem:[%s6584_s4 + $0xe0] sm:$0xff] }
 0x818   :  { %v2761_v29 = vsel %vm2758_vm5, %v2760_v27, %v2756_v28  ;;  %v2775_v49 = vor.u32 1.1754944e-38, %v2774_v41  ;;  %vm2773_vm12 = vcmp.eq.f32.partialorder %v2772_v45, 8.507059e+37  ;;  %v4656_v41 = vld [vmem:[%s6584_s4 + $0xe8] sm:$0xff]  ;;  %v4651_v45 = vld [vmem:[%s6584_s4 + $0xc0] sm:$0xff] }
 0x819   :  { %v2778_v31 = vmul.f32 1.0614054, %v2761_v29  ;;  %5045 = vpow2.f32 %v2802_v5 }
 0x81b   :  { %v4639_v32 = vadd.f32 -1.4531521, %v2778_v31 }
 0x81c   :  { %v5042_v33 = vpop.eup %5041 }
 0x81d   :  { %v2782_v36 = vmul.f32 %v4639_v32, %v2761_v29  ;;  %v2764_v37 = vmul.f32 %v5042_v33, %v2747_v25  ;;  %vm2769_vm6 = vweird.f32 %v5042_v33  ;;  %v5044_v59 = vpop.eup %5043 }
 0x81e   :  { %vm2770_vm11 = vmor %vm2768_vm7, %vm2769_vm6 }
 0x81f   :  { %v2784_v38 = vadd.f32 1.4214138, %v2782_v36  ;;  %v2765_v39 = vsub.f32 1.0, %v2764_v37  ;;  %v5046_v16 = vpop.eup %5045 }
 0x821   :  { %v2786_v43 = vmul.f32 %v2784_v38, %v2761_v29  ;;  %v2766_v44 = vmul.f32 %v5042_v33, %v2765_v39  ;;  %v4657_v38 = vld [vmem:[%s6584_s4 + $0xf0] sm:$0xff]  ;;  %v4658_v39 = vld [vmem:[%s6584_s4 + $0xf8] sm:$0xff] }
 0x822   :  { %2943 = vmatpush.msrb.mxu1 %v4657_v38  ;;  %2966 = vmatpush.msrb.mxu2 %v4658_v39 }
 0x823   :  { %v4641_v46 = vadd.f32 -0.28449672, %v2786_v43  ;;  %v2767_v47 = vadd.f32 %v5042_v33, %v2766_v44  ;;  %v4653_v43 = vld [vmem:[%s6584_s4 + $0xd0] sm:$0xff]  ;;  %v4654_v44 = vld [vmem:[%s6584_s4 + $0xd8] sm:$0xff] }
 0x824   :  { %2944 = vmatpush.msrb.mxu1 %v4655_v40  ;;  %2967 = vmatpush.msrb.mxu2 %v4656_v41 }
 0x825   :  { %v2790_v51 = vmul.f32 %v4641_v46, %v2761_v29  ;;  %v2771_v52 = vsel %vm2770_vm11, %v5042_v33, %v2767_v47  ;;  %v4652_v46 = vld [vmem:[%s6584_s4 + $0xc8] sm:$0xff]  ;;  %v4649_v47 = vld [vmem:[%s6584_s4 + $0xb0] sm:$0xff] }
 0x826   :  { %v2776_v54 = vsel %vm2773_vm12, %v2775_v49, %v2771_v52  ;;  %2945 = vmatpush.msrb.mxu1 %v4653_v43  ;;  %2968 = vmatpush.msrb.mxu2 %v4654_v44  ;;  %v4650_v49 = vld [vmem:[%s6584_s4 + $0xb8] sm:$0xff]  ;;  %v4648_v52 = vld [vmem:[%s6584_s4 + $0xa8] sm:$0xff]  ;;  %v5099_v44 = vld [vmem:[%s6586_s3] sm:$0xff] }
 0x827   :  { %v2792_v55 = vadd.f32 0.2548296, %v2790_v51  ;;  %v2779_v56 = vmul.f32 1.0614054, %v2776_v54  ;;  %v4647_v51 = vld [vmem:[%s6584_s4 + $0xa0] sm:$0xff] }
 0x828   :  { %2946 = vmatpush.msrb.mxu1 %v4651_v45  ;;  %2969 = vmatpush.msrb.mxu2 %v4652_v46 }
 0x829   :  { %v2794_v57 = vmul.f32 %v2792_v55, %v2761_v29  ;;  %v4640_v58 = vadd.f32 -1.4531521, %v2779_v56  ;;  %v4643_v55 = vld [vmem:[%s6584_s4 + $0x80] sm:$0xff]  ;;  %v4644_v56 = vld [vmem:[%s6584_s4 + $0x88] sm:$0xff] }
 0x82a   :  { %2947 = vmatpush.msrb.mxu1 %v4649_v47  ;;  %2970 = vmatpush.msrb.mxu2 %v4650_v49 }
 0x82b   :  { %v2804_v61 = vmul.f32 %v5044_v59, %v2794_v57  ;;  %v2783_v63 = vmul.f32 %v4640_v58, %v2776_v54 }
 0x82c   :  { %2948 = vmatpush.msrb.mxu1 %v4647_v51  ;;  %2971 = vmatpush.msrb.mxu2 %v4648_v52 }
 0x82d   :  { %v2806_v1 = vsub.f32 1.0, %v2804_v61  ;;  %v2785_v2 = vadd.f32 1.4214138, %v2783_v63 }
 0x82e   :  { %2949 = vmatpush.msrb.mxu1 %v4645_v53  ;;  %v5100_v53 = vld [vmem:[%s6586_s3 + $0x8] sm:$0xff] }
 0x82f   :  { %v2808_v6 = vmul.f32 %v2806_v1, %v2740_v4  ;;  %v2787_v7 = vmul.f32 %v2785_v2, %v2776_v54 }
 0x830   :  { %2950 = vmatpush.msrb.mxu1 %v4643_v55 }
 0x831   :  { %v2810_v10 = vadd.f32 1.0, %v2808_v6  ;;  %v4642_v11 = vadd.f32 -0.28449672, %v2787_v7 }
 0x833   :  { %v2812_v13 = vmul.f32 %v2810_v10, %v2734_v8  ;;  %v2791_v14 = vmul.f32 %v4642_v11, %v2776_v54 }
 0x835   :  { %2846 = vmatmul.f32.vlgmr.msra.gmra.mxu0 %v2812_v13  ;;  %v2793_v34 = vadd.f32 0.2548296, %v2791_v14 }
 0x837   :  { %v2795_v0 = vmul.f32 %v2793_v34, %v2776_v54  ;;  %v4646_v54 = vld [vmem:[%s6584_s4 + $0x98] sm:$0xff] }
 0x838   :  { %2972 = vmatpush.msrb.mxu2 %v4646_v54 }
 0x839   :  { %v2805_v17 = vmul.f32 %v5046_v16, %v2795_v0 }
 0x83a   :  { %2973 = vmatpush.msrb.mxu2 %v4644_v56 }
 0x83b   :  { %v2807_v18 = vsub.f32 1.0, %v2805_v17 }
 0x83d   :  { %v2809_v42 = vmul.f32 %v2807_v18, %v2741_v19  ;;  %v4659_v19 = vld [vmem:[%s6585_s5 + $0x2] sm:$0x3] }
 0x83f   :  { %v2811_v21 = vadd.f32 1.0, %v2809_v42  ;;  %v2925_v42 = vperm.slane %v4659_v19, 0 }
 0x841   :  { %v2813_v62 = vmul.f32 %v2811_v21, %v2735_v20 }
 0x843   :  { %2849 = vmatmul.f32.gmra.mxu0 %v2813_v62 }
 0x8b2   :  { %v2847_v23 = vpop.f32.mrf.mxu0 }
 0x8b3   :  { %v2853_v24 = vadd.f32 %v2847_v23, %v6110_v9 }
 0x8b5   :  { %v6226_v25 = vadd.f32 %v4992_v22, %v2853_v24  ;;  %v2926_v24 = vperm.slane %v4659_v19, 1 }
 0x8b7   :  { %v2861_v15 = vsel %vm2067_vm0, %v6226_v25, 0.0 }
 0x8b8   :  { %2862 = vadd.xlane.f32.xlu0 %v2861_v15 }
 0x8c0   :  { %v2850_v26 = vpop.f32.mrf.mxu0 }
 0x8c1   :  { %v2854_v27 = vadd.f32 %v2850_v26, %v6115_v12 }
 0x8c3   :  { %v6231_v48 = vadd.f32 %v4992_v22, %v2854_v27 }
 0x8c5   :  { %v2864_v28 = vsel %vm2067_vm0, %v6231_v48, 0.0 }
 0x8c6   :  { %2865 = vadd.xlane.f32.xlu1 %v2864_v28 }
 0x92b   :  { %v2863_v29 = vpop.xlane.xlu0 %2862 }
 0x92c   :  { %v2867_v30 = vmul.f32 %v2863_v29, %v5919_v50 }
 0x92e   :  { %v2869_v9 = vsub.f32 %v6226_v25, %v2867_v30 }
 0x930   :  { %v2871_v31 = vmul.f32 %v2869_v9, %v2869_v9 }
 0x932   :  { %v2873_v32 = vsel %vm2067_vm0, %v2871_v31, 0.0 }
 0x933   :  { %2874 = vadd.xlane.f32.xlu0 %v2873_v32 }
 0x939   :  { %v2866_v33 = vpop.xlane.xlu1 %2865 }
 0x93a   :  { %v2868_v35 = vmul.f32 %v2866_v33, %v5919_v50 }
 0x93c   :  { %v6240_v12 = vsub.f32 %v6231_v48, %v2868_v35 }
 0x93e   :  { %v2872_v36 = vmul.f32 %v6240_v12, %v6240_v12 }
 0x940   :  { %v2876_v37 = vsel %vm2067_vm0, %v2872_v36, 0.0 }
 0x941   :  { %2877 = vadd.xlane.f32.xlu1 %v2876_v37 }
 0x9a6   :  { %v2875_v57 = vpop.xlane.xlu0 %2874 }
 0x9a7   :  { %v2879_v58 = vmul.f32 %v2875_v57, %v5919_v50 }
 0x9a9   :  { %v2881_v59 = vadd.f32 1e-06, %v2879_v58 }
 0x9ab   :  { %5047 = vrsqrt.f32 %v2881_v59  ;;  %vm2889_vm1 = vweird.f32 %v2881_v59 }
 0x9b1   :  { %v5048_v60 = vpop.eup %5047 }
 0x9b2   :  { %v2884_v61 = vmul.f32 %v5048_v60, %v2881_v59  ;;  %vm2890_vm15 = vweird.f32 %v5048_v60 }
 0x9b3   :  { %vm2891_vm2 = vmor %vm2889_vm1, %vm2890_vm15 }
 0x9b4   :  { %v2885_v63 = vmul.f32 %v5048_v60, %v2884_v61  ;;  %v2878_v1 = vpop.xlane.xlu1 %2877 }
 0x9b5   :  { %v2880_v2 = vmul.f32 %v2878_v1, %v5919_v50 }
 0x9b6   :  { %v2886_v4 = vmul.f32 0.5, %v2885_v63 }
 0x9b7   :  { %v2882_v5 = vadd.f32 1e-06, %v2880_v2 }
 0x9b8   :  { %v2887_v6 = vsub.f32 1.5, %v2886_v4 }
 0x9b9   :  { %5049 = vrsqrt.f32 %v2882_v5  ;;  %vm2899_vm4 = vweird.f32 %v2882_v5 }
 0x9ba   :  { %v2888_v7 = vmul.f32 %v5048_v60, %v2887_v6 }
 0x9bc   :  { %v2892_v8 = vsel %vm2891_vm2, %v5048_v60, %v2888_v7 }
 0x9bd   :  { %v2903_v10 = vmul.f32 %v2892_v8, %v2869_v9 }
 0x9bf   :  { %v5050_v11 = vpop.eup %5049  ;;  %4660 = vmatmul.msk.f32.vlgmr.msrb.gmra.mxu1 %vm2067_vm0, %v2903_v10  ;;  %4662 = vmatmul.msk.f32.vlgmr.msrb.gmra.mxu2 %vm2067_vm0, %v2903_v10 }
 0x9c0   :  { %v2894_v13 = vmul.f32 %v5050_v11, %v2882_v5  ;;  %vm2900_vm3 = vweird.f32 %v5050_v11 }
 0x9c1   :  { %vm2901_vm5 = vmor %vm2899_vm4, %vm2900_vm3 }
 0x9c2   :  { %v2895_v14 = vmul.f32 %v5050_v11, %v2894_v13 }
 0x9c4   :  { %v2896_v34 = vmul.f32 0.5, %v2895_v14 }
 0x9c6   :  { %v2897_v0 = vsub.f32 1.5, %v2896_v34 }
 0x9c8   :  { %v2898_v16 = vmul.f32 %v5050_v11, %v2897_v0 }
 0x9ca   :  { %v2902_v17 = vsel %vm2901_vm5, %v5050_v11, %v2898_v16 }
 0x9cb   :  { %v2904_v18 = vmul.f32 %v2902_v17, %v6240_v12 }
 0x9cd   :  { %4661 = vmatmul.msk.f32.gmra.mxu1 %vm2067_vm0, %v2904_v18  ;;  %4663 = vmatmul.msk.f32.gmra.mxu2 %vm2067_vm0, %v2904_v18 }
 0xa3c   :  { %v2952_v20 = vpop.f32.mrf.mxu1 }
 0xa3d   :  { %v2953_v21 = vadd.f32 %v2952_v20, %v2925_v42 }
 0xa3f   :  { %3073 = vrot.lane.b32.xlu2 %v2953_v21, %s5104_s29 }
 0xa42   :  { %v2975_v62 = vpop.f32.mrf.mxu2 }
 0xa43   :  { %v2976_v26 = vadd.f32 %v2975_v62, %v2926_v24 }
 0xa47   :  { %2983 = vrot.lane.b32.xlu2 %v2953_v21, %s5102_s0 }
 0xa4a   :  { %v2955_v22 = vpop.f32.mrf.mxu1 }
 0xa4b   :  { %v2956_v23 = vadd.f32 %v2955_v22, %v2925_v42 }
 0xa4d   :  { %2985 = vrot.lane.b32.xlu1 %v2956_v23, %s5102_s0  ;;  %3075 = vrot.lane.b32.xlu0 %v2956_v23, %s5104_s29 }
 0xa4f   :  { %3267 = vrot.lane.b32.xlu2 %v2953_v21, %s5105_s30 }
 0xa50   :  { %v2978_v15 = vpop.f32.mrf.mxu2 }
 0xa51   :  { %v2979_v27 = vadd.f32 %v2978_v15, %v2926_v24 }
 0xa53   :  { %3060 = vmatpush.msra.mxu1 %v2979_v27  ;;  %v6308_v28 = vpack.i.bf16 %v2976_v26, %v2979_v27 }
 0xa55   :  { %3061 = vmatpush.msra.mxu1 %v2976_v26  ;;  %3269 = vrot.lane.b32.xlu1 %v2956_v23, %s5105_s30 }
 0xa56   :  { %3069 = vrot.lane.b32.xlu0 %v2953_v21, %s5108_s16 }
 0xa57   :  { %3171 = vrot.lane.b32.xlu2 %v2953_v21, %s5103_s28 }
 0xa5d   :  { %3173 = vrot.lane.b32.xlu1 %v2956_v23, %s5103_s28 }
 0xa5e   :  { %3071 = vrot.lane.b32.xlu0 %v2956_v23, %s5108_s16 }
 0xa5f   :  { %3169 = vrot.lane.b32.xlu2 %v2956_v23, %s5106_s2 }
 0xa65   :  { %3167 = vrot.lane.b32.xlu1 %v2953_v21, %s5106_s2 }
 0xa66   :  { %3263 = vrot.lane.b32.xlu0 %v2953_v21, %s5107_s15 }
 0xa6e   :  { %3265 = vrot.lane.b32.xlu0 %v2956_v23, %s5107_s15 }
 0xa99   :  { %v3074_v29 = vpop.permute.xlu2 %3073 }
 0xaa1   :  { %v2984_v30 = vpop.permute.xlu2 %2983 }
 0xaa9   :  { %v3268_v35 = vpop.permute.xlu2 %3267 }
 0xab1   :  { %v3172_v37 = vpop.permute.xlu2 %3171 }
 0xab9   :  { %v3170_v40 = vpop.permute.xlu2 %3169 }
 0xabf   :  { %v2986_v9 = vpop.permute.xlu1 %2985  ;;  %v3076_v31 = vpop.permute.xlu0 %3075 }
 0xac0   :  { %4664 = vmatpush.xpose.msk.msrb.mxu3 %vm2199_vm8, %v2986_v9  ;;  %4670 = vmatpush.xpose.msk.msra.mxu2 %vm2199_vm8, %v3076_v31 }
 0xac4   :  { %4665 = vmatpush.xpose.msk.msrb.mxu3 %vm2199_vm8, %v2984_v30  ;;  %4671 = vmatpush.xpose.msk.msra.mxu2 %vm2199_vm8, %v3074_v29 }
 0xac7   :  { %4666 = vmatmul.msk.f32.vlgmr.msrb.gmra.mxu3 %vm2199_vm8, %v2953_v21  ;;  %v3270_v32 = vpop.permute.xlu1 %3269 }
 0xac8   :  { %v3070_v33 = vpop.permute.xlu0 %3069  ;;  %4682 = vmatpush.xpose.msk.msrb.mxu2 %vm2199_vm8, %v3270_v32 }
 0xac9   :  { %4672 = vmatmul.msk.f32.vlgmr.msra.gmra.mxu2 %vm2199_vm8, %v3070_v33 }
 0xacc   :  { %4683 = vmatpush.xpose.msk.msrb.mxu2 %vm2199_vm8, %v3268_v35 }
 0xacf   :  { %4667 = vmatmul.msk.f32.gmra.mxu3 %vm2199_vm8, %v2956_v23  ;;  %v3174_v12 = vpop.permute.xlu1 %3173 }
 0xad0   :  { %v3072_v36 = vpop.permute.xlu0 %3071  ;;  %4676 = vmatpush.xpose.msk.msrb.mxu0 %vm2199_vm8, %v3174_v12 }
 0xad1   :  { %4673 = vmatmul.msk.f32.gmra.mxu2 %vm2199_vm8, %v3072_v36 }
 0xad4   :  { %4677 = vmatpush.xpose.msk.msrb.mxu0 %vm2199_vm8, %v3172_v37 }
 0xad7   :  { %v3168_v38 = vpop.permute.xlu1 %3167 }
 0xad8   :  { %v3264_v39 = vpop.permute.xlu0 %3263  ;;  %4678 = vmatmul.msk.f32.vlgmr.msrb.gmra.mxu0 %vm2199_vm8, %v3168_v38 }
 0xad9   :  { %4684 = vmatmul.msk.f32.vlgmr.msrb.gmra.mxu2 %vm2199_vm8, %v3264_v39 }
 0xae0   :  { %v3266_v41 = vpop.permute.xlu0 %3265  ;;  %4679 = vmatmul.msk.f32.gmra.mxu0 %vm2199_vm8, %v3170_v40 }
 0xae1   :  { %4685 = vmatmul.msk.f32.gmra.mxu2 %vm2199_vm8, %v3266_v41 }
 0xb4a   :  { %v3012_v43 = vpop.f32.mrf.mxu3 }
 0xb4b   :  { %v3013_v45 = vadd.f32 %v5099_v44, %v3012_v43 }
 0xb4c   :  { %v3102_v46 = vpop.f32.mrf.mxu2 }
 0xb4d   :  { %v3103_v47 = vadd.f32 %v5099_v44, %v3102_v46  ;;  %v3018_v49 = vsel %vm2199_vm8, %v3013_v45, -inf }
 0xb4e   :  { %3019 = vmax.xlane.f32.xlu1 %v3018_v49 }
 0xb4f   :  { %v3108_v51 = vsel %vm2199_vm8, %v3103_v47, -inf }
 0xb50   :  { %3109 = vmax.xlane.f32.xlu0 %v3108_v51 }
 0xb52   :  { %v3015_v52 = vpop.f32.mrf.mxu3 }
 0xb53   :  { %v3016_v54 = vadd.f32 %v5100_v53, %v3015_v52 }
 0xb54   :  { %v3105_v55 = vpop.f32.mrf.mxu2 }
 0xb55   :  { %v3106_v56 = vadd.f32 %v5100_v53, %v3105_v55  ;;  %v3021_v57 = vsel %vm2199_vm8, %v3016_v54, -inf  ;;  %v3200_v58 = vpop.f32.mrf.mxu0 }
 0xb56   :  { %v3201_v60 = vadd.f32 %v5099_v44, %v3200_v58 }
 0xb57   :  { %v3111_v59 = vsel %vm2199_vm8, %v3106_v56, -inf }
 0xb58   :  { %3022 = vmax.xlane.f32.xlu0 %v3021_v57  ;;  %3112 = vmax.xlane.f32.xlu2 %v3111_v59  ;;  %v3206_v1 = vsel %vm2199_vm8, %v3201_v60, -inf }
 0xb5c   :  { %v3296_v61 = vpop.f32.mrf.mxu2 }
 0xb5d   :  { %v3297_v63 = vadd.f32 %v5099_v44, %v3296_v61  ;;  %v3203_v4 = vpop.f32.mrf.mxu0 }
 0xb5e   :  { %v3204_v5 = vadd.f32 %v5100_v53, %v3203_v4 }
 0xb5f   :  { %v3302_v2 = vsel %vm2199_vm8, %v3297_v63, -inf }
 0xb60   :  { %3207 = vmax.xlane.f32.xlu2 %v3206_v1  ;;  %3303 = vmax.xlane.f32.xlu1 %v3302_v2  ;;  %v3209_v8 = vsel %vm2199_vm8, %v3204_v5, -inf }
 0xb64   :  { %v3299_v6 = vpop.f32.mrf.mxu2 }
 0xb65   :  { %v3300_v7 = vadd.f32 %v5100_v53, %v3299_v6 }
 0xb67   :  { %v3305_v10 = vsel %vm2199_vm8, %v3300_v7, -inf }
 0xb68   :  { %3210 = vmax.xlane.f32.xlu1 %v3209_v8  ;;  %3306 = vmax.xlane.f32.xlu0 %v3305_v10 }
 0xb81   :  { %4976 = vrot.lane.b32.xlu1 %v6308_v28, %s5108_s16 }
 0xb89   :  { %4986 = vrot.lane.b32.xlu1 %v6308_v28, %s5106_s2 }
 0xbc1   :  { %v3020_v34 = vpop.xlane.xlu1 %3019 }
 0xbc2   :  { %v3024_v23 = vsub.f32 %v3013_v45, %v3020_v34 }
 0xbc3   :  { %v3110_v11 = vpop.xlane.xlu0 %3109 }
 0xbc4   :  { %v3114_v13 = vsub.f32 %v3103_v47, %v3110_v11  ;;  %v3026_v27 = vmul.f32 1.442695, %v3024_v23 }
 0xbc6   :  { %v3116_v14 = vmul.f32 1.442695, %v3114_v13 }
 0xbc8   :  { %5051 = vpow2.f32 %v3116_v14 }
 0xbcb   :  { %v3113_v0 = vpop.xlane.xlu2 %3112  ;;  %v3023_v29 = vpop.xlane.xlu0 %3022 }
 0xbcc   :  { %v3115_v16 = vsub.f32 %v3106_v56, %v3113_v0  ;;  %v3025_v9 = vsub.f32 %v3016_v54, %v3023_v29 }
 0xbce   :  { %v6353_v17 = vpop.eup %5051  ;;  %v3118_v18 = vmul.f32 1.442695, %v3115_v16  ;;  %v3028_v35 = vmul.f32 1.442695, %v3025_v9  ;;  %v4695_v9 = vld [vmem:[%s6588_s6 + $0x78] sm:$0xff] }
 0xbcf   :  { %v3120_v19 = vsel %vm2199_vm8, %v6353_v17, 0.0  ;;  %3412 = vmatpush.msra.mxu0 %v4695_v9 }
 0xbd0   :  { %5053 = vpow2.f32 %v3118_v18  ;;  %3121 = vadd.xlane.f32.xlu2 %v3120_v19 }
 0xbd3   :  { %v3208_v42 = vpop.xlane.xlu2 %3207  ;;  %v3304_v20 = vpop.xlane.xlu1 %3303 }
 0xbd4   :  { %v3212_v21 = vsub.f32 %v3201_v60, %v3208_v42  ;;  %v3308_v62 = vsub.f32 %v3297_v63, %v3304_v20 }
 0xbd6   :  { %v5054_v22 = vpop.eup %5053  ;;  %v3214_v24 = vmul.f32 1.442695, %v3212_v21  ;;  %v3310_v15 = vmul.f32 1.442695, %v3308_v62 }
 0xbd7   :  { %v3123_v26 = vsel %vm2199_vm8, %v5054_v22, 0.0 }
 0xbd8   :  { %5055 = vpow2.f32 %v3214_v24  ;;  %3124 = vadd.xlane.f32.xlu2 %v3123_v26 }
 0xbd9   :  { %5057 = vpow2.f32 %v3310_v15 }
 0xbda   :  { %5059 = vpow2.f32 %v3026_v27 }
 0xbdb   :  { %v3307_v12 = vpop.xlane.xlu0 %3306  ;;  %5061 = vpow2.f32 %v3028_v35  ;;  %v3211_v40 = vpop.xlane.xlu1 %3210  ;;  %v4691_v35 = vld [vmem:[%s6588_s6 + $0x58] sm:$0xff] }
 0xbdc   :  { %v3309_v37 = vsub.f32 %v3300_v7, %v3307_v12  ;;  %v3213_v43 = vsub.f32 %v3204_v5, %v3211_v40  ;;  %v4690_v12 = vld [vmem:[%s6588_s6 + $0x50] sm:$0xff] }
 0xbde   :  { %v6358_v30 = vpop.eup %5055  ;;  %v3312_v39 = vmul.f32 1.442695, %v3309_v37  ;;  %v3216_v45 = vmul.f32 1.442695, %v3213_v43  ;;  %v4688_v37 = vld [vmem:[%s6588_s6 + $0x40] sm:$0xff] }
 0xbdf   :  { %v5058_v31 = vpop.eup %5057  ;;  %v3218_v32 = vsel %vm2199_vm8, %v6358_v30, 0.0 }
 0xbe0   :  { %3219 = vadd.xlane.f32.xlu0 %v3218_v32  ;;  %v3314_v33 = vsel %vm2199_vm8, %v5058_v31, 0.0  ;;  %v5060_v36 = vpop.eup %5059  ;;  %5063 = vpow2.f32 %v3312_v39  ;;  %v4693_v32 = vld [vmem:[%s6588_s6 + $0x68] sm:$0xff] }
 0xbe1   :  { %3315 = vadd.xlane.f32.xlu2 %v3314_v33  ;;  %v3030_v38 = vsel %vm2199_vm8, %v5060_v36, 0.0  ;;  %v5062_v41 = vpop.eup %5061  ;;  %5065 = vpow2.f32 %v3216_v45  ;;  %v4692_v33 = vld [vmem:[%s6588_s6 + $0x60] sm:$0xff] }
 0xbe2   :  { %v3033_v44 = vsel %vm2199_vm8, %v5062_v41, 0.0 }
 0xbe6   :  { %v5064_v47 = vpop.eup %5063 }
 0xbe7   :  { %v3317_v52 = vsel %vm2199_vm8, %v5064_v47, 0.0  ;;  %v5066_v54 = vpop.eup %5065 }
 0xbe8   :  { %3031 = vadd.xlane.f32.xlu0 %v3030_v38  ;;  %v3221_v57 = vsel %vm2199_vm8, %v5066_v54, 0.0 }
 0xbf0   :  { %3034 = vadd.xlane.f32.xlu0 %v3033_v44 }
 0xbf3   :  { %v4977_v46 = vpop.permute.xlu1 %4976 }
 0xbf4   :  { %v4978_v49 = vunpack.i.l.bf16 %v4977_v46  ;;  %v4979_v51 = vunpack.i.h.bf16 %v4977_v46 }
 0xbf6   :  { %3158 = vmatpush.msra.mxu3 %v4978_v49 }
 0xbf8   :  { %3159 = vmatpush.msra.mxu3 %v4979_v51  ;;  %3318 = vadd.xlane.f32.xlu0 %v3317_v52 }
 0xbf9   :  { %4981 = vrot.lane.b32.xlu2 %v6308_v28, %s5107_s15 }
 0xbfb   :  { %v4987_v53 = vpop.permute.xlu1 %4986 }
 0xbfc   :  { %v4988_v55 = vunpack.i.l.bf16 %v4987_v53  ;;  %v4989_v56 = vunpack.i.h.bf16 %v4987_v53  ;;  %v4993_v53 = vld [vmem:[%s6587_s7 + $0x1] ss:$0 sm:$0xff] }
 0xbfe   :  { %3254 = vmatpush.msrb.mxu1 %v4988_v55 }
 0xc00   :  { %3255 = vmatpush.msrb.mxu1 %v4989_v56  ;;  %3222 = vadd.xlane.f32.xlu0 %v3221_v57 }
 0xc43   :  { %v3122_v58 = vpop.xlane.xlu2 %3121 }
 0xc44   :  { %5067 = vrcp.f32 %v3122_v58 }
 0xc4a   :  { %v5068_v59 = vpop.eup %5067 }
 0xc4b   :  { %v3128_v60 = vmul.f32 %v5068_v59, %v6353_v17  ;;  %v3125_v61 = vpop.xlane.xlu2 %3124 }
 0xc4c   :  { %5069 = vrcp.f32 %v3125_v61 }
 0xc4d   :  { %4674 = vmatmul.msk.f32.vlgmr.msra.gmra.mxu3 %vm2199_vm8, %v3128_v60 }
 0xc52   :  { %v5070_v63 = vpop.eup %5069 }
 0xc53   :  { %v3220_v28 = vpop.xlane.xlu0 %3219  ;;  %v3129_v1 = vmul.f32 %v5070_v63, %v5054_v22 }
 0xc54   :  { %v3316_v2 = vpop.xlane.xlu2 %3315 }
 0xc55   :  { %4675 = vmatmul.msk.f32.gmra.mxu3 %vm2199_vm8, %v3129_v1  ;;  %5071 = vrcp.f32 %v3316_v2 }
 0xc5b   :  { %v3032_v4 = vpop.xlane.xlu0 %3031  ;;  %v5072_v6 = vpop.eup %5071 }
 0xc5c   :  { %v4982_v5 = vpop.permute.xlu2 %4981  ;;  %5073 = vrcp.f32 %v3032_v4  ;;  %v3322_v10 = vmul.f32 %v5072_v6, %v5058_v31  ;;  %v4694_v31 = vld [vmem:[%s6588_s6 + $0x70] sm:$0xff] }
 0xc5d   :  { %v4983_v7 = vunpack.i.l.bf16 %v4982_v5  ;;  %v4984_v8 = vunpack.i.h.bf16 %v4982_v5  ;;  %3413 = vmatpush.msra.mxu0 %v4694_v31 }
 0xc5f   :  { %3350 = vmatpush.msrb.mxu3 %v4983_v7  ;;  %3414 = vmatpush.msra.mxu0 %v4693_v32 }
 0xc61   :  { %3351 = vmatpush.msrb.mxu3 %v4984_v8  ;;  %3415 = vmatpush.msra.mxu0 %v4692_v33  ;;  %v4706_v8 = vld [vmem:[%s6590_s8 + $0x78] sm:$0xff] }
 0xc62   :  { %v5074_v11 = vpop.eup %5073  ;;  %4686 = vmatmul.msk.f32.vlgmr.msrb.gmra.mxu3 %vm2199_vm8, %v3322_v10  ;;  %v4705_v10 = vld [vmem:[%s6590_s8 + $0x70] sm:$0xff] }
 0xc63   :  { %v3038_v13 = vmul.f32 %v5074_v11, %v5060_v36  ;;  %v3035_v14 = vpop.xlane.xlu0 %3034  ;;  %3416 = vmatpush.msra.mxu0 %v4691_v35  ;;  %v4689_v36 = vld [vmem:[%s6588_s6 + $0x48] sm:$0xff] }
 0xc64   :  { %5075 = vrcp.f32 %v3035_v14  ;;  %v4704_v11 = vld [vmem:[%s6590_s8 + $0x68] sm:$0xff]  ;;  %v4702_v14 = vld [vmem:[%s6590_s8 + $0x58] sm:$0xff] }
 0xc65   :  { %4668 = vmatmul.msk.f32.vlgmr.msra.gmra.mxu1 %vm2199_vm8, %v3038_v13  ;;  %5077 = vrcp.f32 %v3220_v28  ;;  %3417 = vmatpush.msra.mxu0 %v4690_v12  ;;  %v4703_v13 = vld [vmem:[%s6590_s8 + $0x60] sm:$0xff] }
 0xc66   :  { %3508 = vmatpush.msra.mxu1 %v4706_v8 }
 0xc67   :  { %3418 = vmatpush.msra.mxu0 %v4689_v36 }
 0xc68   :  { %3509 = vmatpush.msra.mxu1 %v4705_v10 }
 0xc69   :  { %3419 = vmatpush.msra.mxu0 %v4688_v37  ;;  %v4729_v37 = vld [vmem:[%s6592_s10 + $0xf8] sm:$0xff] }
 0xc6a   :  { %v5076_v34 = vpop.eup %5075  ;;  %3510 = vmatpush.msra.mxu1 %v4704_v11  ;;  %3620 = vmatpush.msra.mxu2 %v4729_v37 }
 0xc6b   :  { %v3319_v0 = vpop.xlane.xlu0 %3318  ;;  %v3039_v16 = vmul.f32 %v5076_v34, %v5062_v41  ;;  %v5078_v17 = vpop.eup %5077  ;;  %v4701_v34 = vld [vmem:[%s6590_s8 + $0x50] sm:$0xff] }
 0xc6c   :  { %5079 = vrcp.f32 %v3319_v0  ;;  %v3226_v19 = vmul.f32 %v5078_v17, %v6358_v30  ;;  %3511 = vmatpush.msra.mxu1 %v4703_v13  ;;  %v4700_v0 = vld [vmem:[%s6590_s8 + $0x48] sm:$0xff] }
 0xc6d   :  { %4669 = vmatmul.msk.f32.gmra.mxu1 %vm2199_vm8, %v3039_v16  ;;  %v4699_v16 = vld [vmem:[%s6590_s8 + $0x40] sm:$0xff]  ;;  %v4715_v13 = vld [vmem:[%s6592_s10 + $0x88] sm:$0xff] }
 0xc6e   :  { %3512 = vmatpush.msra.mxu1 %v4702_v14  ;;  %v4714_v14 = vld [vmem:[%s6592_s10 + $0x80] sm:$0xff] }
 0xc70   :  { %3513 = vmatpush.msra.mxu1 %v4701_v34 }
 0xc72   :  { %v5080_v18 = vpop.eup %5079  ;;  %3514 = vmatpush.msra.mxu1 %v4700_v0 }
 0xc73   :  { %v3223_v42 = vpop.xlane.xlu0 %3222  ;;  %v3323_v20 = vmul.f32 %v5080_v18, %v5064_v47 }
 0xc74   :  { %5081 = vrcp.f32 %v3223_v42  ;;  %3515 = vmatpush.msra.mxu1 %v4699_v16 }
 0xc75   :  { %4680 = vmatmul.msk.f32.vlgmr.msrb.gmra.mxu1 %vm2199_vm8, %v3226_v19  ;;  %4687 = vmatmul.msk.f32.gmra.mxu3 %vm2199_vm8, %v3323_v20 }
 0xc7a   :  { %v5082_v21 = vpop.eup %5081 }
 0xc7b   :  { %v3227_v62 = vmul.f32 %v5082_v21, %v5066_v54 }
 0xc7d   :  { %4681 = vmatmul.msk.f32.gmra.mxu1 %vm2199_vm8, %v3227_v62 }
 0xcd0   :  { %v3161_v22 = vpop.f32.mrf.mxu3 }
 0xcd1   :  { %3361 = vrot.lane.b32.xlu1 %v3161_v22, %s5105_s30 }
 0xcd8   :  { %v3164_v23 = vpop.f32.mrf.mxu3 }
 0xcd9   :  { %3363 = vrot.lane.b32.xlu2 %v3164_v23, %s5105_s30 }
 0xce2   :  { %v3063_v24 = vpop.f32.mrf.mxu1 }
 0xce5   :  { %v3353_v15 = vpop.f32.mrf.mxu3 }
 0xce6   :  { %3377 = vrot.lane.b32.xlu1 %v3353_v15, %s5104_s29 }
 0xcea   :  { %v3066_v26 = vpop.f32.mrf.mxu1 }
 0xcf2   :  { %v3257_v27 = vpop.f32.mrf.mxu1 }
 0xcf3   :  { %3369 = vrot.lane.b32.xlu0 %v3257_v27, %s5103_s28 }
 0xcf8   :  { %v3356_v29 = vpop.f32.mrf.mxu3 }
 0xcf9   :  { %3379 = vrot.lane.b32.xlu2 %v3356_v29, %s5104_s29 }
 0xcfa   :  { %v3260_v30 = vpop.f32.mrf.mxu1 }
 0xcfb   :  { %3371 = vrot.lane.b32.xlu1 %v3260_v30, %s5103_s28 }
 0xd33   :  { %v3364_v43 = vpop.permute.xlu2 %3363 }
 0xd34   :  { %v3384_v46 = vsel %vm2199_vm8, %v3066_v26, %v3364_v43  ;;  %v4726_v43 = vld [vmem:[%s6592_s10 + $0xe0] sm:$0xff] }
 0xd43   :  { %v3362_v38 = vpop.permute.xlu1 %3361 }
 0xd44   :  { %v3383_v39 = vsel %vm2199_vm8, %v3063_v24, %v3362_v38  ;;  %v4728_v38 = vld [vmem:[%s6592_s10 + $0xf0] sm:$0xff] }
 0xd45   :  { %3621 = vmatpush.msra.mxu2 %v4728_v38 }
 0xd53   :  { %v3380_v49 = vpop.permute.xlu2 %3379 }
 0xd58   :  { %v3378_v40 = vpop.permute.xlu1 %3377 }
 0xd65   :  { %v3370_v41 = vpop.permute.xlu0 %3369 }
 0xd66   :  { %v3385_v44 = vsel %vm2598_vm9, %v3383_v39, %v3370_v41  ;;  %v4994_v39 = vld [vmem:[%s6589_s9 + $0x1] ss:$0 sm:$0xff] }
 0xd67   :  { %v3387_v45 = vsel %vm2601_vm10, %v3385_v44, %v3378_v40  ;;  %v4727_v40 = vld [vmem:[%s6592_s10 + $0xe8] sm:$0xff] }
 0xd68   :  { %4696 = vmatmul.msk.f32.vlgmr.msra.gmra.mxu0 %vm2067_vm0, %v3387_v45  ;;  %3622 = vmatpush.msra.mxu2 %v4727_v40  ;;  %v4725_v45 = vld [vmem:[%s6592_s10 + $0xd8] sm:$0xff] }
 0xd6a   :  { %3623 = vmatpush.msra.mxu2 %v4726_v43 }
 0xd6c   :  { %3624 = vmatpush.msra.mxu2 %v4725_v45 }
 0xd6d   :  { %v3372_v47 = vpop.permute.xlu1 %3371 }
 0xd6e   :  { %v3386_v51 = vsel %vm2598_vm9, %v3384_v46, %v3372_v47  ;;  %v4724_v47 = vld [vmem:[%s6592_s10 + $0xd0] sm:$0xff] }
 0xd6f   :  { %v3388_v52 = vsel %vm2601_vm10, %v3386_v51, %v3380_v49  ;;  %3625 = vmatpush.msra.mxu2 %v4724_v47  ;;  %v4723_v51 = vld [vmem:[%s6592_s10 + $0xc8] sm:$0xff] }
 0xd70   :  { %4697 = vmatmul.msk.f32.gmra.mxu0 %vm2067_vm0, %v3388_v52 }
 0xd71   :  { %3626 = vmatpush.msra.mxu2 %v4723_v51 }
 0xde5   :  { %v3421_v54 = vpop.f32.mrf.mxu0 }
 0xde6   :  { %v3427_v55 = vadd.f32 %v3421_v54, %v6226_v25  ;;  %v4722_v54 = vld [vmem:[%s6592_s10 + $0xc0] sm:$0xff] }
 0xde7   :  { %3627 = vmatpush.msra.mxu2 %v4722_v54 }
 0xde8   :  { %v6421_v56 = vadd.f32 %v4993_v53, %v3427_v55 }
 0xdea   :  { %v3436_v57 = vsel %vm2067_vm0, %v6421_v56, 0.0 }
 0xdeb   :  { %3437 = vadd.xlane.f32.xlu1 %v3436_v57 }
 0xded   :  { %v3424_v58 = vpop.f32.mrf.mxu0 }
 0xdee   :  { %v3428_v59 = vadd.f32 %v3424_v58, %v6231_v48  ;;  %v4721_v58 = vld [vmem:[%s6592_s10 + $0xb8] sm:$0xff] }
 0xdef   :  { %3628 = vmatpush.msra.mxu2 %v4721_v58 }
 0xdf0   :  { %v6426_v60 = vadd.f32 %v4993_v53, %v3428_v59 }
 0xdf2   :  { %v3439_v61 = vsel %vm2067_vm0, %v6426_v60, 0.0 }
 0xdf3   :  { %3440 = vadd.xlane.f32.xlu0 %v3439_v61  ;;  %v4720_v61 = vld [vmem:[%s6592_s10 + $0xb0] sm:$0xff] }
 0xdf4   :  { %3629 = vmatpush.msra.mxu2 %v4720_v61 }
 0xe5e   :  { %v3438_v63 = vpop.xlane.xlu1 %3437 }
 0xe5f   :  { %v3442_v28 = vmul.f32 %v3438_v63, %v5919_v50 }
 0xe61   :  { %v3444_v25 = vsub.f32 %v6421_v56, %v3442_v28  ;;  %v4719_v28 = vld [vmem:[%s6592_s10 + $0xa8] sm:$0xff] }
 0xe62   :  { %3630 = vmatpush.msra.mxu2 %v4719_v28 }
 0xe63   :  { %v3446_v1 = vmul.f32 %v3444_v25, %v3444_v25 }
 0xe65   :  { %v3448_v2 = vsel %vm2067_vm0, %v3446_v1, 0.0  ;;  %v4718_v1 = vld [vmem:[%s6592_s10 + $0xa0] sm:$0xff] }
 0xe66   :  { %3449 = vadd.xlane.f32.xlu2 %v3448_v2  ;;  %v3441_v4 = vpop.xlane.xlu0 %3440  ;;  %3631 = vmatpush.msra.mxu2 %v4718_v1 }
 0xe67   :  { %v3443_v5 = vmul.f32 %v3441_v4, %v5919_v50 }
 0xe69   :  { %v3445_v48 = vsub.f32 %v6426_v60, %v3443_v5 }
 0xe6b   :  { %v3447_v6 = vmul.f32 %v3445_v48, %v3445_v48 }
 0xe6d   :  { %v3451_v7 = vsel %vm2067_vm0, %v3447_v6, 0.0 }
 0xe6e   :  { %3452 = vadd.xlane.f32.xlu1 %v3451_v7  ;;  %v4716_v7 = vld [vmem:[%s6592_s10 + $0x90] sm:$0xff] }
 0xed9   :  { %v3450_v17 = vpop.xlane.xlu2 %3449 }
 0xeda   :  { %v3454_v18 = vmul.f32 %v3450_v17, %v5919_v50 }
 0xedc   :  { %v3456_v19 = vadd.f32 1e-06, %v3454_v18 }
 0xede   :  { %5083 = vrsqrt.f32 %v3456_v19  ;;  %vm3464_vm9 = vweird.f32 %v3456_v19 }
 0xee1   :  { %v3453_v42 = vpop.xlane.xlu1 %3452 }
 0xee2   :  { %v3455_v20 = vmul.f32 %v3453_v42, %v5919_v50 }
 0xee4   :  { %v5084_v21 = vpop.eup %5083  ;;  %v3457_v62 = vadd.f32 1e-06, %v3455_v20 }
 0xee5   :  { %v3459_v22 = vmul.f32 %v5084_v21, %v3456_v19  ;;  %vm3465_vm8 = vweird.f32 %v5084_v21 }
 0xee6   :  { %5085 = vrsqrt.f32 %v3457_v62  ;;  %vm3466_vm10 = vmor %vm3464_vm9, %vm3465_vm8  ;;  %vm3474_vm7 = vweird.f32 %v3457_v62 }
 0xee7   :  { %v3460_v23 = vmul.f32 %v5084_v21, %v3459_v22 }
 0xee9   :  { %v3461_v24 = vmul.f32 0.5, %v3460_v23 }
 0xeeb   :  { %v3462_v15 = vsub.f32 1.5, %v3461_v24 }
 0xeec   :  { %v5086_v26 = vpop.eup %5085 }
 0xeed   :  { %v3463_v27 = vmul.f32 %v5084_v21, %v3462_v15  ;;  %v3469_v29 = vmul.f32 %v5086_v26, %v3457_v62  ;;  %vm3475_vm6 = vweird.f32 %v5086_v26 }
 0xeee   :  { %vm3476_vm11 = vmor %vm3474_vm7, %vm3475_vm6 }
 0xeef   :  { %v3467_v30 = vsel %vm3466_vm10, %v5084_v21, %v3463_v27  ;;  %v3470_v9 = vmul.f32 %v5086_v26, %v3469_v29 }
 0xef0   :  { %v3478_v31 = vmul.f32 %v3467_v30, %v3444_v25 }
 0xef1   :  { %v3471_v32 = vmul.f32 0.5, %v3470_v9 }
 0xef2   :  { %4708 = vmatmul.msk.f32.vlgmr.msra.gmra.mxu1 %vm2067_vm0, %v3478_v31 }
 0xef3   :  { %v3472_v33 = vsub.f32 1.5, %v3471_v32 }
 0xef5   :  { %v3473_v35 = vmul.f32 %v5086_v26, %v3472_v33 }
 0xef7   :  { %v3477_v12 = vsel %vm3476_vm11, %v5086_v26, %v3473_v35 }
 0xef8   :  { %v3479_v36 = vmul.f32 %v3477_v12, %v3445_v48  ;;  %v4717_v48 = vld [vmem:[%s6592_s10 + $0x98] sm:$0xff] }
 0xef9   :  { %3632 = vmatpush.msra.mxu2 %v4717_v48 }
 0xefa   :  { %4709 = vmatmul.msk.f32.gmra.mxu1 %vm2067_vm0, %v3479_v36 }
 0xefb   :  { %3633 = vmatpush.msra.mxu2 %v4716_v7 }
 0xefd   :  { %3634 = vmatpush.msra.mxu2 %v4715_v13 }
 0xeff   :  { %3635 = vmatpush.msra.mxu2 %v4714_v14 }
 0xf6f   :  { %v3517_v41 = vpop.f32.mrf.mxu1 }
 0xf70   :  { %v6479_v44 = vadd.f32 %v4994_v39, %v3517_v41 }
 0xf72   :  { %v6485_v46 = vmul.f32 0.70710677, %v6479_v44 }
 0xf74   :  { %v3531_v49 = vand.u32 2147483647, %v6485_v46  ;;  %vm3527_vm5 = vcmp.lt.f32.partialorder %v6485_v46, 0.0 }
 0xf76   :  { %v3533_v52 = vmul.f32 0.3275911, %v3531_v49  ;;  %v3585_v19 = vsub.f32 0.0, %v3531_v49 }
 0xf77   :  { %v3520_v53 = vpop.f32.mrf.mxu1 }
 0xf78   :  { %v3535_v55 = vadd.f32 1.0, %v3533_v52  ;;  %v6497_v57 = vadd.f32 %v4994_v39, %v3520_v53  ;;  %v3587_v23 = vmul.f32 %v3585_v19, %v3531_v49 }
 0xf7a   :  { %5087 = vrcp.f32 %v3535_v55  ;;  %v6503_v59 = vmul.f32 0.70710677, %v6497_v57  ;;  %v3548_v8 = vand.u32 2147483648, %v3535_v55  ;;  %v3546_v11 = vand.u32 2147483647, %v3535_v55 }
 0xf7b   :  { %vm3542_vm13 = vweird.f32 %v3535_v55  ;;  %v3589_v9 = vmul.f32 1.442695, %v3587_v23  ;;  %v3524_v7 = vmul.f32 0.5, %v6497_v57  ;;  %v3702_v23 = vld [vmem:[%s6594_s12 + $0x30] sm:$0xff] }
 0xf7c   :  { %v3532_v63 = vand.u32 2147483647, %v6503_v59  ;;  %v3549_v0 = vor.u32 1.1754944e-38, %v3548_v8  ;;  %vm3547_vm15 = vcmp.eq.f32.partialorder %v3546_v11, 8.507059e+37  ;;  %vm3528_vm8 = vcmp.lt.f32.partialorder %v6503_v59, 0.0 }
 0xf7d   :  { %v3530_v48 = vsel %vm3528_vm8, -1.0, %v5109_v3 }
 0xf7e   :  { %v3534_v25 = vmul.f32 0.3275911, %v3532_v63  ;;  %v3586_v33 = vsub.f32 0.0, %v3532_v63 }
 0xf80   :  { %v5088_v2 = vpop.eup %5087  ;;  %v3536_v5 = vadd.f32 1.0, %v3534_v25  ;;  %v3588_v39 = vmul.f32 %v3586_v33, %v3532_v63  ;;  %v3523_v63 = vmul.f32 0.5, %v6479_v44  ;;  %v4995_v44 = vld [vmem:[%s6591_s11 + $0x1] ss:$0 sm:$0xff] }
 0xf81   :  { %v3538_v4 = vmul.f32 %v5088_v2, %v3535_v55  ;;  %vm3543_vm12 = vweird.f32 %v5088_v2  ;;  %v3529_v55 = vsel %vm3527_vm5, -1.0, %v5109_v3 }
 0xf82   :  { %5089 = vrcp.f32 %v3536_v5  ;;  %vm3544_vm14 = vmor %vm3542_vm13, %vm3543_vm12  ;;  %v3563_v22 = vand.u32 2147483648, %v3536_v5  ;;  %v3561_v15 = vand.u32 2147483647, %v3536_v5  ;;  %vm3557_vm2 = vweird.f32 %v3536_v5 }
 0xf83   :  { %v3539_v6 = vsub.f32 1.0, %v3538_v4  ;;  %5091 = vpow2.f32 %v3589_v9  ;;  %v3591_v47 = vmul.f32 1.442695, %v3588_v39 }
 0xf84   :  { %v3564_v30 = vor.u32 1.1754944e-38, %v3563_v22  ;;  %vm3562_vm4 = vcmp.eq.f32.partialorder %v3561_v15, 8.507059e+37  ;;  %v3700_v15 = vld [vmem:[%s6594_s12 + $0x20] sm:$0xff] }
 0xf85   :  { %v3540_v10 = vmul.f32 %v5088_v2, %v3539_v6  ;;  %5093 = vpow2.f32 %v3591_v47 }
 0xf87   :  { %v3541_v34 = vadd.f32 %v5088_v2, %v3540_v10 }
 0xf88   :  { %v5090_v16 = vpop.eup %5089 }
 0xf89   :  { %v3545_v17 = vsel %vm3544_vm14, %v5088_v2, %v3541_v34  ;;  %v3553_v42 = vmul.f32 %v5090_v16, %v3536_v5  ;;  %vm3558_vm1 = vweird.f32 %v5090_v16  ;;  %v5092_v49 = vpop.eup %5091 }
 0xf8a   :  { %v3550_v18 = vsel %vm3547_vm15, %v3549_v0, %v3545_v17  ;;  %vm3559_vm3 = vmor %vm3557_vm2, %vm3558_vm1 }
 0xf8b   :  { %v3567_v20 = vmul.f32 1.0614054, %v3550_v18  ;;  %v3554_v21 = vsub.f32 1.0, %v3553_v42  ;;  %v5094_v2 = vpop.eup %5093 }
 0xf8d   :  { %v4710_v62 = vadd.f32 -1.4531521, %v3567_v20  ;;  %v3555_v24 = vmul.f32 %v5090_v16, %v3554_v21 }
 0xf8f   :  { %v3571_v26 = vmul.f32 %v4710_v62, %v3550_v18  ;;  %v3556_v27 = vadd.f32 %v5090_v16, %v3555_v24  ;;  %v3701_v24 = vld [vmem:[%s6594_s12 + $0x28] sm:$0xff] }
 0xf91   :  { %v3573_v29 = vadd.f32 1.4214138, %v3571_v26  ;;  %v3560_v31 = vsel %vm3559_vm3, %v5090_v16, %v3556_v27  ;;  %v3699_v26 = vld [vmem:[%s6594_s12 + $0x18] sm:$0xff]  ;;  %v3698_v27 = vld [vmem:[%s6594_s12 + $0x10] sm:$0xff] }
 0xf92   :  { %v3565_v35 = vsel %vm3562_vm4, %v3564_v30, %v3560_v31  ;;  %v3696_v30 = vld [vmem:[%s6594_s12] sm:$0xff] }
 0xf93   :  { %v3575_v32 = vmul.f32 %v3573_v29, %v3550_v18  ;;  %v3568_v12 = vmul.f32 1.0614054, %v3565_v35  ;;  %v3697_v29 = vld [vmem:[%s6594_s12 + $0x8] sm:$0xff] }
 0xf95   :  { %v4712_v36 = vadd.f32 -0.28449672, %v3575_v32  ;;  %v4711_v37 = vadd.f32 -1.4531521, %v3568_v12 }
 0xf97   :  { %v3579_v38 = vmul.f32 %v4712_v36, %v3550_v18  ;;  %v3572_v40 = vmul.f32 %v4711_v37, %v3565_v35 }
 0xf99   :  { %v3581_v41 = vadd.f32 0.2548296, %v3579_v38  ;;  %v3574_v43 = vadd.f32 1.4214138, %v3572_v40 }
 0xf9b   :  { %v3583_v45 = vmul.f32 %v3581_v41, %v3550_v18  ;;  %v3576_v51 = vmul.f32 %v3574_v43, %v3565_v35 }
 0xf9d   :  { %v3593_v52 = vmul.f32 %v5092_v49, %v3583_v45  ;;  %v4713_v53 = vadd.f32 -0.28449672, %v3576_v51 }
 0xf9f   :  { %v3595_v54 = vsub.f32 1.0, %v3593_v52  ;;  %v3580_v58 = vmul.f32 %v4713_v53, %v3565_v35 }
 0xfa1   :  { %v3597_v61 = vmul.f32 %v3595_v54, %v3529_v55  ;;  %v3582_v28 = vadd.f32 0.2548296, %v3580_v58  ;;  %v4996_v58 = vld [vmem:[%s6593_s13] ss:$0 sm:$0xff] }
 0xfa3   :  { %v3599_v25 = vadd.f32 1.0, %v3597_v61  ;;  %v3584_v1 = vmul.f32 %v3582_v28, %v3565_v35 }
 0xfa5   :  { %v3601_v4 = vmul.f32 %v3599_v25, %v3523_v63  ;;  %v3594_v5 = vmul.f32 %v5094_v2, %v3584_v1 }
 0xfa7   :  { %3636 = vmatmul.f32.vlgmr.msra.gmra.mxu2 %v3601_v4  ;;  %v3596_v46 = vsub.f32 1.0, %v3594_v5 }
 0xfa9   :  { %v3598_v6 = vmul.f32 %v3596_v46, %v3530_v48 }
 0xfab   :  { %v3600_v8 = vadd.f32 1.0, %v3598_v6 }
 0xfad   :  { %v3602_v10 = vmul.f32 %v3600_v8, %v3524_v7 }
 0xfaf   :  { %3639 = vmatmul.f32.gmra.mxu2 %v3602_v10 }
0x102a   :  { %v3637_v11 = vpop.f32.mrf.mxu2 }
0x102b   :  { %v3643_v13 = vadd.f32 %v3637_v11, %v6421_v56 }
0x102d   :  { %v3650_v14 = vadd.f32 %v4995_v44, %v3643_v13 }
0x102f   :  { %v3652_v59 = vsel %vm2067_vm0, %v3650_v14, 0.0 }
0x1030   :  { %3653 = vadd.xlane.f32.xlu2 %v3652_v59 }
0x1032   :  { %v3640_v34 = vpop.f32.mrf.mxu2 }
0x1033   :  { %v3644_v3 = vadd.f32 %v3640_v34, %v6426_v60  ;;  %v3703_v60 = vld [vmem:[%s6594_s12 + $0x38] sm:$0xff] }
0x1034   :  { %3722 = vmatpush.msra.mxu3 %v3703_v60 }
0x1035   :  { %v3651_v0 = vadd.f32 %v4995_v44, %v3644_v3 }
0x1036   :  { %3723 = vmatpush.msra.mxu3 %v3702_v23 }
0x1037   :  { %v3655_v57 = vsel %vm2067_vm0, %v3651_v0, 0.0 }
0x1038   :  { %3656 = vadd.xlane.f32.xlu0 %v3655_v57  ;;  %3724 = vmatpush.msra.mxu3 %v3701_v24 }
0x103a   :  { %3725 = vmatpush.msra.mxu3 %v3700_v15 }
0x103c   :  { %3726 = vmatpush.msra.mxu3 %v3699_v26 }
0x103e   :  { %3727 = vmatpush.msra.mxu3 %v3698_v27 }
0x1040   :  { %3728 = vmatpush.msra.mxu3 %v3697_v29 }
0x1042   :  { %3729 = vmatpush.msra.mxu3 %v3696_v30 }
0x10a3   :  { %v3654_v16 = vpop.xlane.xlu2 %3653 }
0x10a4   :  { %v3658_v17 = vmul.f32 %v3654_v16, %v5919_v50 }
0x10a6   :  { %v3660_v18 = vsub.f32 %v3650_v14, %v3658_v17 }
0x10a8   :  { %v3662_v19 = vmul.f32 %v3660_v18, %v3660_v18 }
0x10aa   :  { %v3664_v42 = vsel %vm2067_vm0, %v3662_v19, 0.0 }
0x10ab   :  { %3665 = vadd.xlane.f32.xlu1 %v3664_v42  ;;  %v3657_v56 = vpop.xlane.xlu0 %3656 }
0x10ac   :  { %v3659_v20 = vmul.f32 %v3657_v56, %v5919_v50 }
0x10ae   :  { %v3661_v21 = vsub.f32 %v3651_v0, %v3659_v20 }
0x10b0   :  { %v3663_v62 = vmul.f32 %v3661_v21, %v3661_v21 }
0x10b2   :  { %v3667_v22 = vsel %vm2067_vm0, %v3663_v62, 0.0 }
0x10b3   :  { %3668 = vadd.xlane.f32.xlu2 %v3667_v22 }
0x111e   :  { %v3666_v9 = vpop.xlane.xlu1 %3665 }
0x111f   :  { %v3670_v31 = vmul.f32 %v3666_v9, %v5919_v50 }
0x1121   :  { %v3672_v32 = vadd.f32 1e-06, %v3670_v31 }
0x1123   :  { %5095 = vrsqrt.f32 %v3672_v32  ;;  %vm3680_vm10 = vweird.f32 %v3672_v32 }
0x1126   :  { %v3669_v33 = vpop.xlane.xlu2 %3668 }
0x1127   :  { %v3671_v35 = vmul.f32 %v3669_v33, %v5919_v50 }
0x1129   :  { %v5096_v12 = vpop.eup %5095  ;;  %v3673_v37 = vadd.f32 1e-06, %v3671_v35 }
0x112a   :  { %v3675_v36 = vmul.f32 %v5096_v12, %v3672_v32  ;;  %vm3681_vm9 = vweird.f32 %v5096_v12 }
0x112b   :  { %5097 = vrsqrt.f32 %v3673_v37  ;;  %vm3682_vm6 = vmor %vm3680_vm10, %vm3681_vm9  ;;  %vm3690_vm11 = vweird.f32 %v3673_v37 }
0x112c   :  { %v3676_v38 = vmul.f32 %v5096_v12, %v3675_v36 }
0x112e   :  { %v3677_v39 = vmul.f32 0.5, %v3676_v38 }
0x1130   :  { %v3678_v40 = vsub.f32 1.5, %v3677_v39 }
0x1131   :  { %v5098_v41 = vpop.eup %5097 }
0x1132   :  { %v3679_v43 = vmul.f32 %v5096_v12, %v3678_v40  ;;  %v3685_v45 = vmul.f32 %v5098_v41, %v3673_v37  ;;  %vm3691_vm7 = vweird.f32 %v5098_v41 }
0x1133   :  { %vm3692_vm12 = vmor %vm3690_vm11, %vm3691_vm7 }
0x1134   :  { %v3683_v47 = vsel %vm3682_vm6, %v5096_v12, %v3679_v43  ;;  %v3686_v51 = vmul.f32 %v5098_v41, %v3685_v45 }
0x1135   :  { %v3694_v49 = vmul.f32 %v3683_v47, %v3660_v18 }
0x1136   :  { %v3687_v52 = vmul.f32 0.5, %v3686_v51 }
0x1137   :  { %4731 = vmatmul.msk.f32.vlgmr.msra.gmra.mxu3 %vm2067_vm0, %v3694_v49 }
0x1138   :  { %v3688_v50 = vsub.f32 1.5, %v3687_v52 }
0x113a   :  { %v3689_v53 = vmul.f32 %v5098_v41, %v3688_v50 }
0x113c   :  { %v3693_v54 = vsel %vm3692_vm12, %v5098_v41, %v3689_v53 }
0x113d   :  { %v3695_v55 = vmul.f32 %v3693_v54, %v3661_v21 }
0x113f   :  { %4732 = vmatmul.msk.f32.gmra.mxu3 %vm2067_vm0, %v3695_v55 }
0x11ba   :  { %v3731_v61 = vpop.f32.mrf.mxu3 }
0x11bb   :  { %v3732_v28 = vadd.f32 %v4996_v58, %v3731_v61 }
0x11bd   :  { %3737 = vst [vmem:[%s6595_s14] sm:$0xff] %v3732_v28 }
0x11c2   :  { %v3734_v63 = vpop.f32.mrf.mxu3 }
0x11c3   :  { %v3735_v25 = vadd.f32 %v4996_v58, %v3734_v63 }
0x11c5   :  { %3738 = vst [vmem:[%s6595_s14 + $0x8] sm:$0xff] %v3735_v25 }

</bundles_post_ra>
